<compile_context>
chip_gen: v6e
topology: v6e:2x2x1
jax: 0.10.0
libtpu: 0.0.40
codegen_flags: <defaults>
</compile_context>

<pallas_src>
import numpy as np
import jax
import jax.numpy as jnp
from jax.experimental import pallas as pl
from jax.experimental.pallas import tpu as pltpu

KH = KW = 5
IMG = 28
OUT = IMG - KH + 1        # 24
P = OUT * OUT             # 576 conv output positions
NTAP = KH * KW            # 25 conv taps
NC = 16                   # conv channels
H1 = 256                  # fc1 width
PROJ = 64                 # InfoNCE projection dim
XDIM = IMG * IMG          # 784
GRP = 4                   # conv channels per fc1 grid step (K tile = 4*576 = 2304)


# ----------------------------------------------------------------------------
# Fused kernel: conv+BN+ReLU + x-projection (prologue) -> fc1 accumulation ->
#               fc2 + InfoNCE loss (epilogue)
# ----------------------------------------------------------------------------
def _fused_kernel(pt_ref, wcT_ref, scale_ref, shift_ref,
                  w1_ref, b1_ref, w2_ref, b2_ref,
                  xf_ref, wpx1_ref, bpx1_ref, wpx2_ref, bpx2_ref,
                  wpl_ref, bpl_ref,
                  score_ref, loss_ref,
                  conv_ref, acc_ref, px_ref):
    g = pl.program_id(0)
    ng = pl.num_programs(0)
    batch = pt_ref.shape[0]
    grp = w1_ref.shape[0]

    # ---- prologue (first grid step) -----------------------------------------
    @pl.when(g == 0)
    def _():
        acc_ref[...] = jnp.zeros_like(acc_ref)
        # conv + folded BN + ReLU via MXU: per sample, (16,25) @ (25,576).
        wcT = wcT_ref[...]          # (NC, NTAP)
        scale = scale_ref[...]      # (NC, 1)
        shift = shift_ref[...]      # (NC, 1)  (conv bias folded in)
        for b in range(batch):      # static unroll, B tiny
            r = jnp.dot(wcT, pt_ref[b], preferred_element_type=jnp.float32)   # (NC, P)
            conv_ref[:, b, :] = jnp.maximum(r * scale + shift, 0.0)
        # InfoNCE x-projection (natural batch-major orientation); its inputs are
        # resident before step 0, so this hides under the early w1r weight DMAs.
        xb = xf_ref[...].astype(jnp.bfloat16)                                  # (B, 784)
        h = jnp.maximum(
            jnp.dot(xb, wpx1_ref[...], preferred_element_type=jnp.float32)
            + bpx1_ref[...], 0.0)                                              # (B, 256)
        px_ref[...] = (jnp.dot(h.astype(jnp.bfloat16), wpx2_ref[...],
                               preferred_element_type=jnp.float32)
                       + bpx2_ref[...])                                        # (B, 64)

    # ---- fc1 partial sums for this step's channel group (AvgPool folded in w1r) ----
    acc = acc_ref[...]
    for cc in range(grp):                                   # static unroll (4 dots / step)
        c = g * grp + cc
        acc = acc + jnp.dot(conv_ref[c].astype(jnp.bfloat16), w1_ref[cc],
                            preferred_element_type=jnp.float32)   # (B,576)@(576,256)
    acc_ref[...] = acc

    # ---- epilogue (last grid step): fc1 bias/ReLU, fc2+sigmoid, InfoNCE loss ----
    @pl.when(g == ng - 1)
    def _():
        latent = jnp.maximum(acc + b1_ref[...], 0.0)                           # (B, 256)
        s = jnp.dot(latent, w2_ref[...],
                    preferred_element_type=jnp.float32) + b2_ref[...]          # (B, 1)
        score_ref[...] = jax.nn.sigmoid(s)

        plat = jnp.dot(latent.astype(jnp.bfloat16), wpl_ref[...],
                       preferred_element_type=jnp.float32) + bpl_ref[...]      # (B, 64)
        px = px_ref[...]                                                       # (B, 64)
        # sm[i, j] = plat[i] . px[j]  (contract last dims; no in-kernel transpose)
        sm = jax.lax.dot_general(plat, px, (((1,), (1,)), ((), ())),
                                 preferred_element_type=jnp.float32)           # (B, B)
        m = jnp.max(sm, axis=1, keepdims=True)
        lse = m + jnp.log(jnp.sum(jnp.exp(sm - m), axis=1, keepdims=True))     # (B, 1)
        n = sm.shape[0]
        rows = jax.lax.broadcasted_iota(jnp.int32, (n, n), 0)
        cols = jax.lax.broadcasted_iota(jnp.int32, (n, n), 1)
        diag = jnp.sum(jnp.where(rows == cols, sm, 0.0), axis=1, keepdims=True)
        loss_ref[...] = jnp.sum(lse - diag, axis=0, keepdims=True) / n


def fused_forward(pt, xf, p, batch):
    ng = NC // GRP
    in_specs = [
        pl.BlockSpec((batch, NTAP, P), lambda g: (0, 0, 0)),   # im2col patches (B,25,576)
        pl.BlockSpec((NC, NTAP), lambda g: (0, 0)),            # wcT           (16, 25)
        pl.BlockSpec((NC, 1), lambda g: (0, 0)),               # BN scale col
        pl.BlockSpec((NC, 1), lambda g: (0, 0)),               # BN shift col (+conv bias)
        pl.BlockSpec((GRP, P, H1), lambda g: (g, 0, 0)),       # w1r K-tile (4,576,256) bf16
        pl.BlockSpec((1, H1), lambda g: (0, 0)),               # b1
        pl.BlockSpec((H1, 1), lambda g: (0, 0)),               # w2
        pl.BlockSpec((1, 1), lambda g: (0, 0)),                # b2
        pl.BlockSpec((batch, XDIM), lambda g: (0, 0)),         # xf (B, 784)
        pl.BlockSpec((XDIM, H1), lambda g: (0, 0)),            # wpx1 (784,256) bf16
        pl.BlockSpec((1, H1), lambda g: (0, 0)),               # bpx1
        pl.BlockSpec((H1, PROJ), lambda g: (0, 0)),            # wpx2 (256,64) bf16
        pl.BlockSpec((1, PROJ), lambda g: (0, 0)),             # bpx2
        pl.BlockSpec((H1, PROJ), lambda g: (0, 0)),            # wpl (256,64) bf16
        pl.BlockSpec((1, PROJ), lambda g: (0, 0)),             # bpl
    ]
    out_specs = (pl.BlockSpec((batch, 1), lambda g: (0, 0)),
                 pl.BlockSpec((1, 1), lambda g: (0, 0)))
    return pl.pallas_call(
        _fused_kernel,
        out_shape=(jax.ShapeDtypeStruct((batch, 1), jnp.float32),
                   jax.ShapeDtypeStruct((1, 1), jnp.float32)),
        grid_spec=pltpu.PrefetchScalarGridSpec(
            num_scalar_prefetch=0,
            grid=(ng,),
            in_specs=in_specs,
            out_specs=out_specs,
            scratch_shapes=[pltpu.VMEM((NC, batch, P), jnp.float32),   # conv+BN+ReLU result
                            pltpu.VMEM((batch, H1), jnp.float32),      # fc1 accumulator
                            pltpu.VMEM((batch, PROJ), jnp.float32)]),  # x-projection (px)
        compiler_params=pltpu.CompilerParams(
            dimension_semantics=("arbitrary",),
            vmem_limit_bytes=32 * 1024 * 1024),
    )(pt, p['wcT'], p['bn_scale_col'], p['bn_shift_col'],
      p['w1r'], p['b1'], p['w2'], p['b2'],
      xf, p['wpx1_bf16'], p['bpx1'], p['wpx2_bf16'], p['bpx2'],
      p['wpl_bf16'], p['bpl'])


# ----------------------------------------------------------------------------
# Glue: parameter setup, full forward
# ----------------------------------------------------------------------------
def init_params(key):
    ks = jax.random.split(key, 14)

    def lin(k, fan_in, fan_out):
        return jax.random.normal(k, (fan_in, fan_out), jnp.float32) / np.sqrt(fan_in)

    wc = jax.random.normal(ks[0], (NTAP, NC), jnp.float32) / 5.0  # Conv2d(1,16,5), tap=di*5+dj
    bc = 0.1 * jax.random.normal(ks[1], (1, NC), jnp.float32)
    gamma = 1.0 + 0.1 * jax.random.normal(ks[2], (1, NC), jnp.float32)
    beta = 0.1 * jax.random.normal(ks[3], (1, NC), jnp.float32)
    eps = 1e-5
    # TODO(synk): BatchNorm2d eval fold assumes running_mean=0, running_var=1 (fresh module).
    bn_scale = gamma / jnp.sqrt(1.0 + eps)
    bn_shift = beta

    w1 = lin(ks[4], 12 * 12 * NC, H1)        # fc1, PyTorch flatten rows c*144 + ph*12 + pw
    b1 = 0.1 * jax.random.normal(ks[5], (1, H1), jnp.float32)
    w2 = lin(ks[6], H1, 1)
    b2 = 0.1 * jax.random.normal(ks[7], (1, 1), jnp.float32)

    wpx1 = lin(ks[8], XDIM, H1)
    bpx1 = 0.1 * jax.random.normal(ks[9], (1, H1), jnp.float32)
    wpx2 = lin(ks[10], H1, PROJ)
    bpx2 = 0.1 * jax.random.normal(ks[11], (1, PROJ), jnp.float32)
    wpl = lin(ks[12], H1, PROJ)
    bpl = 0.1 * jax.random.normal(ks[13], (1, PROJ), jnp.float32)

    params = dict(wc=wc, bc=bc, bn_scale=bn_scale, bn_shift=bn_shift,
                  w1=w1, b1=b1, w2=w2, b2=b2,
                  wpx1=wpx1, bpx1=bpx1, wpx2=wpx2, bpx2=bpx2, wpl=wpl, bpl=bpl)

    # --- kernel-form parameters -------------------------------------------------
    params['wcT'] = wc.T                                      # (16, 25) for the MXU conv
    params['bn_scale_col'] = bn_scale.T                       # (16, 1)
    params['bn_shift_col'] = (bn_scale * bc + bn_shift).T     # (16, 1)  conv bias folded
    # fold AvgPool2d(2,2) exactly into fc1 weights, regrouped by (channel, h*24+w); bf16 stream
    hh, ww = np.meshgrid(np.arange(OUT), np.arange(OUT), indexing='ij')
    src = (np.arange(NC)[:, None, None] * 144 + (hh // 2) * 12 + (ww // 2)).reshape(NC, P)
    params['w1r'] = jnp.asarray(0.25 * np.asarray(w1)[src]).astype(jnp.bfloat16)  # (16,576,256)
    # InfoNCE projection weights streamed in bf16 (HBM-bandwidth bound kernel)
    params['wpx1_bf16'] = wpx1.astype(jnp.bfloat16)           # (784, 256)
    params['wpx2_bf16'] = wpx2.astype(jnp.bfloat16)           # (256, 64)
    params['wpl_bf16'] = wpl.astype(jnp.bfloat16)             # (256, 64)
    return params


def weighted_mapping_1_forward(x, params):
    batch = x.shape[0]
    xi = x[:, 0]                                              # (B, 28, 28)
    # im2col, sample-major: pt[b, di*5+dj, i*24+j] = x[b, i+di, j+dj]
    taps = [xi[:, di:di + OUT, dj:dj + OUT].reshape(batch, P)
            for di in range(KH) for dj in range(KW)]
    pt = jnp.stack(taps, axis=1)                              # (B, 25, 576)
    xf = x.reshape(batch, XDIM)                               # (B, 784) lane-dense
    score, loss = fused_forward(pt, xf, params, batch)
    return score, loss[0, 0]


# ----------------------------------------------------------------------------
# Pure-JAX reference (literal: conv -> BN -> ReLU -> pool -> NCHW flatten -> fcs)
# ----------------------------------------------------------------------------
def im2col_5x5(x):
    batch = x.shape[0]
    xi = x[:, 0]
    cols = [xi[:, di:di + OUT, dj:dj + OUT] for di in range(KH) for dj in range(KW)]
    pch = jnp.stack(cols, axis=-1)                 # (B, 24, 24, 25)
    return pch.reshape(batch, P, NTAP)


def reference_forward(x, params):
    batch = x.shape[0]
    patches = im2col_5x5(x)
    conv = jnp.einsum('bpk,kc->bpc', patches, params['wc']) + params['bc']
    conv = conv * params['bn_scale'] + params['bn_shift']
    conv = jnp.maximum(conv, 0.0).reshape(batch, OUT, OUT, NC)
    pooled = conv.reshape(batch, 12, 2, 12, 2, NC).mean(axis=(2, 4))   # (B,12,12,16)
    flat = pooled.transpose(0, 3, 1, 2).reshape(batch, 12 * 12 * NC)   # PyTorch (C,H,W) flatten
    latent = jnp.maximum(flat @ params['w1'] + params['b1'], 0.0)
    score = jax.nn.sigmoid(latent @ params['w2'] + params['b2'])
    xf = x.reshape(batch, XDIM)
    px = jnp.maximum(xf @ params['wpx1'] + params['bpx1'], 0.0) @ params['wpx2'] + params['bpx2']
    plat = latent @ params['wpl'] + params['bpl']
    sm = plat @ px.T
    lse = jax.scipy.special.logsumexp(sm, axis=1)
    loss = jnp.mean(lse - jnp.diagonal(sm))
    return score, loss


if __name__ == "__main__":
    key = jax.random.PRNGKey(0)
    kx, kp = jax.random.split(key)
    batch = 4
    x = jax.random.normal(kx, (batch, 1, IMG, IMG), jnp.float32)
    params = init_params(kp)

    score, loss = jax.jit(weighted_mapping_1_forward)(x, params)
    jax.block_until_ready((score, loss))

    ref_score, ref_loss = reference_forward(x, params)
    assert score.shape == (batch, 1)
    # Tolerances account for the bf16 weight stream (f32 accumulation throughout).
    np.testing.assert_allclose(np.asarray(score), np.asarray(ref_score), rtol=1e-2, atol=1e-2)
    np.testing.assert_allclose(float(loss), float(ref_loss), rtol=2e-2, atol=2e-2)

    print("KERNEL_OK")
</pallas_src>

<mosaic_0001>
module attributes {stable_mosaic.version = 11 : i64} {
  func.func @_fused_kernel(%arg0: i32, %arg1: memref<4x25x576xf32, #tpu.memory_space<vmem>>, %arg2: memref<16x25xf32, #tpu.memory_space<vmem>>, %arg3: memref<16x1xf32, #tpu.memory_space<vmem>>, %arg4: memref<16x1xf32, #tpu.memory_space<vmem>>, %arg5: memref<4x576x256xbf16, #tpu.memory_space<vmem>>, %arg6: memref<1x256xf32, #tpu.memory_space<vmem>>, %arg7: memref<256x1xf32, #tpu.memory_space<vmem>>, %arg8: memref<1x1xf32, #tpu.memory_space<vmem>>, %arg9: memref<4x784xf32, #tpu.memory_space<vmem>>, %arg10: memref<784x256xbf16, #tpu.memory_space<vmem>>, %arg11: memref<1x256xf32, #tpu.memory_space<vmem>>, %arg12: memref<256x64xbf16, #tpu.memory_space<vmem>>, %arg13: memref<1x64xf32, #tpu.memory_space<vmem>>, %arg14: memref<256x64xbf16, #tpu.memory_space<vmem>>, %arg15: memref<1x64xf32, #tpu.memory_space<vmem>>, %arg16: memref<4x1xf32, #tpu.memory_space<vmem>>, %arg17: memref<1x1xf32, #tpu.memory_space<vmem>>, %arg18: memref<16x4x576xf32, #tpu.memory_space<vmem>>, %arg19: memref<4x256xf32, #tpu.memory_space<vmem>>, %arg20: memref<4x64xf32, #tpu.memory_space<vmem>>) attributes {dimension_semantics = [#tpu.dimension_semantics<arbitrary>], iteration_bounds = array<i64: 4>, scalar_prefetch = 0 : i64, scratch_operands = 3 : i64, tpu.core_type = #tpu.core_type<tc>, window_params = [{pipeline_mode = #tpu.pipeline_mode<synchronous>, transform_indices = @transform_0, window_bounds = array<i64: 4, 25, 576>}, {pipeline_mode = #tpu.pipeline_mode<synchronous>, transform_indices = @transform_1, window_bounds = array<i64: 16, 25>}, {pipeline_mode = #tpu.pipeline_mode<synchronous>, transform_indices = @transform_2, window_bounds = array<i64: 16, 1>}, {pipeline_mode = #tpu.pipeline_mode<synchronous>, transform_indices = @transform_3, window_bounds = array<i64: 16, 1>}, {transform_indices = @transform_4, window_bounds = array<i64: 4, 576, 256>}, {pipeline_mode = #tpu.pipeline_mode<synchronous>, transform_indices = @transform_5, window_bounds = array<i64: 1, 256>}, {pipeline_mode = #tpu.pipeline_mode<synchronous>, transform_indices = @transform_6, window_bounds = array<i64: 256, 1>}, {pipeline_mode = #tpu.pipeline_mode<synchronous>, transform_indices = @transform_7, window_bounds = array<i64: 1, 1>}, {pipeline_mode = #tpu.pipeline_mode<synchronous>, transform_indices = @transform_8, window_bounds = array<i64: 4, 784>}, {pipeline_mode = #tpu.pipeline_mode<synchronous>, transform_indices = @transform_9, window_bounds = array<i64: 784, 256>}, {pipeline_mode = #tpu.pipeline_mode<synchronous>, transform_indices = @transform_10, window_bounds = array<i64: 1, 256>}, {pipeline_mode = #tpu.pipeline_mode<synchronous>, transform_indices = @transform_11, window_bounds = array<i64: 256, 64>}, {pipeline_mode = #tpu.pipeline_mode<synchronous>, transform_indices = @transform_12, window_bounds = array<i64: 1, 64>}, {pipeline_mode = #tpu.pipeline_mode<synchronous>, transform_indices = @transform_13, window_bounds = array<i64: 256, 64>}, {pipeline_mode = #tpu.pipeline_mode<synchronous>, transform_indices = @transform_14, window_bounds = array<i64: 1, 64>}, {pipeline_mode = #tpu.pipeline_mode<synchronous>, transform_indices = @transform_15, window_bounds = array<i64: 4, 1>}, {pipeline_mode = #tpu.pipeline_mode<synchronous>, transform_indices = @transform_16, window_bounds = array<i64: 1, 1>}]} {
    %c0_i32 = arith.constant 0 : i32
    %0 = arith.cmpi eq, %arg0, %c0_i32 : i32
    %1 = arith.extui %0 : i1 to i32
    %c0_i32_0 = arith.constant 0 : i32
    %2 = arith.cmpi ne, %1, %c0_i32_0 : i32
    scf.if %2 {
      %cst_30 = arith.constant 0.000000e+00 : f32
      %48 = vector.broadcast %cst_30 : f32 to vector<4x256xf32>
      %c0_31 = arith.constant 0 : index
      %c0_32 = arith.constant 0 : index
      %49 = vector.load %arg19[%c0_31, %c0_32] : memref<4x256xf32, #tpu.memory_space<vmem>>, vector<4x256xf32>
      tpu.vector_store %arg19[%c0_31, %c0_32], %48 {strides = array<i32>} : memref<4x256xf32, #tpu.memory_space<vmem>>, vector<4x256xf32>,
      %c0_33 = arith.constant 0 : index
      %c0_34 = arith.constant 0 : index
      %50 = vector.load %arg2[%c0_33, %c0_34] : memref<16x25xf32, #tpu.memory_space<vmem>>, vector<16x25xf32>
      %c0_35 = arith.constant 0 : index
      %c0_36 = arith.constant 0 : index
      %51 = vector.load %arg3[%c0_35, %c0_36] : memref<16x1xf32, #tpu.memory_space<vmem>>, vector<16x1xf32>
      %c0_37 = arith.constant 0 : index
      %c0_38 = arith.constant 0 : index
      %52 = vector.load %arg4[%c0_37, %c0_38] : memref<16x1xf32, #tpu.memory_space<vmem>>, vector<16x1xf32>
      %c0_39 = arith.constant 0 : index
      %c0_40 = arith.constant 0 : index
      %c0_41 = arith.constant 0 : index
      %53 = vector.load %arg1[%c0_39, %c0_40, %c0_41] : memref<4x25x576xf32, #tpu.memory_space<vmem>>, vector<1x25x576xf32>
      %54 = vector.shape_cast %53 : vector<1x25x576xf32> to vector<25x576xf32>
      %cst_42 = arith.constant dense<0.000000e+00> : vector<16x576xf32>
      %55 = tpu.matmul %50, %54, %cst_42 {dimension_numbers = #tpu.dot_dimension_numbers<[1], [0], [0], [1], [0, 0, 1, 1], [], []>} : vector<16x25xf32>, vector<25x576xf32>, vector<16x576xf32> -> vector<16x576xf32>
      %56 = vector.broadcast %51 : vector<16x1xf32> to vector<16x576xf32>
      %57 = arith.mulf %55, %56 : vector<16x576xf32>
      %58 = vector.broadcast %52 : vector<16x1xf32> to vector<16x576xf32>
      %59 = arith.addf %57, %58 : vector<16x576xf32>
      %cst_43 = arith.constant 0.000000e+00 : f32
      %60 = vector.broadcast %cst_43 : f32 to vector<16x576xf32>
      %61 = arith.maximumf %59, %60 : vector<16x576xf32>
      %c0_44 = arith.constant 0 : index
      %c0_45 = arith.constant 0 : index
      %c0_46 = arith.constant 0 : index
      %62 = vector.load %arg18[%c0_44, %c0_45, %c0_46] : memref<16x4x576xf32, #tpu.memory_space<vmem>>, vector<16x1x576xf32>
      %63 = vector.shape_cast %62 : vector<16x1x576xf32> to vector<16x576xf32>
      %64 = vector.shape_cast %61 : vector<16x576xf32> to vector<16x1x576xf32>
      tpu.vector_store %arg18[%c0_44, %c0_45, %c0_46], %64 {strides = array<i32>} : memref<16x4x576xf32, #tpu.memory_space<vmem>>, vector<16x1x576xf32>,
      %c1_47 = arith.constant 1 : index
      %c0_48 = arith.constant 0 : index
      %c0_49 = arith.constant 0 : index
      %65 = vector.load %arg1[%c1_47, %c0_48, %c0_49] : memref<4x25x576xf32, #tpu.memory_space<vmem>>, vector<1x25x576xf32>
      %66 = vector.shape_cast %65 : vector<1x25x576xf32> to vector<25x576xf32>
      %cst_50 = arith.constant dense<0.000000e+00> : vector<16x576xf32>
      %67 = tpu.matmul %50, %66, %cst_50 {dimension_numbers = #tpu.dot_dimension_numbers<[1], [0], [0], [1], [0, 0, 1, 1], [], []>} : vector<16x25xf32>, vector<25x576xf32>, vector<16x576xf32> -> vector<16x576xf32>
      %68 = vector.broadcast %51 : vector<16x1xf32> to vector<16x576xf32>
      %69 = arith.mulf %67, %68 : vector<16x576xf32>
      %70 = vector.broadcast %52 : vector<16x1xf32> to vector<16x576xf32>
      %71 = arith.addf %69, %70 : vector<16x576xf32>
      %cst_51 = arith.constant 0.000000e+00 : f32
      %72 = vector.broadcast %cst_51 : f32 to vector<16x576xf32>
      %73 = arith.maximumf %71, %72 : vector<16x576xf32>
      %c0_52 = arith.constant 0 : index
      %c1_53 = arith.constant 1 : index
      %c0_54 = arith.constant 0 : index
      %74 = vector.load %arg18[%c0_52, %c1_53, %c0_54] : memref<16x4x576xf32, #tpu.memory_space<vmem>>, vector<16x1x576xf32>
      %75 = vector.shape_cast %74 : vector<16x1x576xf32> to vector<16x576xf32>
      %76 = vector.shape_cast %73 : vector<16x576xf32> to vector<16x1x576xf32>
      tpu.vector_store %arg18[%c0_52, %c1_53, %c0_54], %76 {strides = array<i32>} : memref<16x4x576xf32, #tpu.memory_space<vmem>>, vector<16x1x576xf32>,
      %c2_55 = arith.constant 2 : index
      %c0_56 = arith.constant 0 : index
      %c0_57 = arith.constant 0 : index
      %77 = vector.load %arg1[%c2_55, %c0_56, %c0_57] : memref<4x25x576xf32, #tpu.memory_space<vmem>>, vector<1x25x576xf32>
      %78 = vector.shape_cast %77 : vector<1x25x576xf32> to vector<25x576xf32>
      %cst_58 = arith.constant dense<0.000000e+00> : vector<16x576xf32>
      %79 = tpu.matmul %50, %78, %cst_58 {dimension_numbers = #tpu.dot_dimension_numbers<[1], [0], [0], [1], [0, 0, 1, 1], [], []>} : vector<16x25xf32>, vector<25x576xf32>, vector<16x576xf32> -> vector<16x576xf32>
      %80 = vector.broadcast %51 : vector<16x1xf32> to vector<16x576xf32>
      %81 = arith.mulf %79, %80 : vector<16x576xf32>
      %82 = vector.broadcast %52 : vector<16x1xf32> to vector<16x576xf32>
      %83 = arith.addf %81, %82 : vector<16x576xf32>
      %cst_59 = arith.constant 0.000000e+00 : f32
      %84 = vector.broadcast %cst_59 : f32 to vector<16x576xf32>
      %85 = arith.maximumf %83, %84 : vector<16x576xf32>
      %c0_60 = arith.constant 0 : index
      %c2_61 = arith.constant 2 : index
      %c0_62 = arith.constant 0 : index
      %86 = vector.load %arg18[%c0_60, %c2_61, %c0_62] : memref<16x4x576xf32, #tpu.memory_space<vmem>>, vector<16x1x576xf32>
      %87 = vector.shape_cast %86 : vector<16x1x576xf32> to vector<16x576xf32>
      %88 = vector.shape_cast %85 : vector<16x576xf32> to vector<16x1x576xf32>
      tpu.vector_store %arg18[%c0_60, %c2_61, %c0_62], %88 {strides = array<i32>} : memref<16x4x576xf32, #tpu.memory_space<vmem>>, vector<16x1x576xf32>,
      %c3_63 = arith.constant 3 : index
      %c0_64 = arith.constant 0 : index
      %c0_65 = arith.constant 0 : index
      %89 = vector.load %arg1[%c3_63, %c0_64, %c0_65] : memref<4x25x576xf32, #tpu.memory_space<vmem>>, vector<1x25x576xf32>
      %90 = vector.shape_cast %89 : vector<1x25x576xf32> to vector<25x576xf32>
      %cst_66 = arith.constant dense<0.000000e+00> : vector<16x576xf32>
      %91 = tpu.matmul %50, %90, %cst_66 {dimension_numbers = #tpu.dot_dimension_numbers<[1], [0], [0], [1], [0, 0, 1, 1], [], []>} : vector<16x25xf32>, vector<25x576xf32>, vector<16x576xf32> -> vector<16x576xf32>
      %92 = vector.broadcast %51 : vector<16x1xf32> to vector<16x576xf32>
      %93 = arith.mulf %91, %92 : vector<16x576xf32>
      %94 = vector.broadcast %52 : vector<16x1xf32> to vector<16x576xf32>
      %95 = arith.addf %93, %94 : vector<16x576xf32>
      %cst_67 = arith.constant 0.000000e+00 : f32
      %96 = vector.broadcast %cst_67 : f32 to vector<16x576xf32>
      %97 = arith.maximumf %95, %96 : vector<16x576xf32>
      %c0_68 = arith.constant 0 : index
      %c3_69 = arith.constant 3 : index
      %c0_70 = arith.constant 0 : index
      %98 = vector.load %arg18[%c0_68, %c3_69, %c0_70] : memref<16x4x576xf32, #tpu.memory_space<vmem>>, vector<16x1x576xf32>
      %99 = vector.shape_cast %98 : vector<16x1x576xf32> to vector<16x576xf32>
      %100 = vector.shape_cast %97 : vector<16x576xf32> to vector<16x1x576xf32>
      tpu.vector_store %arg18[%c0_68, %c3_69, %c0_70], %100 {strides = array<i32>} : memref<16x4x576xf32, #tpu.memory_space<vmem>>, vector<16x1x576xf32>,
      %c0_71 = arith.constant 0 : index
      %c0_72 = arith.constant 0 : index
      %101 = vector.load %arg9[%c0_71, %c0_72] : memref<4x784xf32, #tpu.memory_space<vmem>>, vector<4x784xf32>
      %102 = arith.truncf %101 : vector<4x784xf32> to vector<4x784xbf16>
      %c0_73 = arith.constant 0 : index
      %c0_74 = arith.constant 0 : index
      %103 = vector.load %arg10[%c0_73, %c0_74] : memref<784x256xbf16, #tpu.memory_space<vmem>>, vector<784x256xbf16>
      %cst_75 = arith.constant dense<0.000000e+00> : vector<4x256xf32>
      %104 = tpu.matmul %102, %103, %cst_75 {dimension_numbers = #tpu.dot_dimension_numbers<[1], [0], [0], [1], [0, 0, 1, 1], [], []>} : vector<4x784xbf16>, vector<784x256xbf16>, vector<4x256xf32> -> vector<4x256xf32>
      %c0_76 = arith.constant 0 : index
      %c0_77 = arith.constant 0 : index
      %105 = vector.load %arg11[%c0_76, %c0_77] : memref<1x256xf32, #tpu.memory_space<vmem>>, vector<1x256xf32>
      %106 = vector.broadcast %105 : vector<1x256xf32> to vector<4x256xf32>
      %107 = arith.addf %104, %106 : vector<4x256xf32>
      %cst_78 = arith.constant 0.000000e+00 : f32
      %108 = vector.broadcast %cst_78 : f32 to vector<4x256xf32>
      %109 = arith.maximumf %107, %108 : vector<4x256xf32>
      %110 = arith.truncf %109 : vector<4x256xf32> to vector<4x256xbf16>
      %c0_79 = arith.constant 0 : index
      %c0_80 = arith.constant 0 : index
      %111 = vector.load %arg12[%c0_79, %c0_80] : memref<256x64xbf16, #tpu.memory_space<vmem>>, vector<256x64xbf16>
      %cst_81 = arith.constant dense<0.000000e+00> : vector<4x64xf32>
      %112 = tpu.matmul %110, %111, %cst_81 {dimension_numbers = #tpu.dot_dimension_numbers<[1], [0], [0], [1], [0, 0, 1, 1], [], []>} : vector<4x256xbf16>, vector<256x64xbf16>, vector<4x64xf32> -> vector<4x64xf32>
      %c0_82 = arith.constant 0 : index
      %c0_83 = arith.constant 0 : index
      %113 = vector.load %arg13[%c0_82, %c0_83] : memref<1x64xf32, #tpu.memory_space<vmem>>, vector<1x64xf32>
      %114 = vector.broadcast %113 : vector<1x64xf32> to vector<4x64xf32>
      %115 = arith.addf %112, %114 : vector<4x64xf32>
      %c0_84 = arith.constant 0 : index
      %c0_85 = arith.constant 0 : index
      %116 = vector.load %arg20[%c0_84, %c0_85] : memref<4x64xf32, #tpu.memory_space<vmem>>, vector<4x64xf32>
      tpu.vector_store %arg20[%c0_84, %c0_85], %115 {strides = array<i32>} : memref<4x64xf32, #tpu.memory_space<vmem>>, vector<4x64xf32>,
    } else {
    }
    %c0 = arith.constant 0 : index
    %c0_1 = arith.constant 0 : index
    %3 = vector.load %arg19[%c0, %c0_1] : memref<4x256xf32, #tpu.memory_space<vmem>>, vector<4x256xf32>
    %c4_i32 = arith.constant 4 : i32
    %4 = arith.muli %arg0, %c4_i32 : i32
    %c0_i32_2 = arith.constant 0 : i32
    %5 = arith.addi %4, %c0_i32_2 : i32
    %6 = arith.index_cast %5 : i32 to index
    %c0_3 = arith.constant 0 : index
    %c0_4 = arith.constant 0 : index
    %7 = vector.load %arg18[%6, %c0_3, %c0_4] : memref<16x4x576xf32, #tpu.memory_space<vmem>>, vector<1x4x576xf32>
    %8 = vector.shape_cast %7 : vector<1x4x576xf32> to vector<4x576xf32>
    %9 = arith.truncf %8 : vector<4x576xf32> to vector<4x576xbf16>
    %c0_5 = arith.constant 0 : index
    %c0_6 = arith.constant 0 : index
    %c0_7 = arith.constant 0 : index
    %10 = vector.load %arg5[%c0_5, %c0_6, %c0_7] : memref<4x576x256xbf16, #tpu.memory_space<vmem>>, vector<1x576x256xbf16>
    %11 = vector.shape_cast %10 : vector<1x576x256xbf16> to vector<576x256xbf16>
    %cst = arith.constant dense<0.000000e+00> : vector<4x256xf32>
    %12 = tpu.matmul %9, %11, %cst {dimension_numbers = #tpu.dot_dimension_numbers<[1], [0], [0], [1], [0, 0, 1, 1], [], []>} : vector<4x576xbf16>, vector<576x256xbf16>, vector<4x256xf32> -> vector<4x256xf32>
    %13 = arith.addf %3, %12 : vector<4x256xf32>
    %c4_i32_8 = arith.constant 4 : i32
    %14 = arith.muli %arg0, %c4_i32_8 : i32
    %c1_i32 = arith.constant 1 : i32
    %15 = arith.addi %14, %c1_i32 : i32
    %16 = arith.index_cast %15 : i32 to index
    %c0_9 = arith.constant 0 : index
    %c0_10 = arith.constant 0 : index
    %17 = vector.load %arg18[%16, %c0_9, %c0_10] : memref<16x4x576xf32, #tpu.memory_space<vmem>>, vector<1x4x576xf32>
    %18 = vector.shape_cast %17 : vector<1x4x576xf32> to vector<4x576xf32>
    %19 = arith.truncf %18 : vector<4x576xf32> to vector<4x576xbf16>
    %c1 = arith.constant 1 : index
    %c0_11 = arith.constant 0 : index
    %c0_12 = arith.constant 0 : index
    %20 = vector.load %arg5[%c1, %c0_11, %c0_12] : memref<4x576x256xbf16, #tpu.memory_space<vmem>>, vector<1x576x256xbf16>
    %21 = vector.shape_cast %20 : vector<1x576x256xbf16> to vector<576x256xbf16>
    %cst_13 = arith.constant dense<0.000000e+00> : vector<4x256xf32>
    %22 = tpu.matmul %19, %21, %cst_13 {dimension_numbers = #tpu.dot_dimension_numbers<[1], [0], [0], [1], [0, 0, 1, 1], [], []>} : vector<4x576xbf16>, vector<576x256xbf16>, vector<4x256xf32> -> vector<4x256xf32>
    %23 = arith.addf %13, %22 : vector<4x256xf32>
    %c4_i32_14 = arith.constant 4 : i32
    %24 = arith.muli %arg0, %c4_i32_14 : i32
    %c2_i32 = arith.constant 2 : i32
    %25 = arith.addi %24, %c2_i32 : i32
    %26 = arith.index_cast %25 : i32 to index
    %c0_15 = arith.constant 0 : index
    %c0_16 = arith.constant 0 : index
    %27 = vector.load %arg18[%26, %c0_15, %c0_16] : memref<16x4x576xf32, #tpu.memory_space<vmem>>, vector<1x4x576xf32>
    %28 = vector.shape_cast %27 : vector<1x4x576xf32> to vector<4x576xf32>
    %29 = arith.truncf %28 : vector<4x576xf32> to vector<4x576xbf16>
    %c2 = arith.constant 2 : index
    %c0_17 = arith.constant 0 : index
    %c0_18 = arith.constant 0 : index
    %30 = vector.load %arg5[%c2, %c0_17, %c0_18] : memref<4x576x256xbf16, #tpu.memory_space<vmem>>, vector<1x576x256xbf16>
    %31 = vector.shape_cast %30 : vector<1x576x256xbf16> to vector<576x256xbf16>
    %cst_19 = arith.constant dense<0.000000e+00> : vector<4x256xf32>
    %32 = tpu.matmul %29, %31, %cst_19 {dimension_numbers = #tpu.dot_dimension_numbers<[1], [0], [0], [1], [0, 0, 1, 1], [], []>} : vector<4x576xbf16>, vector<576x256xbf16>, vector<4x256xf32> -> vector<4x256xf32>
    %33 = arith.addf %23, %32 : vector<4x256xf32>
    %c4_i32_20 = arith.constant 4 : i32
    %34 = arith.muli %arg0, %c4_i32_20 : i32
    %c3_i32 = arith.constant 3 : i32
    %35 = arith.addi %34, %c3_i32 : i32
    %36 = arith.index_cast %35 : i32 to index
    %c0_21 = arith.constant 0 : index
    %c0_22 = arith.constant 0 : index
    %37 = vector.load %arg18[%36, %c0_21, %c0_22] : memref<16x4x576xf32, #tpu.memory_space<vmem>>, vector<1x4x576xf32>
    %38 = vector.shape_cast %37 : vector<1x4x576xf32> to vector<4x576xf32>
    %39 = arith.truncf %38 : vector<4x576xf32> to vector<4x576xbf16>
    %c3 = arith.constant 3 : index
    %c0_23 = arith.constant 0 : index
    %c0_24 = arith.constant 0 : index
    %40 = vector.load %arg5[%c3, %c0_23, %c0_24] : memref<4x576x256xbf16, #tpu.memory_space<vmem>>, vector<1x576x256xbf16>
    %41 = vector.shape_cast %40 : vector<1x576x256xbf16> to vector<576x256xbf16>
    %cst_25 = arith.constant dense<0.000000e+00> : vector<4x256xf32>
    %42 = tpu.matmul %39, %41, %cst_25 {dimension_numbers = #tpu.dot_dimension_numbers<[1], [0], [0], [1], [0, 0, 1, 1], [], []>} : vector<4x576xbf16>, vector<576x256xbf16>, vector<4x256xf32> -> vector<4x256xf32>
    %43 = arith.addf %33, %42 : vector<4x256xf32>
    %c0_26 = arith.constant 0 : index
    %c0_27 = arith.constant 0 : index
    %44 = vector.load %arg19[%c0_26, %c0_27] : memref<4x256xf32, #tpu.memory_space<vmem>>, vector<4x256xf32>
    tpu.vector_store %arg19[%c0_26, %c0_27], %43 {strides = array<i32>} : memref<4x256xf32, #tpu.memory_space<vmem>>, vector<4x256xf32>,
    %c3_i32_28 = arith.constant 3 : i32
    %45 = arith.cmpi eq, %arg0, %c3_i32_28 : i32
    %46 = arith.extui %45 : i1 to i32
    %c0_i32_29 = arith.constant 0 : i32
    %47 = arith.cmpi ne, %46, %c0_i32_29 : i32
    scf.if %47 {
      %c0_30 = arith.constant 0 : index
      %c0_31 = arith.constant 0 : index
      %48 = vector.load %arg6[%c0_30, %c0_31] : memref<1x256xf32, #tpu.memory_space<vmem>>, vector<1x256xf32>
      %49 = vector.broadcast %48 : vector<1x256xf32> to vector<4x256xf32>
      %50 = arith.addf %43, %49 : vector<4x256xf32>
      %cst_32 = arith.constant 0.000000e+00 : f32
      %51 = vector.broadcast %cst_32 : f32 to vector<4x256xf32>
      %52 = arith.maximumf %50, %51 : vector<4x256xf32>
      %c0_33 = arith.constant 0 : index
      %c0_34 = arith.constant 0 : index
      %53 = vector.load %arg7[%c0_33, %c0_34] : memref<256x1xf32, #tpu.memory_space<vmem>>, vector<256x1xf32>
      %cst_35 = arith.constant dense<0.000000e+00> : vector<4x1xf32>
      %54 = tpu.matmul %52, %53, %cst_35 {dimension_numbers = #tpu.dot_dimension_numbers<[1], [0], [0], [1], [0, 0, 1, 1], [], []>} : vector<4x256xf32>, vector<256x1xf32>, vector<4x1xf32> -> vector<4x1xf32>
      %c0_36 = arith.constant 0 : index
      %c0_37 = arith.constant 0 : index
      %55 = vector.load %arg8[%c0_36, %c0_37] : memref<1x1xf32, #tpu.memory_space<vmem>>, vector<1x1xf32>
      %56 = vector.broadcast %55 : vector<1x1xf32> to vector<4x1xf32>
      %57 = arith.addf %54, %56 : vector<4x1xf32>
      %58 = arith.negf %57 : vector<4x1xf32>
      %59 = math.exp %58 : vector<4x1xf32>
      %cst_38 = arith.constant 1.000000e+00 : f32
      %60 = vector.broadcast %cst_38 : f32 to vector<4x1xf32>
      %61 = arith.addf %60, %59 : vector<4x1xf32>
      %62 = arith.divf %60, %61 : vector<4x1xf32>
      %c0_39 = arith.constant 0 : index
      %c0_40 = arith.constant 0 : index
      %63 = vector.load %arg16[%c0_39, %c0_40] : memref<4x1xf32, #tpu.memory_space<vmem>>, vector<4x1xf32>
      tpu.vector_store %arg16[%c0_39, %c0_40], %62 {strides = array<i32>} : memref<4x1xf32, #tpu.memory_space<vmem>>, vector<4x1xf32>,
      %64 = arith.truncf %52 : vector<4x256xf32> to vector<4x256xbf16>
      %c0_41 = arith.constant 0 : index
      %c0_42 = arith.constant 0 : index
      %65 = vector.load %arg14[%c0_41, %c0_42] : memref<256x64xbf16, #tpu.memory_space<vmem>>, vector<256x64xbf16>
      %cst_43 = arith.constant dense<0.000000e+00> : vector<4x64xf32>
      %66 = tpu.matmul %64, %65, %cst_43 {dimension_numbers = #tpu.dot_dimension_numbers<[1], [0], [0], [1], [0, 0, 1, 1], [], []>} : vector<4x256xbf16>, vector<256x64xbf16>, vector<4x64xf32> -> vector<4x64xf32>
      %c0_44 = arith.constant 0 : index
      %c0_45 = arith.constant 0 : index
      %67 = vector.load %arg15[%c0_44, %c0_45] : memref<1x64xf32, #tpu.memory_space<vmem>>, vector<1x64xf32>
      %68 = vector.broadcast %67 : vector<1x64xf32> to vector<4x64xf32>
      %69 = arith.addf %66, %68 : vector<4x64xf32>
      %c0_46 = arith.constant 0 : index
      %c0_47 = arith.constant 0 : index
      %70 = vector.load %arg20[%c0_46, %c0_47] : memref<4x64xf32, #tpu.memory_space<vmem>>, vector<4x64xf32>
      %cst_48 = arith.constant dense<0.000000e+00> : vector<4x4xf32>
      %71 = tpu.matmul %69, %70, %cst_48 {dimension_numbers = #tpu.dot_dimension_numbers<[1], [1], [0], [0], [0, 0, 1, 0], [], []>} : vector<4x64xf32>, vector<4x64xf32>, vector<4x4xf32> -> vector<4x4xf32>
      %cst_49 = arith.constant dense<0xFF800000> : vector<4xf32>
      %72 = vector.multi_reduction <maximumf>, %71, %cst_49 [1] : vector<4x4xf32> to vector<4xf32>
      %73 = vector.shape_cast %72 : vector<4xf32> to vector<4x1xf32>
      %74 = vector.broadcast %73 : vector<4x1xf32> to vector<4x4xf32>
      %75 = arith.subf %71, %74 : vector<4x4xf32>
      %76 = math.exp %75 : vector<4x4xf32>
      %cst_50 = arith.constant dense<0.000000e+00> : vector<4xf32>
      %77 = vector.multi_reduction <add>, %76, %cst_50 [1] : vector<4x4xf32> to vector<4xf32>
      %78 = vector.shape_cast %77 : vector<4xf32> to vector<4x1xf32>
      %79 = math.log %78 : vector<4x1xf32>
      %80 = arith.addf %73, %79 : vector<4x1xf32>
      %81 = tpu.iota {dimensions = array<i32: 0>} : vector<4x4xi32>
      %82 = tpu.iota {dimensions = array<i32: 1>} : vector<4x4xi32>
      %83 = arith.cmpi eq, %81, %82 : vector<4x4xi32>
      %cst_51 = arith.constant 0.000000e+00 : f32
      %84 = vector.broadcast %cst_51 : f32 to vector<4x4xf32>
      %85 = arith.select %83, %71, %84 : vector<4x4xi1>, vector<4x4xf32>
      %cst_52 = arith.constant dense<0.000000e+00> : vector<4xf32>
      %86 = vector.multi_reduction <add>, %85, %cst_52 [1] : vector<4x4xf32> to vector<4xf32>
      %87 = vector.shape_cast %86 : vector<4xf32> to vector<4x1xf32>
      %88 = arith.subf %80, %87 : vector<4x1xf32>
      %cst_53 = arith.constant dense<0.000000e+00> : vector<1xf32>
      %89 = vector.multi_reduction <add>, %88, %cst_53 [0] : vector<4x1xf32> to vector<1xf32>
      %90 = vector.shape_cast %89 : vector<1xf32> to vector<1x1xf32>
      %cst_54 = arith.constant 4.000000e+00 : f32
      %91 = vector.broadcast %cst_54 : f32 to vector<1x1xf32>
      %92 = arith.divf %90, %91 : vector<1x1xf32>
      %c0_55 = arith.constant 0 : index
      %c0_56 = arith.constant 0 : index
      %93 = vector.load %arg17[%c0_55, %c0_56] : memref<1x1xf32, #tpu.memory_space<vmem>>, vector<1x1xf32>
      tpu.vector_store %arg17[%c0_55, %c0_56], %92 {strides = array<i32>} : memref<1x1xf32, #tpu.memory_space<vmem>>, vector<1x1xf32>,
    } else {
    }
    return
  }
  func.func @transform_0(%arg0: i32) -> (i32, i32, i32) {
    %c0_i32 = arith.constant 0 : i32
    %c0_i32_0 = arith.constant 0 : i32
    %c0_i32_1 = arith.constant 0 : i32
    %c0_i32_2 = arith.constant 0 : i32
    return %c0_i32, %c0_i32_0, %c0_i32_1 : i32, i32, i32
  }
  func.func @transform_1(%arg0: i32) -> (i32, i32) {
    %c0_i32 = arith.constant 0 : i32
    %c0_i32_0 = arith.constant 0 : i32
    %c0_i32_1 = arith.constant 0 : i32
    return %c0_i32, %c0_i32_0 : i32, i32
  }
  func.func @transform_2(%arg0: i32) -> (i32, i32) {
    %c0_i32 = arith.constant 0 : i32
    %c0_i32_0 = arith.constant 0 : i32
    %c0_i32_1 = arith.constant 0 : i32
    return %c0_i32, %c0_i32_0 : i32, i32
  }
  func.func @transform_3(%arg0: i32) -> (i32, i32) {
    %c0_i32 = arith.constant 0 : i32
    %c0_i32_0 = arith.constant 0 : i32
    %c0_i32_1 = arith.constant 0 : i32
    return %c0_i32, %c0_i32_0 : i32, i32
  }
  func.func @transform_4(%arg0: i32) -> (i32, i32, i32) {
    %c0_i32 = arith.constant 0 : i32
    %c0_i32_0 = arith.constant 0 : i32
    %c0_i32_1 = arith.constant 0 : i32
    return %arg0, %c0_i32, %c0_i32_0 : i32, i32, i32
  }
  func.func @transform_5(%arg0: i32) -> (i32, i32) {
    %c0_i32 = arith.constant 0 : i32
    %c0_i32_0 = arith.constant 0 : i32
    %c0_i32_1 = arith.constant 0 : i32
    return %c0_i32, %c0_i32_0 : i32, i32
  }
  func.func @transform_6(%arg0: i32) -> (i32, i32) {
    %c0_i32 = arith.constant 0 : i32
    %c0_i32_0 = arith.constant 0 : i32
    %c0_i32_1 = arith.constant 0 : i32
    return %c0_i32, %c0_i32_0 : i32, i32
  }
  func.func @transform_7(%arg0: i32) -> (i32, i32) {
    %c0_i32 = arith.constant 0 : i32
    %c0_i32_0 = arith.constant 0 : i32
    %c0_i32_1 = arith.constant 0 : i32
    return %c0_i32, %c0_i32_0 : i32, i32
  }
  func.func @transform_8(%arg0: i32) -> (i32, i32) {
    %c0_i32 = arith.constant 0 : i32
    %c0_i32_0 = arith.constant 0 : i32
    %c0_i32_1 = arith.constant 0 : i32
    return %c0_i32, %c0_i32_0 : i32, i32
  }
  func.func @transform_9(%arg0: i32) -> (i32, i32) {
    %c0_i32 = arith.constant 0 : i32
    %c0_i32_0 = arith.constant 0 : i32
    %c0_i32_1 = arith.constant 0 : i32
    return %c0_i32, %c0_i32_0 : i32, i32
  }
  func.func @transform_10(%arg0: i32) -> (i32, i32) {
    %c0_i32 = arith.constant 0 : i32
    %c0_i32_0 = arith.constant 0 : i32
    %c0_i32_1 = arith.constant 0 : i32
    return %c0_i32, %c0_i32_0 : i32, i32
  }
  func.func @transform_11(%arg0: i32) -> (i32, i32) {
    %c0_i32 = arith.constant 0 : i32
    %c0_i32_0 = arith.constant 0 : i32
    %c0_i32_1 = arith.constant 0 : i32
    return %c0_i32, %c0_i32_0 : i32, i32
  }
  func.func @transform_12(%arg0: i32) -> (i32, i32) {
    %c0_i32 = arith.constant 0 : i32
    %c0_i32_0 = arith.constant 0 : i32
    %c0_i32_1 = arith.constant 0 : i32
    return %c0_i32, %c0_i32_0 : i32, i32
  }
  func.func @transform_13(%arg0: i32) -> (i32, i32) {
    %c0_i32 = arith.constant 0 : i32
    %c0_i32_0 = arith.constant 0 : i32
    %c0_i32_1 = arith.constant 0 : i32
    return %c0_i32, %c0_i32_0 : i32, i32
  }
  func.func @transform_14(%arg0: i32) -> (i32, i32) {
    %c0_i32 = arith.constant 0 : i32
    %c0_i32_0 = arith.constant 0 : i32
    %c0_i32_1 = arith.constant 0 : i32
    return %c0_i32, %c0_i32_0 : i32, i32
  }
  func.func @transform_15(%arg0: i32) -> (i32, i32) {
    %c0_i32 = arith.constant 0 : i32
    %c0_i32_0 = arith.constant 0 : i32
    %c0_i32_1 = arith.constant 0 : i32
    return %c0_i32, %c0_i32_0 : i32, i32
  }
  func.func @transform_16(%arg0: i32) -> (i32, i32) {
    %c0_i32 = arith.constant 0 : i32
    %c0_i32_0 = arith.constant 0 : i32
    %c0_i32_1 = arith.constant 0 : i32
    return %c0_i32, %c0_i32_0 : i32, i32
  }
}

</mosaic_0001>

<bundles_post_ra>
// kernel: weighted_mapping_1_forward.1
= control target key start
LH: loop header
LB: loop body
LE: loop exit
PB: predicated region body
PF: predicated region fallthrough
CT: control target
= control target key end

     0   :  { %s10174_s0 = inlined_call_operand.vmem [shape: f32[4,25,576], index: 0, kind: input, shape index: {}]   ;;  %s10175_s1 = inlined_call_operand.vmem [shape: f32[16,25], index: 1, kind: input, shape index: {}]   ;;  %s10176_s2 = inlined_call_operand.vmem [shape: f32[16,1], index: 2, kind: input, shape index: {}]   ;;  %s10177_s3 = inlined_call_operand.vmem [shape: f32[16,1], index: 3, kind: input, shape index: {}]   ;;  %s10178_s4 = inlined_call_operand.vmem [shape: bf16[16,576,256], index: 4, kind: input, shape index: {}]   ;;  %s10179_s5 = inlined_call_operand.vmem [shape: f32[1,256], index: 5, kind: input, shape index: {}]   ;;  %s10180_s6 = inlined_call_operand.vmem [shape: f32[256,1], index: 6, kind: input, shape index: {}]   ;;  %s10181_s7 = inlined_call_operand.<no memory space> [shape: f32[1,1], index: 7, kind: input, shape index: {}]   ;;  %s10182_s8 = inlined_call_operand.vmem [shape: f32[4,784], index: 8, kind: input, shape index: {}]   ;;  %s10183_s9 = inlined_call_operand.vmem [shape: bf16[784,256], index: 9, kind: input, shape index: {}]   ;;  %s10184_s10 = inlined_call_operand.vmem [shape: f32[1,256], index: 10, kind: input, shape index: {}]   ;;  %s10185_s11 = inlined_call_operand.vmem [shape: bf16[256,64], index: 11, kind: input, shape index: {}]   ;;  %s10186_s12 = inlined_call_operand.vmem [shape: f32[1,64], index: 12, kind: input, shape index: {}]   ;;  %s10187_s13 = inlined_call_operand.vmem [shape: bf16[256,64], index: 13, kind: input, shape index: {}]   ;;  %s10188_s14 = inlined_call_operand.vmem [shape: f32[1,64], index: 14, kind: input, shape index: {}]   ;;  %s10189_s15 = inlined_call_operand.vmem [shape: f32[4,1], index: 15, kind: output, shape index: {0}]   ;;  %s10190_s16 = inlined_call_operand.hbm [shape: f32[1,1], index: 16, kind: output, shape index: {1}]  }
   0x1   :  { %10192 = sst [smem:[#allocation9_spill]] %s10174_s0  ;;  %v22_v0 = vstv %s10181_s7 }
   0x2   :  { %23 = vst [vmem:[#allocation5] sm:$0x1] %v22_v0 }
   0x3   :  { %24 = vsyncpa [#allocation7], 0  ;;  %s8414_s23 = smov 0  }
   0x4 LB: > { %s8420_s24 = sadd.s32 4294967295, %s8317_s23   ;;  %p6698_p0 = scmp.ge.s32.totalorder %s8317_s23, 1  ;;  %s8317_s23 = sphi %s8414_s23, %s30_s23  }
   0x5   : > { %p460_p1 = scmp.lt.s32.totalorder %s8317_s23, 5 }
   0x7   : > { %p461_p2 = pnand %p6698_p0, %p460_p1 }
   0x8   : > { %s6699_s7 = sshll.u32 (!%p461_p2), %s8420_s24, 2  ;;  %p6701_p4 = scmp.ne.s32.totalorder (!%p461_p2), %s8420_s24, 0 }
   0x9   : > { %464 = sbr.rel (%p461_p2) target bundleno = 1874 (0x752), region = 80  ;;  %p507_p3 = scmp.lt.s32.totalorder (!%p461_p2), %s6699_s7, 15 }
   0xe   : > { %s10197_s7 = smov (!%p507_p3, %s6699_s7), 15  ;;  %517 = sbr.rel (%p6701_p4) target bundleno = 609 (0x261), region = 84 }
   0xf   : > { %s7629_s25 = smul.u32 576, %s10197_s7  ;;  %s10193_s0 = sld [smem:[#allocation9_spill]] (!%p6701_p4) }
  0x11   : > { %s8428_s28 = scalar_lea.vmem %s10178_s4, %s7629_s25 }
  0x13   : > { %vm552_vm0 = vcmask 1040384   ;;  %v8319_v9 = vmov 0.0   ;;  %v8475_v14 = vld [vmem:[%s10175_s1] sm:$0xff]  ;;  %vm545_vm1 = vcmask 203776   ;;  %v8484_v16 = vld [vmem:[%s10175_s1 + $0x8] sm:$0xff]  ;;  %vm3523_vm2 = vcmask 130048  }
  0x14   : > { %518 = vst [vmem:[#allocation3] sm:$0xff] %v8319_v9  ;;  %632 = vmatprep.mubr.f32.mxu1 %v8319_v9  ;;  %7588 = vmatprep.mubr.msk.f32.mxu0 %vm545_vm1, %v8475_v14  ;;  %vm3870_vm4 = vcmask 519168  }
  0x15   : > { %v541_v1 = vld [vmem:[%s10193_s0 + $0x80] sm:$0x1]  ;;  %v544_v2 = vld [vmem:[%s10193_s0 + $0x98] sm:$0x1]  ;;  %v539_v5 = vld [vmem:[%s10193_s0 + $0x70] sm:$0xff] }
  0x16   : > { %v536_v3 = vld [vmem:[%s10193_s0 + $0x58] sm:$0xff]  ;;  %6702 = vmatprep.subr.msk.mxu1 %vm552_vm0, %v541_v1  ;;  %7580 = vmatprep.subr.msk.mxu0 %vm552_vm0, %v544_v2  ;;  %v535_v6 = vld [vmem:[%s10193_s0 + $0x50] sm:$0xff]  ;;  %v534_v8 = vld [vmem:[%s10193_s0 + $0x48] sm:$0xff] }
  0x17   : > { %v540_v4 = vld [vmem:[%s10193_s0 + $0x78] sm:$0x1]  ;;  %7581 = vmatpush3.msk.msra.mxu0 %vm552_vm0, %v544_v2  ;;  %v531_v7 = vld [vmem:[%s10193_s0 + $0x30] sm:$0xff]  ;;  %v530_v10 = vld [vmem:[%s10193_s0 + $0x28] sm:$0xff] }
  0x18   : > { %6703 = vmatpush1.msk.msra.mxu1 %vm552_vm0, %v540_v4  ;;  %7582 = vmatprep.subr.mxu0 %v539_v5  ;;  %v526_v11 = vld [vmem:[%s10193_s0 + $0x8] sm:$0xff]  ;;  %v529_v12 = vld [vmem:[%s10193_s0 + $0x20] sm:$0xff]  ;;  %v543_v15 = vld [vmem:[%s10193_s0 + $0x90] sm:$0x1] }
  0x19   : > { %594 = vmatprep.subr.mxu1 %v536_v3  ;;  %7583 = vmatpush3.msra.mxu0 %v539_v5  ;;  %v525_v13 = vld [vmem:[%s10193_s0] sm:$0xff]  ;;  %v6731_v17 = vld [vmem:[%s10193_s0 + $0x130] sm:$0x1]  ;;  %v542_v18 = vld [vmem:[%s10193_s0 + $0x88] sm:$0x1] }
  0x1a   : > { %595 = vmatpush1.msra.mxu1 %v535_v6  ;;  %7584 = vmatprep.subr.mxu0 %v534_v8  ;;  %v6730_v19 = vld [vmem:[%s10193_s0 + $0x128] sm:$0x1]  ;;  %v537_v22 = vld [vmem:[%s10193_s0 + $0x60] sm:$0xff]  ;;  %v532_v26 = vld [vmem:[%s10193_s0 + $0x38] sm:$0xff] }
  0x1b   : > { %596 = vmatprep.subr.mxu1 %v531_v7  ;;  %7585 = vmatpush3.msra.mxu0 %v534_v8  ;;  %v538_v20 = vld [vmem:[%s10193_s0 + $0x68] sm:$0xff]  ;;  %v6725_v23 = vld [vmem:[%s10193_s0 + $0x100] sm:$0xff]  ;;  %v6720_v27 = vld [vmem:[%s10193_s0 + $0xd8] sm:$0xff] }
  0x1c   : > { %597 = vmatpush1.msra.mxu1 %v530_v10  ;;  %7586 = vmatprep.subr.mxu0 %v529_v12  ;;  %v6726_v21 = vld [vmem:[%s10193_s0 + $0x108] sm:$0xff]  ;;  %v533_v24 = vld [vmem:[%s10193_s0 + $0x40] sm:$0xff]  ;;  %v528_v28 = vld [vmem:[%s10193_s0 + $0x18] sm:$0xff] }
  0x1d   : > { %598 = vmatprep.subr.mxu1 %v526_v11  ;;  %7587 = vmatpush3.msra.mxu0 %v529_v12  ;;  %v6721_v25 = vld [vmem:[%s10193_s0 + $0xe0] sm:$0xff]  ;;  %v6716_v29 = vld [vmem:[%s10193_s0 + $0xb8] sm:$0xff]  ;;  %v527_v30 = vld [vmem:[%s10193_s0 + $0x10] sm:$0xff] }
  0x1e   : > { %599 = vmatpush1.msra.mxu1 %v525_v13  ;;  %7589 = vmatmul.mubr.msk.f32.vlgmr.msra.gmra.mxu0 %vm545_vm1, %v8484_v16  ;;  %v6715_v31 = vld [vmem:[%s10193_s0 + $0xb0] sm:$0xff]  ;;  %v6729_v32 = vld [vmem:[%s10193_s0 + $0x120] sm:$0x1]  ;;  %v6728_v34 = vld [vmem:[%s10193_s0 + $0x118] sm:$0x1] }
  0x1f   : > { %6704 = vmatmul.mubr.msk.f32.vlgmr.msra.gmra.mxu1 %vm545_vm1, %v8475_v14  ;;  %6706 = vmatprep.subr.msk.mxu1 %vm552_vm0, %v543_v15  ;;  %v6760_v33 = vld [vmem:[%s10193_s0 + $0x1c0] sm:$0x1]  ;;  %v6759_v35 = vld [vmem:[%s10193_s0 + $0x1b8] sm:$0x1]  ;;  %v6723_v38 = vld [vmem:[%s10193_s0 + $0xf0] sm:$0xff] }
  0x20   : > { %6737 = vmatprep.subr.msk.mxu0 %vm552_vm0, %v6731_v17  ;;  %6707 = vmatpush1.msk.msra.mxu1 %vm552_vm0, %v542_v18  ;;  %v6724_v36 = vld [vmem:[%s10193_s0 + $0xf8] sm:$0xff]  ;;  %v6754_v39 = vld [vmem:[%s10193_s0 + $0x190] sm:$0xff]  ;;  %v6718_v42 = vld [vmem:[%s10193_s0 + $0xc8] sm:$0xff] }
  0x21   : > { %6738 = vmatpush1.msk.msra.mxu0 %vm552_vm0, %v6730_v19  ;;  %671 = vmatprep.subr.mxu1 %v538_v20  ;;  %v6755_v37 = vld [vmem:[%s10193_s0 + $0x198] sm:$0xff]  ;;  %v6719_v40 = vld [vmem:[%s10193_s0 + $0xd0] sm:$0xff]  ;;  %v6749_v43 = vld [vmem:[%s10193_s0 + $0x168] sm:$0xff] }
  0x22   : > { %1281 = vmatprep.subr.mxu0 %v6726_v21  ;;  %638 = vmatprep.mubr.f32.mxu1 %v8319_v9  ;;  %v6750_v41 = vld [vmem:[%s10193_s0 + $0x170] sm:$0xff]  ;;  %v6714_v44 = vld [vmem:[%s10193_s0 + $0xa8] sm:$0xff]  ;;  %v6713_v46 = vld [vmem:[%s10193_s0 + $0xa0] sm:$0xff] }
  0x23   : > { %672 = vmatpush1.msra.mxu1 %v537_v22  ;;  %1282 = vmatpush1.msra.mxu0 %v6725_v23  ;;  %v6745_v45 = vld [vmem:[%s10193_s0 + $0x148] sm:$0xff]  ;;  %v6744_v47 = vld [vmem:[%s10193_s0 + $0x140] sm:$0xff]  ;;  %v6732_v48 = vld [vmem:[%s10193_s0 + $0x138] sm:$0x1] }
  0x24   : > { %6705 = vmatmul.mubr.msk.f32.gmra.mxu1 %vm545_vm1, %v8484_v16  ;;  %673 = vmatprep.subr.mxu1 %v533_v24  ;;  %v6763_v49 = vld [vmem:[%s10193_s0 + $0x1d8] sm:$0x1]  ;;  %v6727_v50 = vld [vmem:[%s10193_s0 + $0x110] sm:$0xff]  ;;  %v6722_v52 = vld [vmem:[%s10193_s0 + $0xe8] sm:$0xff] }
  0x25   : > { %1283 = vmatprep.subr.mxu0 %v6721_v25  ;;  %674 = vmatpush1.msra.mxu1 %v532_v26  ;;  %v6758_v51 = vld [vmem:[%s10193_s0 + $0x1b0] sm:$0xff]  ;;  %v6753_v53 = vld [vmem:[%s10193_s0 + $0x188] sm:$0xff]  ;;  %v6717_v54 = vld [vmem:[%s10193_s0 + $0xc0] sm:$0xff] }
  0x26   : > { %1284 = vmatpush1.msra.mxu0 %v6720_v27  ;;  %675 = vmatprep.subr.mxu1 %v528_v28  ;;  %v6748_v55 = vld [vmem:[%s10193_s0 + $0x160] sm:$0xff]  ;;  %v6762_v56 = vld [vmem:[%s10193_s0 + $0x1d0] sm:$0x1]  ;;  %v6761_v58 = vld [vmem:[%s10193_s0 + $0x1c8] sm:$0x1] }
  0x27   : > { %1285 = vmatprep.subr.mxu0 %v6716_v29  ;;  %676 = vmatpush1.msra.mxu1 %v527_v30  ;;  %v6793_v57 = vld [vmem:[%s10193_s0 + $0x270] sm:$0x1]  ;;  %v6792_v59 = vld [vmem:[%s10193_s0 + $0x268] sm:$0x1]  ;;  %v6756_v62 = vld [vmem:[%s10193_s0 + $0x1a0] sm:$0xff] }
  0x28   : > { %709 = vmatprep.mubr.f32.mxu1 %v8319_v9  ;;  %1286 = vmatpush1.msra.mxu0 %v6715_v31  ;;  %v6757_v60 = vld [vmem:[%s10193_s0 + $0x1a8] sm:$0xff]  ;;  %v6787_v63 = vld [vmem:[%s10193_s0 + $0x240] sm:$0xff]  ;;  %v6751_v2 = vld [vmem:[%s10193_s0 + $0x178] sm:$0xff] }
  0x29   : > { %1319 = vmatprep.mubr.f32.mxu0 %v8319_v9  ;;  %6708 = vmatmul.mubr.msk.f32.vlgmr.msra.gmra.mxu1 %vm545_vm1, %v8475_v14  ;;  %v6788_v61 = vld [vmem:[%s10193_s0 + $0x248] sm:$0xff]  ;;  %v6752_v0 = vld [vmem:[%s10193_s0 + $0x180] sm:$0xff]  ;;  %v6782_v3 = vld [vmem:[%s10193_s0 + $0x218] sm:$0xff] }
  0x2a   : > { %6733 = vmatprep.subr.msk.mxu1 %vm552_vm0, %v6729_v32  ;;  %6739 = vmatmul.mubr.msk.f32.vlgmr.msra.gmra.mxu0 %vm545_vm1, %v8475_v14  ;;  %v6783_v1 = vld [vmem:[%s10193_s0 + $0x220] sm:$0xff]  ;;  %v6747_v4 = vld [vmem:[%s10193_s0 + $0x158] sm:$0xff]  ;;  %v6746_v6 = vld [vmem:[%s10193_s0 + $0x150] sm:$0xff] }
  0x2b   : > { %6764 = vmatprep.subr.msk.mxu0 %vm552_vm0, %v6760_v33  ;;  %6734 = vmatpush1.msk.msra.mxu1 %vm552_vm0, %v6728_v34  ;;  %v6778_v5 = vld [vmem:[%s10193_s0 + $0x1f8] sm:$0xff]  ;;  %v6777_v7 = vld [vmem:[%s10193_s0 + $0x1f0] sm:$0xff]  ;;  %v6791_v8 = vld [vmem:[%s10193_s0 + $0x260] sm:$0x1] }
  0x2c   : > { %6765 = vmatpush1.msk.msra.mxu0 %vm552_vm0, %v6759_v35  ;;  %1204 = vmatprep.subr.mxu1 %v6724_v36  ;;  %v7655_v10 = vld [vmem:[%s10183_s9 + $0x74] ss:$8 sps:$4 sm:$0xff]   ;;  %v7653_v11 = vld [vmem:[%s10183_s9 + $0x70] ss:$8 sps:$4 sm:$0xff]   ;;  %v7658_v15 = vld [vmem:[%s10183_s9 + $0x64] ss:$8 sps:$4 sm:$0xff]  }
  0x2d   : > { %1791 = vmatprep.subr.mxu0 %v6755_v37  ;;  %715 = vmatprep.mubr.f32.mxu1 %v8319_v9  ;;  %v6790_v12 = vld [vmem:[%s10193_s0 + $0x258] sm:$0x1]  ;;  %v6785_v17 = vld [vmem:[%s10193_s0 + $0x230] sm:$0xff]  ;;  %v7656_v19 = vld [vmem:[%s10183_s9 + $0x60] ss:$8 sps:$4 sm:$0xff]  }
  0x2e   : > { %1205 = vmatpush1.msra.mxu1 %v6723_v38  ;;  %1325 = vmatprep.mubr.f32.mxu0 %v8319_v9  ;;  %v6786_v13 = vld [vmem:[%s10193_s0 + $0x238] sm:$0xff]  ;;  %v6781_v18 = vld [vmem:[%s10193_s0 + $0x210] sm:$0xff]  ;;  %v6780_v20 = vld [vmem:[%s10193_s0 + $0x208] sm:$0xff] }
  0x2f   : > { %1792 = vmatpush1.msra.mxu0 %v6754_v39  ;;  %6709 = vmatmul.mubr.msk.f32.gmra.mxu1 %vm545_vm1, %v8484_v16  ;;  %v6776_v21 = vld [vmem:[%s10193_s0 + $0x1e8] sm:$0xff]  ;;  %v7661_v22 = vld [vmem:[%s10183_s9 + $0x54] ss:$8 sps:$4 sm:$0xff]   ;;  %v6775_v23 = vld [vmem:[%s10193_s0 + $0x1e0] sm:$0xff] }
  0x30   : > { %1206 = vmatprep.subr.mxu1 %v6719_v40  ;;  %6740 = vmatmul.mubr.msk.f32.gmra.mxu0 %vm545_vm1, %v8484_v16  ;;  %v6794_v24 = vld [vmem:[%s10193_s0 + $0x278] sm:$0x1]  ;;  %v6789_v26 = vld [vmem:[%s10193_s0 + $0x250] sm:$0xff]  ;;  %v7664_v27 = vld [vmem:[%s10183_s9 + $0x44] ss:$8 sps:$4 sm:$0xff]  }
  0x31   : > { %1793 = vmatprep.subr.mxu0 %v6750_v41  ;;  %1207 = vmatpush1.msra.mxu1 %v6718_v42  ;;  %v7659_v25 = vld [vmem:[%s10183_s9 + $0x50] ss:$8 sps:$4 sm:$0xff]   ;;  %v6784_v28 = vld [vmem:[%s10193_s0 + $0x228] sm:$0xff]  ;;  %v6779_v30 = vld [vmem:[%s10193_s0 + $0x200] sm:$0xff] }
  0x32   : > { %1794 = vmatpush1.msra.mxu0 %v6749_v43  ;;  %1208 = vmatprep.subr.mxu1 %v6714_v44  ;;  %v7662_v29 = vld [vmem:[%s10183_s9 + $0x40] ss:$8 sps:$4 sm:$0xff]   ;;  %v7665_v31 = vld [vmem:[%s10183_s9 + $0x30] ss:$8 sps:$4 sm:$0xff]   ;;  %v7667_v32 = vld [vmem:[%s10183_s9 + $0x34] ss:$8 sps:$4 sm:$0xff]  }
  0x33   : > { %1795 = vmatprep.subr.mxu0 %v6745_v45  ;;  %1209 = vmatpush1.msra.mxu1 %v6713_v46  ;;  %v7668_v33 = vld [vmem:[%s10183_s9 + $0x170] ss:$8 sps:$4 sm:$0xff]   ;;  %v7670_v34 = vld [vmem:[%s10183_s9 + $0x174] ss:$8 sps:$4 sm:$0xff]   ;;  %v7673_v35 = vld [vmem:[%s10183_s9 + $0x24] ss:$8 sps:$4 sm:$0xff]  }
  0x34   : > { %1242 = vmatprep.mubr.f32.mxu1 %v8319_v9  ;;  %1796 = vmatpush1.msra.mxu0 %v6744_v47  ;;  %v7676_v36 = vld [vmem:[%s10183_s9 + $0x164] ss:$8 sps:$4 sm:$0xff]   ;;  %v7671_v37 = vld [vmem:[%s10183_s9 + $0x20] ss:$8 sps:$4 sm:$0xff]   ;;  %v7682_v42 = vld [vmem:[%s10183_s9 + $0x154] ss:$8 sps:$4 sm:$0xff]  }
  0x35   : > { %1829 = vmatprep.mubr.f32.mxu0 %v8319_v9  ;;  %6735 = vmatmul.mubr.msk.f32.vlgmr.msra.gmra.mxu1 %vm545_vm1, %v8475_v14  ;;  %v7674_v38 = vld [vmem:[%s10183_s9 + $0x160] ss:$8 sps:$4 sm:$0xff]   ;;  %v7677_v43 = vld [vmem:[%s10183_s9 + $0x10] ss:$8 sps:$4 sm:$0xff]   ;;  %v8320_v45 = vmov 0  }
  0x36   : > { %7591 = vmatprep.subr.msk.mxu1 %vm552_vm0, %v6732_v48  ;;  %6766 = vmatmul.mubr.msk.f32.vlgmr.msra.gmra.mxu0 %vm545_vm1, %v8475_v14  ;;  %v521_v39 = vld [vmem:[%s10176_s2] sm:$0xff]  ;;  %v7680_v44 = vld [vmem:[%s10183_s9 + $0x150] ss:$8 sps:$4 sm:$0xff]   ;;  %v522_v46 = vld [vmem:[%s10176_s2 + $0x8] sm:$0xff] }
  0x37   : > { %7602 = vmatprep.subr.msk.mxu0 %vm552_vm0, %v6763_v49  ;;  %7592 = vmatpush3.msk.msra.mxu1 %vm552_vm0, %v6732_v48  ;;  %v523_v40 = vld [vmem:[%s10177_s3] sm:$0xff]  ;;  %v524_v47 = vld [vmem:[%s10177_s3 + $0x8] sm:$0xff] }
  0x38   : > { %7603 = vmatpush3.msk.msra.mxu0 %vm552_vm0, %v6763_v49  ;;  %7593 = vmatprep.subr.mxu1 %v6727_v50  ;;  %v8827_v41 = vld [vmem:[%s10182_s8] sm:$0xff]  ;;  %v8851_v49 = vld [vmem:[%s10182_s8 + $0x8] sm:$0xff] }
  0x39   : > { %7604 = vmatprep.subr.mxu0 %v6758_v51  ;;  %1248 = vmatprep.mubr.f32.mxu1 %v8319_v9  ;;  %v2910_v48 = vcombine.high %v8827_v41, %v8827_v41 }
  0x3a   : > { %7594 = vmatpush3.msra.mxu1 %v6727_v50  ;;  %1835 = vmatprep.mubr.f32.mxu0 %v8319_v9  ;;  %v7685_v50 = vld [vmem:[%s10183_s9 + $0x4] ss:$8 sps:$4 sm:$0xff]  }
  0x3b   : > { %7605 = vmatpush3.msra.mxu0 %v6758_v51  ;;  %6736 = vmatmul.mubr.msk.f32.gmra.mxu1 %vm545_vm1, %v8484_v16  ;;  %v7688_v51 = vld [vmem:[%s10183_s9 + $0x144] ss:$8 sps:$4 sm:$0xff]  }
  0x3c   : > { %7595 = vmatprep.subr.mxu1 %v6722_v52  ;;  %6767 = vmatmul.mubr.msk.f32.gmra.mxu0 %vm545_vm1, %v8484_v16 }
  0x3d   : > { %7606 = vmatprep.subr.mxu0 %v6753_v53  ;;  %7596 = vmatpush3.msra.mxu1 %v6722_v52  ;;  %v2911_v52 = vcombine.high %v8851_v49, %v8851_v49 }
  0x3e   : > { %7607 = vmatpush3.msra.mxu0 %v6753_v53  ;;  %7597 = vmatprep.subr.mxu1 %v6717_v54  ;;  %v7683_v53 = vld [vmem:[%s10183_s9] ss:$8 sps:$4 sm:$0xff]  }
  0x3f   : > { %7608 = vmatprep.subr.mxu0 %v6748_v55  ;;  %7598 = vmatpush3.msra.mxu1 %v6717_v54  ;;  %v2917_v54 = vpack.c.bf16 %v2910_v48, %v2910_v48  ;;  %v2918_v48 = vpack.c.bf16 %v8851_v49, %v8851_v49  ;;  %v7766_v49 = vld [vmem:[%s10183_s9 + $0x220] ss:$8 sps:$4 sm:$0xff]  }
  0x40   : > { %7599 = vmatprep.mubr.msk.f32.mxu1 %vm545_vm1, %v8475_v14  ;;  %7609 = vmatpush3.msra.mxu0 %v6748_v55  ;;  %v2919_v55 = vpack.c.bf16 %v2911_v52, %v2911_v52  ;;  %v7768_v52 = vld [vmem:[%s10183_s9 + $0x224] ss:$8 sps:$4 sm:$0xff]  }
  0x41   : > { %7610 = vmatprep.mubr.msk.f32.mxu0 %vm545_vm1, %v8475_v14  ;;  %7600 = vmatmul.mubr.msk.f32.vlgmr.msra.gmra.mxu1 %vm545_vm1, %v8484_v16 }
  0x42   : > { %6768 = vmatprep.subr.msk.mxu1 %vm552_vm0, %v6762_v56  ;;  %7611 = vmatmul.mubr.msk.f32.vlgmr.msra.gmra.mxu0 %vm545_vm1, %v8484_v16  ;;  %v7686_v56 = vld [vmem:[%s10183_s9 + $0x140] ss:$8 sps:$4 sm:$0xff]  }
  0x43   : > { %6799 = vmatprep.subr.msk.mxu0 %vm552_vm0, %v6793_v57  ;;  %6769 = vmatpush1.msk.msra.mxu1 %vm552_vm0, %v6761_v58  ;;  %v7694_v57 = vld [vmem:[%s10183_s9 + $0x134] ss:$8 sps:$4 sm:$0xff]   ;;  %v7689_v58 = vld [vmem:[%s10183_s9 + $0xf0] ss:$8 sps:$4 sm:$0xff]  }
  0x44   : > { %6800 = vmatpush1.msk.msra.mxu0 %vm552_vm0, %v6792_v59  ;;  %1868 = vmatprep.subr.mxu1 %v6757_v60  ;;  %v7692_v59 = vld [vmem:[%s10183_s9 + $0x130] ss:$8 sps:$4 sm:$0xff]   ;;  %v7697_v60 = vld [vmem:[%s10183_s9 + $0xe4] ss:$8 sps:$4 sm:$0xff]  }
  0x45   : > { %2455 = vmatprep.subr.mxu0 %v6788_v61  ;;  %1869 = vmatpush1.msra.mxu1 %v6756_v62  ;;  %v7695_v61 = vld [vmem:[%s10183_s9 + $0xe0] ss:$8 sps:$4 sm:$0xff]  }
  0x46   : > { %2456 = vmatpush1.msra.mxu0 %v6787_v63  ;;  %1870 = vmatprep.subr.mxu1 %v6752_v0  ;;  %v7698_v62 = vld [vmem:[%s10183_s9 + $0x120] ss:$8 sps:$4 sm:$0xff]   ;;  %v7703_v63 = vld [vmem:[%s10183_s9 + $0xd4] ss:$8 sps:$4 sm:$0xff]  }
  0x47   : > { %2457 = vmatprep.subr.mxu0 %v6783_v1  ;;  %1871 = vmatpush1.msra.mxu1 %v6751_v2  ;;  %v7706_v0 = vld [vmem:[%s10183_s9 + $0x114] ss:$8 sps:$4 sm:$0xff]   ;;  %v7701_v1 = vld [vmem:[%s10183_s9 + $0xd0] ss:$8 sps:$4 sm:$0xff]  }
  0x48   : > { %2458 = vmatpush1.msra.mxu0 %v6782_v3  ;;  %1872 = vmatprep.subr.mxu1 %v6747_v4  ;;  %v7704_v2 = vld [vmem:[%s10183_s9 + $0x110] ss:$8 sps:$4 sm:$0xff]   ;;  %v7709_v3 = vld [vmem:[%s10183_s9 + $0xc4] ss:$8 sps:$4 sm:$0xff]  }
  0x49   : > { %2459 = vmatprep.subr.mxu0 %v6778_v5  ;;  %1873 = vmatpush1.msra.mxu1 %v6746_v6  ;;  %v7712_v4 = vld [vmem:[%s10183_s9 + $0x104] ss:$8 sps:$4 sm:$0xff]   ;;  %v7707_v5 = vld [vmem:[%s10183_s9 + $0xc0] ss:$8 sps:$4 sm:$0xff]  }
  0x4a   : > { %1906 = vmatprep.mubr.f32.mxu1 %v8319_v9  ;;  %2460 = vmatpush1.msra.mxu0 %v6777_v7  ;;  %v7710_v6 = vld [vmem:[%s10183_s9 + $0x100] ss:$8 sps:$4 sm:$0xff]   ;;  %v7715_v7 = vld [vmem:[%s10183_s9 + $0xb4] ss:$8 sps:$4 sm:$0xff]  }
  0x4b   : > { %2493 = vmatprep.mubr.f32.mxu0 %v8319_v9  ;;  %6770 = vmatmul.mubr.msk.f32.vlgmr.msra.gmra.mxu1 %vm545_vm1, %v8475_v14 }
  0x4c   : > { %6795 = vmatprep.subr.msk.mxu1 %vm552_vm0, %v6791_v8  ;;  %6801 = vmatmul.mubr.msk.f32.vlgmr.msra.gmra.mxu0 %vm545_vm1, %v8475_v14  ;;  %v7718_v8 = vld [vmem:[%s10183_s9 + $0x1f4] ss:$8 sps:$4 sm:$0xff]  }
  0x4d   : > { %3527 = vmatprep.subr.bf16.mxu0 %v7655_v10  ;;  %6796 = vmatpush1.msk.msra.mxu1 %vm552_vm0, %v6790_v12  ;;  %v7713_v10 = vld [vmem:[%s10183_s9 + $0xb0] ss:$8 sps:$4 sm:$0xff]   ;;  %v7721_v12 = vld [vmem:[%s10183_s9 + $0xa4] ss:$8 sps:$4 sm:$0xff]  }
  0x4e   : > { %3528 = vmatpush1.bf16.msra.mxu0 %v7653_v11  ;;  %2378 = vmatprep.subr.mxu1 %v6786_v13  ;;  %v7716_v11 = vld [vmem:[%s10183_s9 + $0x1f0] ss:$8 sps:$4 sm:$0xff]   ;;  %v7724_v13 = vld [vmem:[%s10183_s9 + $0x1e4] ss:$8 sps:$4 sm:$0xff]  }
  0x4f   : > { %1912 = vmatprep.mubr.f32.mxu1 %v8319_v9  ;;  %2379 = vmatpush1.msra.mxu1 %v6785_v17  ;;  %v7722_v17 = vld [vmem:[%s10183_s9 + $0x1e0] ss:$8 sps:$4 sm:$0xff]  }
  0x50   : > { %3529 = vmatprep.subr.bf16.mxu0 %v7658_v15  ;;  %6771 = vmatmul.mubr.msk.f32.gmra.mxu1 %vm545_vm1, %v8484_v16  ;;  %v7719_v15 = vld [vmem:[%s10183_s9 + $0xa0] ss:$8 sps:$4 sm:$0xff]  }
  0x51   : > { %2380 = vmatprep.subr.mxu1 %v6781_v18  ;;  %2416 = vmatprep.mubr.f32.mxu1 %v8319_v9  ;;  %v7727_v18 = vld [vmem:[%s10183_s9 + $0x94] ss:$8 sps:$4 sm:$0xff]  }
  0x52   : > { %2381 = vmatpush1.msra.mxu1 %v6780_v20  ;;  %3530 = vmatpush1.bf16.msra.mxu0 %v7656_v19  ;;  %v7730_v19 = vld [vmem:[%s10183_s9 + $0x1d4] ss:$8 sps:$4 sm:$0xff]   ;;  %v7725_v20 = vld [vmem:[%s10183_s9 + $0x90] ss:$8 sps:$4 sm:$0xff]  }
  0x53   : > { %2382 = vmatprep.subr.mxu1 %v6776_v21  ;;  %3531 = vmatprep.subr.bf16.mxu0 %v7661_v22  ;;  %v7728_v21 = vld [vmem:[%s10183_s9 + $0x1d0] ss:$8 sps:$4 sm:$0xff]   ;;  %v7733_v22 = vld [vmem:[%s10183_s9 + $0x84] ss:$8 sps:$4 sm:$0xff]  }
  0x54   : > { %2383 = vmatpush1.msra.mxu1 %v6775_v23  ;;  %7651 = vset.pattern.permute.xlu0 %v8320_v45  ;;  %v7736_v23 = vld [vmem:[%s10183_s9 + $0x1c4] ss:$8 sps:$4 sm:$0xff]  }
  0x55   : > { %6797 = vmatmul.mubr.msk.f32.vlgmr.msra.gmra.mxu1 %vm545_vm1, %v8475_v14  ;;  %7613 = vmatprep.subr.msk.mxu1 %vm552_vm0, %v6794_v24 }
  0x56   : > { %7614 = vmatpush3.msk.msra.mxu1 %vm552_vm0, %v6794_v24  ;;  %3532 = vmatpush1.bf16.msra.mxu0 %v7659_v25  ;;  %v8963_v24 = vld [vmem:[%s10182_s8 + $0x10] sm:$0xff]  ;;  %v7731_v25 = vld [vmem:[%s10183_s9 + $0x80] ss:$8 sps:$4 sm:$0xff]  }
  0x57   : > { %7615 = vmatprep.subr.mxu1 %v6789_v26  ;;  %2422 = vmatprep.mubr.f32.mxu1 %v8319_v9 }
  0x58   : > { %7616 = vmatpush3.msra.mxu1 %v6789_v26  ;;  %3533 = vmatprep.subr.bf16.mxu0 %v7664_v27  ;;  %v7734_v26 = vld [vmem:[%s10183_s9 + $0x1c0] ss:$8 sps:$4 sm:$0xff]   ;;  %v7740_v27 = vld [vmem:[%s10183_s9 + $0x1b4] ss:$8 sps:$4 sm:$0xff]  }
  0x59   : > { %6798 = vmatmul.mubr.msk.f32.gmra.mxu1 %vm545_vm1, %v8484_v16  ;;  %7617 = vmatprep.subr.mxu1 %v6784_v28 }
  0x5a   : > { %7618 = vmatpush3.msra.mxu1 %v6784_v28  ;;  %3534 = vmatpush1.bf16.msra.mxu0 %v7662_v29  ;;  %v7743_v28 = vld [vmem:[%s10183_s9 + $0x274] ss:$8 sps:$4 sm:$0xff]   ;;  %v2912_v29 = vcombine.high %v8963_v24, %v8963_v24 }
  0x5b   : > { %7619 = vmatprep.subr.mxu1 %v6779_v30  ;;  %7621 = vmatprep.mubr.msk.f32.mxu1 %vm545_vm1, %v8475_v14  ;;  %v7679_v14 = vld [vmem:[%s10183_s9 + $0x14] ss:$8 sps:$4 sm:$0xff]  }
  0x5c   : > { %7620 = vmatpush3.msra.mxu1 %v6779_v30  ;;  %3535 = vmatprep.subr.bf16.mxu0 %v7667_v32  ;;  %v2916_v30 = vpack.c.bf16 %v8827_v41, %v8827_v41  ;;  %v7741_v32 = vld [vmem:[%s10183_s9 + $0x270] ss:$8 sps:$4 sm:$0xff]   ;;  %v7758_v41 = vld [vmem:[%s10183_s9 + $0x184] ss:$8 sps:$4 sm:$0xff]  }
  0x5d   : > { %7622 = vmatmul.mubr.msk.f32.vlgmr.msra.gmra.mxu1 %vm545_vm1, %v8484_v16  ;;  %3568 = vmatprep.subr.bf16.mxu1 %v7670_v34  ;;  %v7749_v34 = vld [vmem:[%s10183_s9 + $0x264] ss:$8 sps:$4 sm:$0xff]  }
  0x5e   : > { %3536 = vmatpush1.bf16.msra.mxu0 %v7665_v31  ;;  %3569 = vmatpush1.bf16.msra.mxu1 %v7668_v33  ;;  %v7738_v31 = vld [vmem:[%s10183_s9 + $0x1b0] ss:$8 sps:$4 sm:$0xff]   ;;  %v7746_v33 = vld [vmem:[%s10183_s9 + $0x1a4] ss:$8 sps:$4 sm:$0xff]  }
  0x5f   : > { %3537 = vmatprep.subr.bf16.mxu0 %v7673_v35  ;;  %3570 = vmatprep.subr.bf16.mxu1 %v7676_v36  ;;  %v2921_v35 = vpack.c.bf16 %v2912_v29, %v2912_v29  ;;  %v7744_v36 = vld [vmem:[%s10183_s9 + $0x1a0] ss:$8 sps:$4 sm:$0xff]  }
  0x60   : > { %7652 = vset.pattern.permute.xlu1 %v8320_v45  ;;  %799 = vperm.xlu0 %7651, %v521_v39   ;;  %v7750_v39 = vld [vmem:[%s10183_s9 + $0x190] ss:$8 sps:$4 sm:$0xff]  }
  0x61   : > { %819 = vperm.xlu1 %7652, %v523_v40   ;;  %2499 = vmatprep.mubr.f32.mxu0 %v8319_v9  ;;  %v7691_v9 = vld [vmem:[%s10183_s9 + $0xf4] ss:$8 sps:$4 sm:$0xff]   ;;  %v7753_v40 = vld [vmem:[%s10183_s9 + $0x250] ss:$8 sps:$4 sm:$0xff]  }
  0x62   : > { %3538 = vmatpush1.bf16.msra.mxu0 %v7671_v37  ;;  %3571 = vmatpush1.bf16.msra.mxu1 %v7674_v38  ;;  %v7747_v37 = vld [vmem:[%s10183_s9 + $0x260] ss:$8 sps:$4 sm:$0xff]   ;;  %v7752_v38 = vld [vmem:[%s10183_s9 + $0x194] ss:$8 sps:$4 sm:$0xff]  }
  0x63   : > { %3539 = vmatprep.subr.bf16.mxu0 %v7679_v14  ;;  %3572 = vmatprep.subr.bf16.mxu1 %v7682_v42  ;;  %v7755_v14 = vld [vmem:[%s10183_s9 + $0x254] ss:$8 sps:$4 sm:$0xff]   ;;  %v7761_v42 = vld [vmem:[%s10183_s9 + $0x244] ss:$8 sps:$4 sm:$0xff]  }
  0x64   : > { %804 = vperm.xlu0 %7651, %v522_v46   ;;  %6802 = vmatmul.mubr.msk.f32.gmra.mxu0 %vm545_vm1, %v8484_v16  ;;  %v7700_v16 = vld [vmem:[%s10183_s9 + $0x124] ss:$8 sps:$4 sm:$0xff]   ;;  %v7765_v46 = vld [vmem:[%s10183_s9 + $0x234] ss:$8 sps:$4 sm:$0xff]  }
  0x65   : > { %824 = vperm.xlu1 %7652, %v524_v47   ;;  %3600 = vmatprep.mubr.bf16.mxu1 %v2919_v55  ;;  %v7798_v47 = vld [vmem:[%s10183_s9 + $0x304] ss:$8 sps:$4 sm:$0xff]  }
  0x66   : > { %3540 = vmatpush1.bf16.msra.mxu0 %v7677_v43  ;;  %3573 = vmatpush1.bf16.msra.mxu1 %v7680_v44  ;;  %v7756_v43 = vld [vmem:[%s10183_s9 + $0x180] ss:$8 sps:$4 sm:$0xff]  }
  0x67   : > { %3541 = vmatprep.subr.bf16.mxu0 %v7685_v50  ;;  %3574 = vmatprep.subr.bf16.mxu1 %v7688_v51  ;;  %v7759_v44 = vld [vmem:[%s10183_s9 + $0x240] ss:$8 sps:$4 sm:$0xff]   ;;  %v7763_v50 = vld [vmem:[%s10183_s9 + $0x230] ss:$8 sps:$4 sm:$0xff]  }
  0x68   : > { %3559 = vmatprep.mubr.bf16.mxu0 %v2917_v54  ;;  %v7796_v51 = vld [vmem:[%s10183_s9 + $0x300] ss:$8 sps:$4 sm:$0xff]   ;;  %v7771_v54 = vld [vmem:[%s10183_s9 + $0x214] ss:$8 sps:$4 sm:$0xff]  }
  0x6a   : > { %3542 = vmatpush1.bf16.msra.mxu0 %v7683_v53  ;;  %3575 = vmatpush1.bf16.msra.mxu1 %v7686_v56  ;;  %v2906_v53 = vld [vmem:[%s10182_s8 + $0x18] sm:$0xf] }
  0x6b   : > { %3543 = vmatprep.subr.bf16.mxu0 %v7691_v9  ;;  %3576 = vmatprep.subr.bf16.mxu1 %v7694_v57  ;;  %v2922_v55 = vpack.c.bf16 %v2906_v53, %v2906_v53  ;;  %v7769_v56 = vld [vmem:[%s10183_s9 + $0x210] ss:$8 sps:$4 sm:$0xff]   ;;  %v7774_v9 = vld [vmem:[%s10183_s9 + $0x204] ss:$8 sps:$4 sm:$0xff]   ;;  %v7772_v57 = vld [vmem:[%s10183_s9 + $0x200] ss:$8 sps:$4 sm:$0xff]  }
  0x6e   : > { %3544 = vmatpush2.bf16.msra.mxu0 %v7689_v58  ;;  %3577 = vmatpush1.bf16.msra.mxu1 %v7692_v59  ;;  %v7775_v58 = vld [vmem:[%s10183_s9 + $0x2f0] ss:$8 sps:$4 sm:$0xff]   ;;  %v7780_v59 = vld [vmem:[%s10183_s9 + $0x2e4] ss:$8 sps:$4 sm:$0xff]  }
  0x6f   : > { %3545 = vmatprep.subr.bf16.mxu0 %v7697_v60  ;;  %3578 = vmatprep.subr.bf16.mxu1 %v7700_v16  ;;  %v7778_v60 = vld [vmem:[%s10183_s9 + $0x2e0] ss:$8 sps:$4 sm:$0xff]   ;;  %v7783_v16 = vld [vmem:[%s10183_s9 + $0x2d4] ss:$8 sps:$4 sm:$0xff]  }
  0x72   : > { %3546 = vmatpush2.bf16.msra.mxu0 %v7695_v61  ;;  %3579 = vmatpush1.bf16.msra.mxu1 %v7698_v62  ;;  %v7781_v61 = vld [vmem:[%s10183_s9 + $0x2d0] ss:$8 sps:$4 sm:$0xff]   ;;  %v7786_v62 = vld [vmem:[%s10183_s9 + $0x2c4] ss:$8 sps:$4 sm:$0xff]  }
  0x73   : > { %3547 = vmatprep.subr.bf16.mxu0 %v7703_v63  ;;  %3580 = vmatprep.subr.bf16.mxu1 %v7706_v0  ;;  %v7784_v63 = vld [vmem:[%s10183_s9 + $0x2c0] ss:$8 sps:$4 sm:$0xff]   ;;  %v7789_v0 = vld [vmem:[%s10183_s9 + $0x2b4] ss:$8 sps:$4 sm:$0xff]  }
  0x76   : > { %3548 = vmatpush2.bf16.msra.mxu0 %v7701_v1  ;;  %3581 = vmatpush1.bf16.msra.mxu1 %v7704_v2  ;;  %v7787_v1 = vld [vmem:[%s10183_s9 + $0x2b0] ss:$8 sps:$4 sm:$0xff]   ;;  %v7792_v2 = vld [vmem:[%s10183_s9 + $0x2a4] ss:$8 sps:$4 sm:$0xff]  }
  0x77   : > { %3549 = vmatprep.subr.bf16.mxu0 %v7709_v3  ;;  %3582 = vmatprep.subr.bf16.mxu1 %v7712_v4  ;;  %v7790_v3 = vld [vmem:[%s10183_s9 + $0x2a0] ss:$8 sps:$4 sm:$0xff]   ;;  %v7795_v4 = vld [vmem:[%s10183_s9 + $0x294] ss:$8 sps:$4 sm:$0xff]  }
  0x7a   : > { %3550 = vmatpush2.bf16.msra.mxu0 %v7707_v5  ;;  %3583 = vmatpush1.bf16.msra.mxu1 %v7710_v6  ;;  %v7793_v5 = vld [vmem:[%s10183_s9 + $0x290] ss:$8 sps:$4 sm:$0xff]   ;;  %v7801_v6 = vld [vmem:[%s10183_s9 + $0x284] ss:$8 sps:$4 sm:$0xff]  }
  0x7b   : > { %3551 = vmatprep.subr.bf16.mxu0 %v7715_v7  ;;  %3584 = vmatprep.subr.bf16.mxu1 %v7718_v8  ;;  %v7799_v7 = vld [vmem:[%s10183_s9 + $0x280] ss:$8 sps:$4 sm:$0xff]   ;;  %v2920_v8 = vpack.c.bf16 %v8963_v24, %v8963_v24 }
  0x7e   : > { %3552 = vmatpush2.bf16.msra.mxu0 %v7713_v10  ;;  %3585 = vmatpush2.bf16.msra.mxu1 %v7716_v11 }
  0x7f   : > { %3553 = vmatprep.subr.bf16.mxu0 %v7721_v12  ;;  %3586 = vmatprep.subr.bf16.mxu1 %v7724_v13  ;;  %v8321_v12 = vmov 1966171168  }
  0x80   : > { %v863_v13 = vunpack.c.l.s4 %v8321_v12 }
  0x82   : > { %3554 = vmatpush2.bf16.msra.mxu0 %v7719_v15  ;;  %3587 = vmatpush2.bf16.msra.mxu1 %v7722_v17  ;;  %v865_v15 = vlaneseq }
  0x83   : > { %3555 = vmatprep.subr.bf16.mxu0 %v7727_v18  ;;  %3588 = vmatprep.subr.bf16.mxu1 %v7730_v19 }
  0x84   : > { %vm9208_vm3 = vcmp.lt.s32.totalorder %v865_v15, 576 }
  0x86   : > { %3556 = vmatpush2.bf16.msra.mxu0 %v7725_v20  ;;  %3589 = vmatpush2.bf16.msra.mxu1 %v7728_v21  ;;  %v7803_v21 = vld [vmem:[%s10185_s11 + $0x78] sm:$0xff]  }
  0x87   : > { %3557 = vmatprep.subr.bf16.mxu0 %v7733_v22  ;;  %3590 = vmatprep.subr.bf16.mxu1 %v7736_v23  ;;  %v7804_v22 = vld [vmem:[%s10185_s11 + $0x38] sm:$0xff]   ;;  %v7805_v23 = vld [vmem:[%s10185_s11 + $0x70] sm:$0xff]  }
  0x8a   : > { %3558 = vmatpush2.bf16.msra.mxu0 %v7731_v25  ;;  %3591 = vmatpush2.bf16.msra.mxu1 %v7734_v26  ;;  %v864_v25 = vunpack.c.0.s8 %v863_v13  ;;  %v9126_v26 = vshrl.u32 %v865_v15, 7 }
  0x8b   : > { %3592 = vmatprep.subr.bf16.mxu1 %v7740_v27  ;;  %3609 = vmatprep.subr.bf16.mxu0 %v7743_v28 }
  0x8d   : > { %3560 = vmatmul.mubr.bf16.vlgmr.msra.gmra.mxu0 %v2916_v30 }
  0x8e   : > { %3593 = vmatpush2.bf16.msra.mxu1 %v7738_v31  ;;  %3610 = vmatpush1.bf16.msra.mxu0 %v7741_v32 }
  0x8f   : > { %3594 = vmatprep.subr.bf16.mxu1 %v7746_v33  ;;  %3611 = vmatprep.subr.bf16.mxu0 %v7749_v34  ;;  %v7806_v34 = vld [vmem:[%s10185_s11 + $0x30] sm:$0xff]  }
  0x90   : > { %3641 = vmatprep.mubr.bf16.mxu0 %v2921_v35 }
  0x92   : > { %3595 = vmatpush2.bf16.msra.mxu1 %v7744_v36  ;;  %3612 = vmatpush1.bf16.msra.mxu0 %v7747_v37 }
  0x93   : > { %3596 = vmatprep.subr.bf16.mxu1 %v7752_v38  ;;  %3613 = vmatprep.subr.bf16.mxu0 %v7755_v14  ;;  %v7807_v38 = vld [vmem:[%s10185_s11 + $0x68] sm:$0xff]   ;;  %v9143_v14 = vsub.s32 %v864_v25, %v9126_v26 }
  0x96   : > { %3597 = vmatpush2.bf16.msra.mxu1 %v7750_v39  ;;  %3614 = vmatpush1.bf16.msra.mxu0 %v7753_v40 }
  0x97   : > { %3598 = vmatprep.subr.bf16.mxu1 %v7758_v41  ;;  %3615 = vmatprep.subr.bf16.mxu0 %v7761_v42 }
  0x9a   : > { %3599 = vmatpush2.bf16.msra.mxu1 %v7756_v43  ;;  %3616 = vmatpush1.bf16.msra.mxu0 %v7759_v44 }
  0x9b   : > { %3617 = vmatprep.subr.bf16.mxu0 %v7765_v46  ;;  %3664 = vmatprep.subr.bf16.mxu1 %v7798_v47 }
  0x9d   : > { %3601 = vmatmul.mubr.bf16.vlgmr.msra.gmra.mxu1 %v2918_v48 }
  0x9e   : > { %3618 = vmatpush1.bf16.msra.mxu0 %v7763_v50  ;;  %3665 = vmatpush1.bf16.msra.mxu1 %v7796_v51  ;;  %v7808_v50 = vld [vmem:[%s10185_s11 + $0x28] sm:$0xff]  }
  0x9f   : > { %3619 = vmatprep.subr.bf16.mxu0 %v7768_v52  ;;  %3682 = vmatprep.mubr.bf16.mxu1 %v8320_v45  ;;  %v7777_v45 = vld [vmem:[%s10183_s9 + $0x2f4] ss:$8 sps:$4 sm:$0xff]   ;;  %v7809_v52 = vld [vmem:[%s10185_s11 + $0x60] sm:$0xff]  }
  0xa0   : > { %7499 = vmatprep.subr.bf16.mxu1 %v7803_v21 }
  0xa2   : > { %3620 = vmatpush1.bf16.msra.mxu0 %v7766_v49 }
  0xa3   : > { %3621 = vmatprep.subr.bf16.mxu0 %v7771_v54 }
  0xa5   : > { %6904 = vmatmul.mubr.msk.bf16.vlgmr.msra.gmra.mxu1 %vm3523_vm2, %v2922_v55 }
  0xa6   : > { %3622 = vmatpush1.bf16.msra.mxu0 %v7769_v56  ;;  %7500 = vmatpush3.bf16.msra.mxu1 %v7804_v22 }
  0xa7   : > { %3623 = vmatprep.subr.bf16.mxu0 %v7774_v9  ;;  %7501 = vmatprep.subr.bf16.mxu1 %v7805_v23 }
  0xaa   : > { %3624 = vmatpush1.bf16.msra.mxu0 %v7772_v57  ;;  %7502 = vmatpush3.bf16.msra.mxu1 %v7806_v34 }
  0xab   : > { %3625 = vmatprep.subr.bf16.mxu0 %v7777_v45  ;;  %7503 = vmatprep.subr.bf16.mxu1 %v7807_v38 }
  0xae   : > { %3626 = vmatpush2.bf16.msra.mxu0 %v7775_v58  ;;  %7504 = vmatpush3.bf16.msra.mxu1 %v7808_v50 }
  0xaf   : > { %3627 = vmatprep.subr.bf16.mxu0 %v7780_v59  ;;  %7505 = vmatprep.subr.bf16.mxu1 %v7809_v52 }
  0xb2   : > { %3628 = vmatpush2.bf16.msra.mxu0 %v7778_v60 }
  0xb3   : > { %3629 = vmatprep.subr.bf16.mxu0 %v7783_v16  ;;  %v7810_v16 = vld [vmem:[%s10185_s11 + $0x20] sm:$0xff]  }
  0xb4   : > { %7506 = vmatpush3.bf16.msra.mxu1 %v7810_v16 }
  0xb6   : > { %3630 = vmatpush2.bf16.msra.mxu0 %v7781_v61 }
  0xb7   : > { %3631 = vmatprep.subr.bf16.mxu0 %v7786_v62 }
  0xba   : > { %3632 = vmatpush2.bf16.msra.mxu0 %v7784_v63 }
  0xbb   : > { %3633 = vmatprep.subr.bf16.mxu0 %v7789_v0  ;;  %v7811_v0 = vld [vmem:[%s10185_s11 + $0x58] sm:$0xff]  }
  0xbc   : > { %7507 = vmatprep.subr.bf16.mxu1 %v7811_v0 }
  0xbe   : > { %3634 = vmatpush2.bf16.msra.mxu0 %v7787_v1 }
  0xbf   : > { %3635 = vmatprep.subr.bf16.mxu0 %v7792_v2 }
  0xc2   : > { %3636 = vmatpush2.bf16.msra.mxu0 %v7790_v3 }
  0xc3   : > { %3637 = vmatprep.subr.bf16.mxu0 %v7795_v4 }
  0xc6   : > { %3638 = vmatpush2.bf16.msra.mxu0 %v7793_v5 }
  0xc7   : > { %3639 = vmatprep.subr.bf16.mxu0 %v7801_v6 }
  0xca   : > { %3640 = vmatpush2.bf16.msra.mxu0 %v7799_v7 }
  0xcd   : > { %3642 = vmatmul.mubr.bf16.vlgmr.msra.gmra.mxu0 %v2920_v8 }
  0xdb   : > { %v9109_v10 = vpop.permute.xlu0 %799 }
  0xdc   : > { %v9111_v11 = vpop.permute.xlu1 %819 }
  0xde   : > { %v7590_v19 = vpop.f32.mrf.mxu0 }
  0xdf   : > { %v634_v17 = vpop.f32.mrf.mxu1  ;;  %v9114_v20 = vpop.permute.xlu0 %804 }
  0xe0   : > { %v807_v18 = vmul.f32 %v9109_v10, %v634_v17  ;;  %v9128_v27 = vpop.permute.xlu1 %824  ;;  %v816_v28 = vmul.f32 %v7590_v19, %v9114_v20  ;;  %v788_v31 = vpop.f32.mrf.mxu0  ;;  %v7812_v19 = vld [vmem:[%s10185_s11 + $0x18] sm:$0xff]  }
  0xe1   : > { %v636_v24 = vpop.f32.mrf.mxu1  ;;  %v811_v32 = vmul.f32 %v9109_v10, %v788_v31  ;;  %7508 = vmatpush3.bf16.msra.mxu1 %v7812_v19 }
  0xe2   : > { %v827_v29 = vadd.f32 %v9111_v11, %v807_v18  ;;  %v808_v30 = vmul.f32 %v9109_v10, %v636_v24  ;;  %v836_v33 = vadd.f32 %v9128_v27, %v816_v28 }
  0xe3   : > { %v831_v39 = vadd.f32 %v9111_v11, %v811_v32 }
  0xe4   : > { %v837_v35 = vmax.f32 %v827_v29, 0.0  ;;  %v828_v36 = vadd.f32 %v9111_v11, %v808_v30  ;;  %v640_v37 = vpop.f32.mrf.mxu1  ;;  %v846_v41 = vmax.f32 %v836_v33, 0.0 }
  0xe5   : > { %v812_v40 = vmul.f32 %v9114_v20, %v640_v37  ;;  %v841_v44 = vmax.f32 %v831_v39, 0.0  ;;  %v3029_v39 = vsub.s32 1, %v9126_v26 }
  0xe6   : > { %v838_v42 = vmax.f32 %v828_v36, 0.0  ;;  %v642_v43 = vpop.f32.mrf.mxu1  ;;  %v978_v48 = vcombine.high %v846_v41, %v846_v41  ;;  %v1013_v9 = vrot.slane %v846_v41, %v9143_v14 }
  0xe7   : > { %v832_v46 = vadd.f32 %v9128_v27, %v812_v40  ;;  %v813_v47 = vmul.f32 %v9114_v20, %v642_v43  ;;  %v861_v53 = vcombine.high %v841_v44, %v841_v44  ;;  %v896_v54 = vrot.slane %v841_v44, %v9143_v14 }
  0xe8   : > { %v857_v51 = vcombine.low %v837_v35, %v838_v42  ;;  %v858_v49 = vcombine.high %v837_v35, %v838_v42  ;;  %v1020_v60 = vrot.slane %v978_v48, %v9143_v14  ;;  %v1025_v8 = vcombine.high %v1013_v9, %v1013_v9 }
  0xe9   : > { %v833_v55 = vadd.f32 %v9128_v27, %v813_v47  ;;  %v711_v56 = vpop.f32.mrf.mxu1  ;;  %v903_v57 = vrot.slane %v861_v53, %v9143_v14  ;;  %v842_v45 = vmax.f32 %v832_v46, 0.0  ;;  %v908_v3 = vcombine.high %v896_v54, %v896_v54 }
  0xea   : > { %v1321_v59 = vpop.f32.mrf.mxu0  ;;  %v809_v61 = vmul.f32 %v9109_v10, %v711_v56  ;;  %v9169_v1 = vrot.slane %v857_v51, %v9143_v14  ;;  %v9172_v2 = vrot.slane %v858_v49, %v9143_v14  ;;  %v9177_v12 = vrot.slane %v896_v54, %v9143_v14 }
  0xeb   : > { %v843_v58 = vmax.f32 %v833_v55, 0.0  ;;  %v1409_v62 = vmul.f32 %v1321_v59, %v9109_v10  ;;  %v713_v63 = vpop.f32.mrf.mxu1  ;;  %v909_v5 = vcombine.high %v903_v57, %v903_v57  ;;  %v1026_v18 = vcombine.high %v1020_v60, %v1020_v60 }
  0xec   : > { %v1323_v4 = vpop.f32.mrf.mxu0  ;;  %v829_v6 = vadd.f32 %v9111_v11, %v809_v61  ;;  %v810_v7 = vmul.f32 %v9109_v10, %v713_v63  ;;  %v9188_v25 = vrot.slane %v1013_v9, %v9143_v14  ;;  %v9191_v28 = vrot.slane %v903_v57, %v9143_v14 }
  0xed   : > { %v974_v13 = vcombine.low %v842_v45, %v843_v58  ;;  %v1410_v17 = vmul.f32 %v1323_v4, %v9109_v10  ;;  %v9184_v22 = vadd.f32 %v1409_v62, %v9111_v11  ;;  %v9194_v29 = vrot.slane %v908_v3, %v9143_v14 }
  0xee   : > { %v839_v21 = vmax.f32 %v829_v6, 0.0  ;;  %v830_v23 = vadd.f32 %v9111_v11, %v810_v7  ;;  %v9201_v33 = vrot.slane %v909_v5, %v9143_v14  ;;  %v975_v34 = vcombine.high %v842_v45, %v843_v58 }
  0xef   : > { %v717_v24 = vpop.f32.mrf.mxu1  ;;  %v9197_v30 = vadd.f32 %v1410_v17, %v9111_v11  ;;  %v9205_v38 = vrot.slane %v974_v13, %v9143_v14  ;;  %v9215_v42 = vrot.slane %v1020_v60, %v9143_v14  ;;  %v1429_v44 = vmax.f32 %v9184_v22, 0.0 }
  0xf0   : > { %v814_v31 = vmul.f32 %v9114_v20, %v717_v24  ;;  %v1327_v32 = vpop.f32.mrf.mxu0  ;;  %v840_v35 = vmax.f32 %v830_v23, 0.0  ;;  %v992_v49 = vrot.slane %v975_v34, %v9143_v14  ;;  %v9228_v55 = vrot.slane %v1025_v8, %v9143_v14 }
  0xf1   : > { %v1414_v36 = vmul.f32 %v1327_v32, %v9114_v20  ;;  %v719_v37 = vpop.f32.mrf.mxu1  ;;  %v1430_v15 = vmax.f32 %v9197_v30, 0.0  ;;  %v9231_v57 = vrot.slane %v1026_v18, %v9143_v14 }
  0xf2   : > { %v834_v40 = vadd.f32 %v9128_v27, %v814_v31  ;;  %v815_v41 = vmul.f32 %v9114_v20, %v719_v37  ;;  %v1329_v43 = vpop.f32.mrf.mxu0  ;;  %v859_v46 = vcombine.low %v839_v21, %v840_v35  ;;  %v860_v47 = vcombine.high %v839_v21, %v840_v35 }
  0xf3   : > { %v1415_v48 = vmul.f32 %v1329_v43, %v9114_v20  ;;  %v9221_v51 = vadd.f32 %v1414_v36, %v9128_v27  ;;  %v9241_v0 = vcombine.low %v1429_v44, %v1430_v15 }
  0xf4   : > { %v844_v50 = vmax.f32 %v834_v40, 0.0  ;;  %v835_v52 = vadd.f32 %v9128_v27, %v815_v41  ;;  %v882_v53 = vrot.slane %v859_v46, %v9143_v14  ;;  %v889_v54 = vrot.slane %v860_v47, %v9143_v14 }
  0xf5   : > { %v1244_v56 = vpop.f32.mrf.mxu1  ;;  %v9234_v45 = vadd.f32 %v1415_v48, %v9128_v27  ;;  %v1434_v3 = vmax.f32 %v9221_v51, 0.0  ;;  %v1450_v40 = vcombine.high %v1429_v44, %v1430_v15 }
  0xf6   : > { %v845_v9 = vmax.f32 %v835_v52, 0.0  ;;  %v1407_v58 = vmul.f32 %v1244_v56, %v9109_v10  ;;  %v1831_v59 = vpop.f32.mrf.mxu0  ;;  %v904_v60 = vcombine.low %v9169_v1, %v882_v53  ;;  %v905_v16 = vcombine.high %v9169_v1, %v882_v53 }
  0xf7   : > { %v906_v61 = vcombine.low %v9172_v2, %v889_v54  ;;  %v907_v62 = vcombine.high %v9172_v2, %v889_v54  ;;  %v1246_v63 = vpop.f32.mrf.mxu1  ;;  %v1435_v18 = vmax.f32 %v9234_v45, 0.0  ;;  %v1994_v43 = vmul.f32 %v1831_v59, %v9109_v10 }
  0xf8   : > { %v976_v4 = vcombine.low %v844_v50, %v845_v9  ;;  %v977_v5 = vcombine.high %v844_v50, %v845_v9  ;;  %v916_v6 = vrot.slane %v904_v60, %v9143_v14  ;;  %v930_v8 = vrot.slane %v905_v16, %v9143_v14  ;;  %v1833_v1 = vpop.f32.mrf.mxu0 }
  0xf9   : > { %v923_v7 = vrot.slane %v906_v61, %v9143_v14  ;;  %v937_v13 = vrot.slane %v907_v62, %v9143_v14  ;;  %v9252_v19 = vadd.f32 %v1407_v58, %v9111_v11  ;;  %v2004_v52 = vadd.f32 %v1994_v43, %v9111_v11 }
  0xfa   : > { %v999_v17 = vrot.slane %v976_v4, %v9143_v14  ;;  %v1006_v2 = vrot.slane %v977_v5, %v9143_v14  ;;  %v966_v21 = vcombine.low %v916_v6, %v9177_v12  ;;  %v967_v22 = vcombine.high %v916_v6, %v9177_v12 }
  0xfb   : > { %v968_v23 = vcombine.low %v923_v7, %v9191_v28  ;;  %v969_v24 = vcombine.high %v923_v7, %v9191_v28  ;;  %v1250_v30 = vpop.f32.mrf.mxu1  ;;  %v970_v31 = vcombine.low %v930_v8, %v9194_v29  ;;  %v971_v32 = vcombine.high %v930_v8, %v9194_v29 }
  0xfc   : > { %v972_v34 = vcombine.low %v937_v13, %v9201_v33  ;;  %v973_v35 = vcombine.high %v937_v13, %v9201_v33  ;;  %1111 = vst.msk [vmem:[#allocation2] ss:$4 sm:$0x1f] %vm9208_vm3, %v966_v21  ;;  %1115 = vst.msk [vmem:[#allocation2 + $0x28] ss:$4 sm:$0x1f] %vm9208_vm3, %v967_v22  ;;  %v1021_v12 = vcombine.low %v9205_v38, %v999_v17  ;;  %v1837_v37 = vpop.f32.mrf.mxu0 }
  0xfd   : > { %1119 = vst.msk [vmem:[#allocation2 + $0x50] ss:$4 sm:$0x1f] %vm9208_vm3, %v968_v23  ;;  %1123 = vst.msk [vmem:[#allocation2 + $0x78] ss:$4 sm:$0x1f] %vm9208_vm3, %v969_v24  ;;  %v1022_v28 = vcombine.high %v9205_v38, %v999_v17  ;;  %v1023_v29 = vcombine.low %v992_v49, %v1006_v2  ;;  %v1024_v36 = vcombine.high %v992_v49, %v1006_v2  ;;  %v1252_v33 = vpop.f32.mrf.mxu1 }
  0xfe   : > { %1113 = vst.msk [vmem:[#allocation2 + $0x14] ss:$4 sm:$0x1f] %vm9208_vm3, %v970_v31  ;;  %1117 = vst.msk [vmem:[#allocation2 + $0x3c] ss:$4 sm:$0x1f] %vm9208_vm3, %v971_v32  ;;  %v1566_v38 = vcombine.low %v1434_v3, %v1435_v18  ;;  %v1033_v46 = vrot.slane %v1021_v12, %v9143_v14  ;;  %v1408_v44 = vmul.f32 %v1246_v63, %v9109_v10  ;;  %v1839_v58 = vpop.f32.mrf.mxu0 }
  0xff   : > { %1121 = vst.msk [vmem:[#allocation2 + $0x64] ss:$4 sm:$0x1f] %vm9208_vm3, %v972_v34  ;;  %1125 = vst.msk [vmem:[#allocation2 + $0x8c] ss:$4 sm:$0x1f] %vm9208_vm3, %v973_v35  ;;  %v1040_v47 = vrot.slane %v1023_v29, %v9143_v14  ;;  %v1047_v48 = vrot.slane %v1022_v28, %v9143_v14  ;;  %v1054_v50 = vrot.slane %v1024_v36, %v9143_v14 }
 0x100   : > { %v1427_v41 = vmax.f32 %v9252_v19, 0.0  ;;  %v1995_v15 = vmul.f32 %v1833_v1, %v9109_v10  ;;  %v1412_v49 = vmul.f32 %v1250_v30, %v9114_v20  ;;  %v1083_v53 = vcombine.low %v1033_v46, %v9188_v25 }
 0x101   : > { %v1084_v54 = vcombine.high %v1033_v46, %v9188_v25  ;;  %v1085_v56 = vcombine.low %v1040_v47, %v9215_v42  ;;  %v1086_v9 = vcombine.high %v1040_v47, %v9215_v42  ;;  %v7601_v59 = vpop.f32.mrf.mxu1  ;;  %v1087_v60 = vcombine.low %v1047_v48, %v9228_v55 }
 0x102   : > { %v1088_v16 = vcombine.high %v1047_v48, %v9228_v55  ;;  %v1089_v61 = vcombine.low %v1054_v50, %v9231_v57  ;;  %v1090_v62 = vcombine.high %v1054_v50, %v9231_v57  ;;  %1127 = vst.msk [vmem:[#allocation2 + $0xa0] ss:$4 sm:$0x1f] %vm9208_vm3, %v1083_v53  ;;  %v2014_v25 = vmax.f32 %v2004_v52, 0.0  ;;  %v7612_v31 = vpop.f32.mrf.mxu0 }
 0x103   : > { %1131 = vst.msk [vmem:[#allocation2 + $0xc8] ss:$4 sm:$0x1f] %vm9208_vm3, %v1084_v54  ;;  %1135 = vst.msk [vmem:[#allocation2 + $0xf0] ss:$4 sm:$0x1f] %vm9208_vm3, %v1085_v56  ;;  %v1418_v42 = vadd.f32 %v1408_v44, %v9111_v11  ;;  %v2005_v55 = vadd.f32 %v1995_v15, %v9111_v11  ;;  %v1422_v63 = vadd.f32 %v1412_v49, %v9128_v27  ;;  %v1398_v28 = vpop.f32.mrf.mxu1 }
 0x104   : > { %1139 = vst.msk [vmem:[#allocation2 + $0x118] ss:$4 sm:$0x1f] %vm9208_vm3, %v1086_v9  ;;  %1129 = vst.msk [vmem:[#allocation2 + $0xb4] ss:$4 sm:$0x1f] %vm9208_vm3, %v1087_v60  ;;  %v1999_v57 = vmul.f32 %v1837_v37, %v9114_v20  ;;  %v1413_v4 = vmul.f32 %v1252_v33, %v9114_v20  ;;  %v2000_v5 = vmul.f32 %v1839_v58, %v9114_v20 }
 0x105   : > { %1133 = vst.msk [vmem:[#allocation2 + $0xdc] ss:$4 sm:$0x1f] %vm9208_vm3, %v1088_v16  ;;  %1137 = vst.msk [vmem:[#allocation2 + $0x104] ss:$4 sm:$0x1f] %vm9208_vm3, %v1089_v61  ;;  %v1416_v6 = vmul.f32 %v7601_v59, %v9114_v20  ;;  %v1567_v7 = vcombine.high %v1434_v3, %v1435_v18  ;;  %v9335_v45 = vrot.slane %v9241_v0, %v9143_v14  ;;  %v1985_v61 = vpop.f32.mrf.mxu0 }
 0x106   : > { %1141 = vst.msk [vmem:[#allocation2 + $0x12c] ss:$4 sm:$0x1f] %vm9208_vm3, %v1090_v62  ;;  %v1428_v8 = vmax.f32 %v1418_v42, 0.0  ;;  %v2015_v13 = vmax.f32 %v2005_v55, 0.0  ;;  %v1432_v1 = vmax.f32 %v1422_v63, 0.0  ;;  %v2009_v17 = vadd.f32 %v1999_v57, %v9128_v27 }
 0x107   : > { %v1423_v2 = vadd.f32 %v1413_v4, %v9128_v27  ;;  %v2010_v19 = vadd.f32 %v2000_v5, %v9128_v27  ;;  %v1426_v21 = vadd.f32 %v1416_v6, %v9128_v27  ;;  %v9338_v32 = vrot.slane %v1450_v40, %v9143_v14 }
 0x108   : > { %v1447_v22 = vcombine.low %v1427_v41, %v1428_v8  ;;  %v1448_v23 = vcombine.high %v1427_v41, %v1428_v8  ;;  %v2034_v24 = vcombine.low %v2014_v25, %v2015_v13  ;;  %v2035_v30 = vcombine.high %v2014_v25, %v2015_v13 }
 0x109   : > { %v2019_v51 = vmax.f32 %v2009_v17, 0.0  ;;  %v1433_v3 = vmax.f32 %v1423_v2, 0.0  ;;  %v2020_v18 = vmax.f32 %v2010_v19, 0.0  ;;  %v1436_v12 = vmax.f32 %v1426_v21, 0.0 }
 0x10a   : > { %v9341_v34 = vrot.slane %v1447_v22, %v9143_v14  ;;  %v9344_v35 = vrot.slane %v1448_v23, %v9143_v14  ;;  %v1589_v29 = vrot.slane %v1566_v38, %v9143_v14  ;;  %v1596_v0 = vrot.slane %v1567_v7, %v9143_v14  ;;  %v7813_v23 = vld [vmem:[%s10185_s11 + $0x50] sm:$0xff]  }
 0x10b   : > { %v1564_v36 = vcombine.low %v1432_v1, %v1433_v3  ;;  %v1565_v37 = vcombine.high %v1432_v1, %v1433_v3  ;;  %v9349_v33 = vrot.slane %v2034_v24, %v9143_v14  ;;  %v9352_v40 = vrot.slane %v2035_v30, %v9143_v14  ;;  %v9355_v46 = vpop.f32.mrf.mxu1  ;;  %v7814_v24 = vld [vmem:[%s10185_s11 + $0x10] sm:$0xff]   ;;  %7509 = vmatprep.subr.bf16.mxu1 %v7813_v23 }
 0x10c   : > { %v2151_v41 = vcombine.low %v2019_v51, %v2020_v18  ;;  %v2003_v43 = vmul.f32 %v7612_v31, %v9114_v20  ;;  %v1494_v47 = vcombine.low %v9341_v34, %v9335_v45  ;;  %v2152_v50 = vcombine.high %v2019_v51, %v2020_v18  ;;  %v2495_v31 = vpop.f32.mrf.mxu0  ;;  %7510 = vmatpush3.bf16.msra.mxu1 %v7814_v24 }
 0x10d   : > { %v1575_v38 = vrot.slane %v1564_v36, %v9143_v14  ;;  %v1582_v48 = vrot.slane %v1565_v37, %v9143_v14  ;;  %v1495_v52 = vcombine.high %v9341_v34, %v9335_v45  ;;  %v1496_v44 = vcombine.low %v9344_v35, %v9338_v32  ;;  %v1910_v62 = vpop.f32.mrf.mxu1  ;;  %v7815_v36 = vld [vmem:[%s10185_s11 + $0x48] sm:$0xff]  }
 0x10e   : > { %v1497_v15 = vcombine.high %v9344_v35, %v9338_v32  ;;  %v1568_v49 = vcombine.high %v1436_v12, %v1436_v12  ;;  %v1603_v58 = vrot.slane %v1436_v12, %v9143_v14  ;;  %v2013_v60 = vadd.f32 %v2003_v43, %v9128_v27  ;;  %7511 = vmatprep.subr.bf16.mxu1 %v7815_v36  ;;  %v2497_v32 = vpop.f32.mrf.mxu0 }
 0x10f   : > { %v1611_v53 = vcombine.low %v1575_v38, %v1589_v29  ;;  %v1612_v54 = vcombine.high %v1575_v38, %v1589_v29  ;;  %v1613_v56 = vcombine.low %v1582_v48, %v1596_v0  ;;  %v1614_v9 = vcombine.high %v1582_v48, %v1596_v0  ;;  %v7816_v48 = vld [vmem:[%s10185_s11 + $0x8] sm:$0xff]  }
 0x110   : > { %v1610_v59 = vrot.slane %v1568_v49, %v9143_v14  ;;  %v1411_v16 = vmul.f32 %v1398_v28, %v9109_v10  ;;  %v9374_v55 = vrot.slane %v2151_v41, %v9143_v14  ;;  %v1615_v57 = vcombine.high %v1603_v58, %v1603_v58  ;;  %v9384_v22 = vpop.f32.mrf.mxu1  ;;  %7512 = vmatpush3.bf16.msra.mxu1 %v7816_v48 }
 0x111   : > { %v1630_v25 = vrot.slane %v1613_v56, %v9143_v14  ;;  %v1637_v42 = vrot.slane %v1612_v54, %v9143_v14  ;;  %v1623_v63 = vrot.slane %v1611_v53, %v9143_v14  ;;  %v1651_v5 = vrot.slane %v1603_v58, %v9143_v14  ;;  %v7817_v54 = vld [vmem:[%s10185_s11 + $0x40] sm:$0xff]  }
 0x112   : > { %v1616_v4 = vcombine.high %v1610_v59, %v1610_v59  ;;  %v1658_v6 = vrot.slane %v1610_v59, %v9143_v14  ;;  %v1644_v7 = vrot.slane %v1614_v9, %v9143_v14  ;;  %v2023_v8 = vmax.f32 %v2013_v60, 0.0  ;;  %7513 = vmatprep.subr.bf16.mxu1 %v7817_v54 }
 0x113   : > { %v1421_v13 = vadd.f32 %v1411_v16, %v9111_v11  ;;  %v1998_v1 = vmul.f32 %v1985_v61, %v9109_v10  ;;  %v1665_v17 = vrot.slane %v1615_v57, %v9143_v14  ;;  %v1673_v19 = vcombine.low %v1623_v63, %v1651_v5 }
 0x114   : > { %v1672_v2 = vrot.slane %v1616_v4, %v9143_v14  ;;  %v1674_v21 = vcombine.high %v1623_v63, %v1651_v5  ;;  %v1675_v30 = vcombine.low %v1630_v25, %v1658_v6  ;;  %v1676_v51 = vcombine.high %v1630_v25, %v1658_v6 }
 0x115   : > { %v2155_v3 = vcombine.high %v2023_v8, %v2023_v8  ;;  %v9393_v18 = vrot.slane %v2023_v8, %v9143_v14  ;;  %v1677_v12 = vcombine.low %v1637_v42, %v1665_v17  ;;  %v1678_v28 = vcombine.high %v1637_v42, %v1665_v17  ;;  %1714 = vst.msk [vmem:[#allocation2 + $0xa1] ss:$4 sm:$0x1f] %vm9208_vm3, %v1673_v19 }
 0x116   : > { %v1679_v29 = vcombine.low %v1644_v7, %v1672_v2  ;;  %v1680_v0 = vcombine.high %v1644_v7, %v1672_v2  ;;  %1718 = vst.msk [vmem:[#allocation2 + $0xc9] ss:$4 sm:$0x1f] %vm9208_vm3, %v1674_v21  ;;  %v9403_v37 = vrot.slane %v1496_v44, %v9143_v14  ;;  %v9406_v41 = vrot.slane %v2152_v50, %v9143_v14 }
 0x117   : > { %1722 = vst.msk [vmem:[#allocation2 + $0xf1] ss:$4 sm:$0x1f] %vm9208_vm3, %v1675_v30  ;;  %1726 = vst.msk [vmem:[#allocation2 + $0x119] ss:$4 sm:$0x1f] %vm9208_vm3, %v1676_v51  ;;  %v9413_v43 = vrot.slane %v2155_v3, %v9143_v14  ;;  %v1520_v44 = vrot.slane %v1495_v52, %v9143_v14  ;;  %v2008_v50 = vadd.f32 %v1998_v1, %v9111_v11  ;;  %v1916_v52 = vpop.f32.mrf.mxu1 }
 0x118   : > { %v1431_v38 = vmax.f32 %v1421_v13, 0.0  ;;  %1716 = vst.msk [vmem:[#allocation2 + $0xb5] ss:$4 sm:$0x1f] %vm9208_vm3, %v1677_v12  ;;  %v1996_v49 = vmul.f32 %v9355_v46, %v9109_v10  ;;  %v2583_v53 = vmul.f32 %v2495_v31, %v9109_v10  ;;  %v1527_v56 = vrot.slane %v1497_v15, %v9143_v14 }
 0x119   : > { %1720 = vst.msk [vmem:[#allocation2 + $0xdd] ss:$4 sm:$0x1f] %vm9208_vm3, %v1678_v28  ;;  %1724 = vst.msk [vmem:[#allocation2 + $0x105] ss:$4 sm:$0x1f] %vm9208_vm3, %v1679_v29  ;;  %v1506_v58 = vrot.slane %v1494_v47, %v9143_v14  ;;  %v1997_v46 = vmul.f32 %v1910_v62, %v9109_v10  ;;  %v2202_v59 = vcombine.high %v9393_v18, %v9393_v18  ;;  %v2418_v57 = vpop.f32.mrf.mxu1 }
 0x11a   : > { %1728 = vst.msk [vmem:[#allocation2 + $0x12d] ss:$4 sm:$0x1f] %vm9208_vm3, %v1680_v0  ;;  %v1451_v9 = vcombine.high %v1431_v38, %v1431_v38  ;;  %v9447_v60 = vrot.slane %v9393_v18, %v9143_v14  ;;  %v1486_v16 = vrot.slane %v1431_v38, %v9143_v14  ;;  %v2018_v61 = vmax.f32 %v2008_v50, 0.0  ;;  %v7818_v47 = vld [vmem:[%s10185_s11] sm:$0xff]  }
 0x11b   : > { %v2203_v35 = vcombine.high %v9413_v43, %v9413_v43  ;;  %v2006_v45 = vadd.f32 %v1996_v49, %v9111_v11  ;;  %v9455_v34 = vadd.f32 %v2583_v53, %v9111_v11  ;;  %v2007_v6 = vadd.f32 %v1997_v46, %v9111_v11  ;;  %7514 = vmatpush3.bf16.msra.mxu1 %v7818_v47  ;;  %v2420_v31 = vpop.f32.mrf.mxu1 }
 0x11c   : > { %v1493_v15 = vrot.slane %v1451_v9, %v9143_v14  ;;  %v1498_v62 = vcombine.high %v1486_v16, %v1486_v16  ;;  %v1534_v25 = vrot.slane %v1486_v16, %v9143_v14  ;;  %v2038_v42 = vcombine.high %v2018_v61, %v2018_v61 }
 0x11d   : > { %v2073_v63 = vrot.slane %v2018_v61, %v9143_v14  ;;  %v2584_v7 = vmul.f32 %v2497_v32, %v9109_v10  ;;  %v9469_v2 = vrot.slane %v9413_v43, %v9143_v14  ;;  %v2016_v3 = vmax.f32 %v2006_v45, 0.0  ;;  %v2424_v32 = vpop.f32.mrf.mxu1 }
 0x11e   : > { %v1499_v4 = vcombine.high %v1493_v15, %v1493_v15  ;;  %v1541_v5 = vrot.slane %v1493_v15, %v9143_v14  ;;  %v1548_v8 = vrot.slane %v1498_v62, %v9143_v14  ;;  %v1556_v13 = vcombine.low %v1506_v58, %v1534_v25 }
 0x11f   : > { %v1557_v1 = vcombine.high %v1506_v58, %v1534_v25  ;;  %v2080_v17 = vrot.slane %v2038_v42, %v9143_v14  ;;  %v2085_v51 = vcombine.high %v2073_v63, %v2073_v63  ;;  %v2603_v0 = vmax.f32 %v9455_v34, 0.0 }
 0x120   : > { %v1555_v19 = vrot.slane %v1499_v4, %v9143_v14  ;;  %v1558_v21 = vcombine.low %v9403_v37, %v1541_v5  ;;  %v1559_v23 = vcombine.high %v9403_v37, %v1541_v5  ;;  %v1560_v24 = vcombine.low %v1520_v44, %v1548_v8  ;;  %1698 = vst.msk [vmem:[#allocation2 + $0x1] ss:$4 sm:$0x1f] %vm9208_vm3, %v1556_v13 }
 0x121   : > { %v1561_v30 = vcombine.high %v1520_v44, %v1548_v8  ;;  %1702 = vst.msk [vmem:[#allocation2 + $0x29] ss:$4 sm:$0x1f] %vm9208_vm3, %v1557_v1  ;;  %v2086_v29 = vcombine.high %v2080_v17, %v2080_v17  ;;  %v2121_v36 = vrot.slane %v2073_v63, %v9143_v14  ;;  %v2017_v37 = vmax.f32 %v2007_v6, 0.0 }
 0x122   : > { %v1562_v12 = vcombine.low %v1527_v56, %v1555_v19  ;;  %v1563_v28 = vcombine.high %v1527_v56, %v1555_v19  ;;  %1706 = vst.msk [vmem:[#allocation2 + $0x51] ss:$4 sm:$0x1f] %vm9208_vm3, %v1558_v21  ;;  %1710 = vst.msk [vmem:[#allocation2 + $0x79] ss:$4 sm:$0x1f] %vm9208_vm3, %v1559_v23  ;;  %v2594_v38 = vadd.f32 %v2584_v7, %v9111_v11  ;;  %v2426_v23 = vpop.f32.mrf.mxu1 }
 0x123   : > { %1700 = vst.msk [vmem:[#allocation2 + $0x15] ss:$4 sm:$0x1f] %vm9208_vm3, %v1560_v24  ;;  %1704 = vst.msk [vmem:[#allocation2 + $0x3d] ss:$4 sm:$0x1f] %vm9208_vm3, %v1561_v30  ;;  %v2001_v48 = vmul.f32 %v9384_v22, %v9114_v20  ;;  %v2128_v44 = vrot.slane %v2080_v17, %v9143_v14  ;;  %v2002_v50 = vmul.f32 %v1916_v52, %v9114_v20 }
 0x124   : > { %1708 = vst.msk [vmem:[#allocation2 + $0x65] ss:$4 sm:$0x1f] %vm9208_vm3, %v1562_v12  ;;  %1712 = vst.msk [vmem:[#allocation2 + $0x8d] ss:$4 sm:$0x1f] %vm9208_vm3, %v1563_v28  ;;  %v2581_v49 = vmul.f32 %v2418_v57, %v9109_v10  ;;  %v2582_v53 = vmul.f32 %v2420_v31, %v9109_v10  ;;  %v2135_v54 = vrot.slane %v2085_v51, %v9143_v14  ;;  %v2501_v18 = vpop.f32.mrf.mxu0 }
 0x125   : > { %v2036_v56 = vcombine.low %v2016_v3, %v2017_v37  ;;  %v2037_v9 = vcombine.high %v2016_v3, %v2017_v37  ;;  %v2011_v22 = vadd.f32 %v2001_v48, %v9128_v27  ;;  %v2604_v58 = vmax.f32 %v2594_v38, 0.0 }
 0x126   : > { %v2012_v46 = vadd.f32 %v2002_v50, %v9128_v27  ;;  %v2591_v16 = vadd.f32 %v2581_v49, %v9111_v11  ;;  %v2592_v61 = vadd.f32 %v2582_v53, %v9111_v11  ;;  %v2142_v52 = vrot.slane %v2086_v29, %v9143_v14  ;;  %v7623_v50 = vpop.f32.mrf.mxu1 }
 0x127   : > { %v2059_v15 = vrot.slane %v2036_v56, %v9143_v14  ;;  %v2066_v45 = vrot.slane %v2037_v9, %v9143_v14  ;;  %v2586_v34 = vmul.f32 %v2424_v32, %v9114_v20  ;;  %v2021_v47 = vmax.f32 %v2011_v22, 0.0 }
 0x128   : > { %v2022_v62 = vmax.f32 %v2012_v46, 0.0  ;;  %v2601_v25 = vmax.f32 %v2591_v16, 0.0  ;;  %v2602_v42 = vmax.f32 %v2592_v61, 0.0  ;;  %v2623_v6 = vcombine.low %v2603_v0, %v2604_v58 }
 0x129   : > { %v2081_v63 = vcombine.low %v9349_v33, %v2059_v15  ;;  %v2082_v57 = vcombine.high %v9349_v33, %v2059_v15  ;;  %v2083_v4 = vcombine.low %v9352_v40, %v2066_v45  ;;  %v2084_v5 = vcombine.high %v9352_v40, %v2066_v45  ;;  %v2572_v45 = vpop.f32.mrf.mxu1 }
 0x12a   : > { %v2624_v7 = vcombine.high %v2603_v0, %v2604_v58  ;;  %v2153_v8 = vcombine.low %v2021_v47, %v2022_v62  ;;  %v2154_v13 = vcombine.high %v2021_v47, %v2022_v62  ;;  %v2621_v30 = vcombine.low %v2601_v25, %v2602_v42 }
 0x12b   : > { %v2093_v1 = vrot.slane %v2081_v63, %v9143_v14  ;;  %v2100_v17 = vrot.slane %v2083_v4, %v9143_v14  ;;  %v2107_v19 = vrot.slane %v2082_v57, %v9143_v14  ;;  %v2114_v21 = vrot.slane %v2084_v5, %v9143_v14 }
 0x12c   : > { %v2176_v24 = vrot.slane %v2153_v8, %v9143_v14  ;;  %v2183_v33 = vrot.slane %v2154_v13, %v9143_v14  ;;  %v2622_v51 = vcombine.high %v2601_v25, %v2602_v42  ;;  %v2252_v49 = vrot.slane %v2202_v59, %v9143_v14 }
 0x12d   : > { %v2143_v40 = vcombine.low %v2093_v1, %v2121_v36  ;;  %v2144_v3 = vcombine.high %v2093_v1, %v2121_v36  ;;  %v2145_v31 = vcombine.low %v2100_v17, %v2128_v44  ;;  %v2146_v12 = vcombine.high %v2100_v17, %v2128_v44 }
 0x12e   : > { %v2147_v28 = vcombine.low %v2107_v19, %v2135_v54  ;;  %v2148_v29 = vcombine.high %v2107_v19, %v2135_v54  ;;  %v2149_v0 = vcombine.low %v2114_v21, %v2142_v52  ;;  %v2150_v37 = vcombine.high %v2114_v21, %v2142_v52 }
 0x12f   : > { %2285 = vst.msk [vmem:[#allocation2 + $0x2] ss:$4 sm:$0x1f] %vm9208_vm3, %v2143_v40  ;;  %2289 = vst.msk [vmem:[#allocation2 + $0x2a] ss:$4 sm:$0x1f] %vm9208_vm3, %v2144_v3  ;;  %v2198_v36 = vcombine.low %v9374_v55, %v2176_v24  ;;  %v2199_v38 = vcombine.high %v9374_v55, %v2176_v24  ;;  %v2200_v48 = vcombine.low %v9406_v41, %v2183_v33 }
 0x130   : > { %2293 = vst.msk [vmem:[#allocation2 + $0x52] ss:$4 sm:$0x1f] %vm9208_vm3, %v2145_v31  ;;  %2297 = vst.msk [vmem:[#allocation2 + $0x7a] ss:$4 sm:$0x1f] %vm9208_vm3, %v2146_v12  ;;  %v2201_v44 = vcombine.high %v9406_v41, %v2183_v33  ;;  %v2632_v55 = vrot.slane %v2621_v30, %v9143_v14  ;;  %v2596_v41 = vadd.f32 %v2586_v34, %v9128_v27 }
 0x131   : > { %2287 = vst.msk [vmem:[#allocation2 + $0x16] ss:$4 sm:$0x1f] %vm9208_vm3, %v2147_v28  ;;  %2291 = vst.msk [vmem:[#allocation2 + $0x3e] ss:$4 sm:$0x1f] %vm9208_vm3, %v2148_v29  ;;  %v2587_v53 = vmul.f32 %v2426_v23, %v9114_v20  ;;  %v2210_v59 = vrot.slane %v2198_v36, %v9143_v14  ;;  %v2217_v54 = vrot.slane %v2200_v48, %v9143_v14 }
 0x132   : > { %2295 = vst.msk [vmem:[#allocation2 + $0x66] ss:$4 sm:$0x1f] %vm9208_vm3, %v2149_v0  ;;  %2299 = vst.msk [vmem:[#allocation2 + $0x8e] ss:$4 sm:$0x1f] %vm9208_vm3, %v2150_v37  ;;  %v2224_v56 = vrot.slane %v2199_v38, %v9143_v14  ;;  %v2231_v9 = vrot.slane %v2201_v44, %v9143_v14  ;;  %v2259_v22 = vrot.slane %v2203_v35, %v9143_v14  ;;  %v2503_v35 = vpop.f32.mrf.mxu0 }
 0x133   : > { %v2646_v58 = vrot.slane %v2623_v6, %v9143_v14  ;;  %v2653_v46 = vrot.slane %v2624_v7, %v9143_v14  ;;  %v2639_v16 = vrot.slane %v2622_v51, %v9143_v14  ;;  %v2260_v61 = vcombine.low %v2210_v59, %v9447_v60 }
 0x134   : > { %v2261_v32 = vcombine.high %v2210_v59, %v9447_v60  ;;  %v2262_v52 = vcombine.low %v2217_v54, %v9469_v2  ;;  %v2263_v15 = vcombine.high %v2217_v54, %v9469_v2  ;;  %v2264_v34 = vcombine.low %v2224_v56, %v2252_v49 }
 0x135   : > { %v2265_v47 = vcombine.high %v2224_v56, %v2252_v49  ;;  %v2266_v62 = vcombine.low %v2231_v9, %v2259_v22  ;;  %v2267_v43 = vcombine.high %v2231_v9, %v2259_v22  ;;  %2301 = vst.msk [vmem:[#allocation2 + $0xa2] ss:$4 sm:$0x1f] %vm9208_vm3, %v2260_v61  ;;  %v2668_v60 = vcombine.low %v2632_v55, %v2646_v58 }
 0x136   : > { %2305 = vst.msk [vmem:[#allocation2 + $0xca] ss:$4 sm:$0x1f] %vm9208_vm3, %v2261_v32  ;;  %2309 = vst.msk [vmem:[#allocation2 + $0xf2] ss:$4 sm:$0x1f] %vm9208_vm3, %v2262_v52  ;;  %v2597_v25 = vadd.f32 %v2587_v53, %v9128_v27  ;;  %v2670_v42 = vcombine.low %v2639_v16, %v2653_v46  ;;  %v2590_v63 = vmul.f32 %v7623_v50, %v9114_v20 }
 0x137   : > { %2313 = vst.msk [vmem:[#allocation2 + $0x11a] ss:$4 sm:$0x1f] %vm9208_vm3, %v2263_v15  ;;  %v2606_v2 = vmax.f32 %v2596_v41, 0.0  ;;  %v2585_v57 = vmul.f32 %v2572_v45, %v9109_v10  ;;  %v2588_v4 = vmul.f32 %v2501_v18, %v9114_v20  ;;  %v2669_v5 = vcombine.high %v2632_v55, %v2646_v58 }
 0x138   : > { %2303 = vst.msk [vmem:[#allocation2 + $0xb6] ss:$4 sm:$0x1f] %vm9208_vm3, %v2264_v34  ;;  %2307 = vst.msk [vmem:[#allocation2 + $0xde] ss:$4 sm:$0x1f] %vm9208_vm3, %v2265_v47  ;;  %v2671_v6 = vcombine.high %v2639_v16, %v2653_v46  ;;  %v2589_v8 = vmul.f32 %v2503_v35, %v9114_v20  ;;  %v2600_v13 = vadd.f32 %v2590_v63, %v9128_v27 }
 0x139   : > { %2311 = vst.msk [vmem:[#allocation2 + $0x106] ss:$4 sm:$0x1f] %vm9208_vm3, %v2266_v62  ;;  %2315 = vst.msk [vmem:[#allocation2 + $0x12e] ss:$4 sm:$0x1f] %vm9208_vm3, %v2267_v43  ;;  %v2595_v1 = vadd.f32 %v2585_v57, %v9111_v11  ;;  %v2598_v17 = vadd.f32 %v2588_v4, %v9128_v27  ;;  %v2687_v24 = vrot.slane %v2670_v42, %v9143_v14 }
 0x13a   : > { %v2607_v7 = vmax.f32 %v2597_v25, 0.0  ;;  %v2599_v23 = vadd.f32 %v2589_v8, %v9128_v27  ;;  %v2610_v10 = vmax.f32 %v2600_v13, 0.0  ;;  %v2694_v51 = vrot.slane %v2669_v5, %v9143_v14 }
 0x13b   : > { %v2605_v33 = vmax.f32 %v2595_v1, 0.0  ;;  %v2608_v30 = vmax.f32 %v2598_v17, 0.0  ;;  %v2701_v40 = vrot.slane %v2671_v6, %v9143_v14  ;;  %v2680_v20 = vrot.slane %v2668_v60, %v9143_v14 }
 0x13c   : > { %v2738_v19 = vcombine.low %v2606_v2, %v2607_v7  ;;  %v2739_v21 = vcombine.high %v2606_v2, %v2607_v7  ;;  %v2609_v3 = vmax.f32 %v2599_v23, 0.0  ;;  %v2742_v31 = vcombine.high %v2610_v10, %v2610_v10 }
 0x13d   : > { %v2777_v11 = vrot.slane %v2610_v10, %v9143_v14  ;;  %v2625_v12 = vcombine.high %v2605_v33, %v2605_v33  ;;  %v2660_v28 = vrot.slane %v2605_v33, %v9143_v14 }
 0x13e   : > { %v2749_v27 = vrot.slane %v2738_v19, %v9143_v14  ;;  %v2756_v29 = vrot.slane %v2739_v21, %v9143_v14  ;;  %v2740_v0 = vcombine.low %v2608_v30, %v2609_v3  ;;  %v2741_v37 = vcombine.high %v2608_v30, %v2609_v3  ;;  %v3021_v3 = vld [vmem:[%s10184_s10] sm:$0x3] }
 0x13f   : > { %v2784_v36 = vrot.slane %v2742_v31, %v9143_v14  ;;  %v2789_v38 = vcombine.high %v2777_v11, %v2777_v11  ;;  %v2825_v48 = vrot.slane %v2777_v11, %v9143_v14  ;;  %v2667_v44 = vrot.slane %v2625_v12, %v9143_v14 }
 0x140   : > { %v2672_v50 = vcombine.high %v2660_v28, %v2660_v28  ;;  %v2708_v49 = vrot.slane %v2660_v28, %v9143_v14  ;;  %v2763_v55 = vrot.slane %v2740_v0, %v9143_v14  ;;  %v2770_v41 = vrot.slane %v2741_v37, %v9143_v14 }
 0x141   : > { %v2790_v53 = vcombine.high %v2784_v36, %v2784_v36  ;;  %v2832_v18 = vrot.slane %v2784_v36, %v9143_v14  ;;  %v2839_v59 = vrot.slane %v2789_v38, %v9143_v14  ;;  %v2673_v54 = vcombine.high %v2667_v44, %v2667_v44 }
 0x142   : > { %v2715_v56 = vrot.slane %v2667_v44, %v9143_v14  ;;  %v2722_v9 = vrot.slane %v2672_v50, %v9143_v14  ;;  %v2730_v22 = vcombine.low %v2680_v20, %v2708_v49  ;;  %v2731_v58 = vcombine.high %v2680_v20, %v2708_v49 }
 0x143   : > { %v2846_v46 = vrot.slane %v2790_v53, %v9143_v14  ;;  %v2729_v16 = vrot.slane %v2673_v54, %v9143_v14  ;;  %v2785_v61 = vcombine.low %v2749_v27, %v2763_v55  ;;  %v2786_v32 = vcombine.high %v2749_v27, %v2763_v55 }
 0x144   : > { %v2732_v52 = vcombine.low %v2687_v24, %v2715_v56  ;;  %v2733_v15 = vcombine.high %v2687_v24, %v2715_v56  ;;  %v2734_v45 = vcombine.low %v2694_v51, %v2722_v9  ;;  %v2735_v34 = vcombine.high %v2694_v51, %v2722_v9  ;;  %2872 = vst.msk [vmem:[#allocation2 + $0x3] ss:$4 sm:$0x1f] %vm9208_vm3, %v2730_v22 }
 0x145   : > { %2876 = vst.msk [vmem:[#allocation2 + $0x2b] ss:$4 sm:$0x1f] %vm9208_vm3, %v2731_v58  ;;  %v2736_v47 = vcombine.low %v2701_v40, %v2729_v16  ;;  %v2737_v62 = vcombine.high %v2701_v40, %v2729_v16  ;;  %v2787_v43 = vcombine.low %v2756_v29, %v2770_v41  ;;  %v2788_v35 = vcombine.high %v2756_v29, %v2770_v41 }
 0x146   : > { %2874 = vst.msk [vmem:[#allocation2 + $0x17] ss:$4 sm:$0x1f] %vm9208_vm3, %v2734_v45  ;;  %2878 = vst.msk [vmem:[#allocation2 + $0x3f] ss:$4 sm:$0x1f] %vm9208_vm3, %v2735_v34  ;;  %v2797_v60 = vrot.slane %v2785_v61, %v9143_v14  ;;  %v2811_v2 = vrot.slane %v2786_v32, %v9143_v14  ;;  %v3030_v11 = vrot.slane %v3021_v3, %v3029_v39 }
 0x147   : > { %2880 = vst.msk [vmem:[#allocation2 + $0x53] ss:$4 sm:$0x1f] %vm9208_vm3, %v2732_v52  ;;  %2884 = vst.msk [vmem:[#allocation2 + $0x7b] ss:$4 sm:$0x1f] %vm9208_vm3, %v2733_v15  ;;  %v2804_v25 = vrot.slane %v2787_v43, %v9143_v14  ;;  %v2818_v42 = vrot.slane %v2788_v35, %v9143_v14 }
 0x148   : > { %2882 = vst.msk [vmem:[#allocation2 + $0x67] ss:$4 sm:$0x1f] %vm9208_vm3, %v2736_v47  ;;  %2886 = vst.msk [vmem:[#allocation2 + $0x8f] ss:$4 sm:$0x1f] %vm9208_vm3, %v2737_v62  ;;  %v2847_v63 = vcombine.low %v2797_v60, %v2825_v48  ;;  %v2848_v57 = vcombine.high %v2797_v60, %v2825_v48  ;;  %v2851_v4 = vcombine.low %v2811_v2, %v2839_v59 }
 0x149   : > { %v2852_v5 = vcombine.high %v2811_v2, %v2839_v59  ;;  %v2849_v6 = vcombine.low %v2804_v25, %v2832_v18  ;;  %v2850_v7 = vcombine.high %v2804_v25, %v2832_v18  ;;  %v2853_v8 = vcombine.low %v2818_v42, %v2846_v46  ;;  %v6905_v59 = vld [vmem:[%s10186_s12] ss:$0 sm:$0xff] }
 0x14a   : > { %v2854_v13 = vcombine.high %v2818_v42, %v2846_v46  ;;  %2888 = vst.msk [vmem:[#allocation2 + $0xa3] ss:$4 sm:$0x1f] %vm9208_vm3, %v2847_v63  ;;  %2890 = vst.msk [vmem:[#allocation2 + $0xb7] ss:$4 sm:$0x1f] %vm9208_vm3, %v2851_v4 }
 0x14b   : > { %2892 = vst.msk [vmem:[#allocation2 + $0xcb] ss:$4 sm:$0x1f] %vm9208_vm3, %v2848_v57  ;;  %2894 = vst.msk [vmem:[#allocation2 + $0xdf] ss:$4 sm:$0x1f] %vm9208_vm3, %v2852_v5 }
 0x14c   : > { %2896 = vst.msk [vmem:[#allocation2 + $0xf3] ss:$4 sm:$0x1f] %vm9208_vm3, %v2849_v6  ;;  %2898 = vst.msk [vmem:[#allocation2 + $0x107] ss:$4 sm:$0x1f] %vm9208_vm3, %v2853_v8 }
 0x14d   : > { %2900 = vst.msk [vmem:[#allocation2 + $0x11b] ss:$4 sm:$0x1f] %vm9208_vm3, %v2850_v7  ;;  %2902 = vst.msk [vmem:[#allocation2 + $0x12f] ss:$4 sm:$0x1f] %vm9208_vm3, %v2854_v13  ;;  %v3561_v14 = vpop.f32.mrf.mxu0 }
 0x14e   : > { %v3025_v20 = vsub.s32 0, %v9126_v26 }
 0x14f   : > { %v3563_v1 = vpop.f32.mrf.mxu0 }
 0x150   : > { %v3026_v31 = vrot.slane %v3021_v3, %v3025_v20  ;;  %v3564_v28 = vadd.f32 %v3563_v1, %v3030_v11 }
 0x151   : > { %v3565_v17 = vpop.f32.mrf.mxu0 }
 0x152   : > { %v3562_v12 = vadd.f32 %v3561_v14, %v3026_v31 }
 0x153   : > { %v3566_v19 = vpop.f32.mrf.mxu0 }
 0x15d   : > { %v3602_v21 = vpop.f32.mrf.mxu1 }
 0x15e   : > { %v3603_v27 = vadd.f32 %v3602_v21, %v3562_v12 }
 0x15f   : > { %v3604_v23 = vpop.f32.mrf.mxu1 }
 0x160   : > { %v3605_v0 = vadd.f32 %v3604_v23, %v3564_v28 }
 0x161   : > { %v3606_v24 = vpop.f32.mrf.mxu1 }
 0x163   : > { %v3607_v10 = vpop.f32.mrf.mxu1 }
 0x165   : > { %v3684_v33 = vpop.f32.mrf.mxu1 }
 0x167   : > { %v3686_v30 = vpop.f32.mrf.mxu1 }
 0x169   : > { %v3688_v51 = vpop.f32.mrf.mxu1 }
 0x16b   : > { %v3689_v40 = vpop.f32.mrf.mxu1 }
 0x18d   : > { %v3643_v29 = vpop.f32.mrf.mxu0 }
 0x18e   : > { %v3644_v37 = vadd.f32 %v3643_v29, %v3603_v27 }
 0x18f   : > { %v3645_v36 = vpop.f32.mrf.mxu0 }
 0x190   : > { %v3685_v38 = vadd.f32 %v3684_v33, %v3644_v37  ;;  %v3646_v48 = vadd.f32 %v3645_v36, %v3605_v0 }
 0x191   : > { %v3647_v44 = vpop.f32.mrf.mxu0 }
 0x192   : > { %v3687_v50 = vadd.f32 %v3686_v30, %v3646_v48  ;;  %v3691_v49 = vmax.f32 %v3685_v38, 0.0 }
 0x193   : > { %v3648_v55 = vpop.f32.mrf.mxu0 }
 0x194   : > { %v3692_v41 = vmax.f32 %v3687_v50, 0.0  ;;  %v3693_v18 = vpack.c.bf16 %v3691_v49, %v3691_v49 }
 0x196   : > { %v3694_v53 = vpack.c.bf16 %v3692_v41, %v3692_v41 }
 0x198   : > { %3862 = vmatprep.mubr.bf16.mxu1 %v3694_v53 }
 0x199   : > { %3863 = vmatmul.mubr.bf16.vlgmr.msra.gmra.mxu1 %v3693_v18 }
 0x259   : > { %v7515_v26 = vpop.f32.mrf.mxu1 }
 0x25b   : > { %v7516_v54 = vpop.f32.mrf.mxu1 }
 0x25c   : > { %v7517_v56 = vadd.f32 %v7516_v54, %v7515_v26 }
 0x25d   : > { %v7518_v9 = vpop.f32.mrf.mxu1 }
 0x25e   : > { %v3865_v22 = vadd.f32 %v7517_v56, %v6905_v59 }
 0x25f   : > { %v7519_v58 = vpop.f32.mrf.mxu1 }
 0x260   : > { %3871 = vst.msk [vmem:[#allocation4] sm:$0xf] %vm3870_vm4, %v3865_v22 }
 0x261 PF: > { %v7819_v46 = vld [vmem:[%s8428_s28 + $0x74] ss:$8 sps:$4 sm:$0xff]   ;;  %v7823_v61 = vld [vmem:[%s8428_s28 + $0x70] ss:$8 sps:$4 sm:$0xff]   ;;  %v7825_v52 = vld [vmem:[%s8428_s28 + $0x64] ss:$8 sps:$4 sm:$0xff]  }
 0x262   : > { %v7821_v16 = vld [vmem:[%s8428_s28 + $0x174] ss:$8 sps:$4 sm:$0xff]   ;;  %4327 = vmatprep.subr.bf16.mxu0 %v7819_v46  ;;  %v7824_v32 = vld [vmem:[%s8428_s28 + $0x170] ss:$8 sps:$4 sm:$0xff]   ;;  %v7827_v15 = vld [vmem:[%s8428_s28 + $0x164] ss:$8 sps:$4 sm:$0xff]  }
 0x263   : > { %4368 = vmatprep.subr.bf16.mxu1 %v7821_v16  ;;  %4328 = vmatpush1.bf16.msra.mxu0 %v7823_v61  ;;  %v7829_v45 = vld [vmem:[%s8428_s28 + $0x60] ss:$8 sps:$4 sm:$0xff]   ;;  %v7831_v47 = vld [vmem:[%s8428_s28 + $0x54] ss:$8 sps:$4 sm:$0xff]   ;;  %v7835_v43 = vld [vmem:[%s8428_s28 + $0x50] ss:$8 sps:$4 sm:$0xff]  }
 0x264   : > { %4369 = vmatpush1.bf16.msra.mxu1 %v7824_v32  ;;  %4329 = vmatprep.subr.bf16.mxu0 %v7825_v52  ;;  %v7830_v34 = vld [vmem:[%s8428_s28 + $0x160] ss:$8 sps:$4 sm:$0xff]   ;;  %v7833_v62 = vld [vmem:[%s8428_s28 + $0x154] ss:$8 sps:$4 sm:$0xff]   ;;  %v7836_v35 = vld [vmem:[%s8428_s28 + $0x150] ss:$8 sps:$4 sm:$0xff]  }
 0x265   : > { %4370 = vmatprep.subr.bf16.mxu1 %v7827_v15  ;;  %v7837_v60 = vld [vmem:[%s8428_s28 + $0x44] ss:$8 sps:$4 sm:$0xff]   ;;  %v7841_v25 = vld [vmem:[%s8428_s28 + $0x40] ss:$8 sps:$4 sm:$0xff]   ;;  %v7843_v63 = vld [vmem:[%s8428_s28 + $0x34] ss:$8 sps:$4 sm:$0xff]  }
 0x266   : > { %v7839_v2 = vld [vmem:[%s8428_s28 + $0x144] ss:$8 sps:$4 sm:$0xff]   ;;  %v7842_v42 = vld [vmem:[%s8428_s28 + $0x140] ss:$8 sps:$4 sm:$0xff]   ;;  %v7845_v57 = vld [vmem:[%s8428_s28 + $0x134] ss:$8 sps:$4 sm:$0xff]  }
 0x267   : > { %4330 = vmatpush1.bf16.msra.mxu0 %v7829_v45  ;;  %v7847_v4 = vld [vmem:[%s8428_s28 + $0x30] ss:$8 sps:$4 sm:$0xff]   ;;  %v7849_v6 = vld [vmem:[%s8428_s28 + $0x24] ss:$8 sps:$4 sm:$0xff]   ;;  %v7853_v8 = vld [vmem:[%s8428_s28 + $0x20] ss:$8 sps:$4 sm:$0xff]  }
 0x268   : > { %4371 = vmatpush1.bf16.msra.mxu1 %v7830_v34  ;;  %4331 = vmatprep.subr.bf16.mxu0 %v7831_v47  ;;  %v7848_v5 = vld [vmem:[%s8428_s28 + $0x130] ss:$8 sps:$4 sm:$0xff]   ;;  %v7851_v7 = vld [vmem:[%s8428_s28 + $0x124] ss:$8 sps:$4 sm:$0xff]   ;;  %v7854_v13 = vld [vmem:[%s8428_s28 + $0x120] ss:$8 sps:$4 sm:$0xff]  }
 0x269   : > { %4372 = vmatprep.subr.bf16.mxu1 %v7833_v62  ;;  %v7855_v14 = vld [vmem:[%s8428_s28 + $0x14] ss:$8 sps:$4 sm:$0xff]   ;;  %v7859_v17 = vld [vmem:[%s8428_s28 + $0x10] ss:$8 sps:$4 sm:$0xff]   ;;  %v7861_v21 = vld [vmem:[%s8428_s28 + $0x4] ss:$8 sps:$4 sm:$0xff]  }
 0x26a   : > { %v7857_v1 = vld [vmem:[%s8428_s28 + $0x114] ss:$8 sps:$4 sm:$0xff]   ;;  %v7860_v19 = vld [vmem:[%s8428_s28 + $0x110] ss:$8 sps:$4 sm:$0xff]   ;;  %v7863_v23 = vld [vmem:[%s8428_s28 + $0x104] ss:$8 sps:$4 sm:$0xff]  }
 0x26b   : > { %4332 = vmatpush1.bf16.msra.mxu0 %v7835_v43  ;;  %v7865_v24 = vld [vmem:[%s8428_s28] ss:$8 sps:$4 sm:$0xff]   ;;  %v7867_v33 = vld [vmem:[%s8428_s28 + $0xf4] ss:$8 sps:$4 sm:$0xff]   ;;  %v7871_v51 = vld [vmem:[%s8428_s28 + $0xf0] ss:$8 sps:$4 sm:$0xff]  }
 0x26c   : > { %4373 = vmatpush1.bf16.msra.mxu1 %v7836_v35  ;;  %4333 = vmatprep.subr.bf16.mxu0 %v7837_v60  ;;  %v7866_v10 = vld [vmem:[%s8428_s28 + $0x100] ss:$8 sps:$4 sm:$0xff]   ;;  %v7869_v30 = vld [vmem:[%s8428_s28 + $0x1f4] ss:$8 sps:$4 sm:$0xff]   ;;  %v7872_v40 = vld [vmem:[%s8428_s28 + $0x1f0] ss:$8 sps:$4 sm:$0xff]  }
 0x26d   : > { %4374 = vmatprep.subr.bf16.mxu1 %v7839_v2  ;;  %v7873_v20 = vld [vmem:[%s8428_s28 + $0xe4] ss:$8 sps:$4 sm:$0xff]   ;;  %v7877_v39 = vld [vmem:[%s8428_s28 + $0xe0] ss:$8 sps:$4 sm:$0xff]   ;;  %s7474_s19 = smul.u32 80, %s8420_s24  ;;  %vm4323_vm5 = vcmask 523264  }
 0x26e   : > { %v7875_v3 = vld [vmem:[%s8428_s28 + $0x1e4] ss:$8 sps:$4 sm:$0xff]   ;;  %v7878_v31 = vld [vmem:[%s8428_s28 + $0x1e0] ss:$8 sps:$4 sm:$0xff]   ;;  %v7879_v11 = vld [vmem:[%s8428_s28 + $0xd4] ss:$8 sps:$4 sm:$0xff]  }
 0x26f   : > { %4334 = vmatpush1.bf16.msra.mxu0 %v7841_v25  ;;  %v7881_v12 = vld [vmem:[%s8428_s28 + $0x1d4] ss:$8 sps:$4 sm:$0xff]   ;;  %v7883_v28 = vld [vmem:[%s8428_s28 + $0xd0] ss:$8 sps:$4 sm:$0xff]   ;;  %v7885_v29 = vld [vmem:[%s8428_s28 + $0xc4] ss:$8 sps:$4 sm:$0xff]  }
 0x270   : > { %4375 = vmatpush1.bf16.msra.mxu1 %v7842_v42  ;;  %4335 = vmatprep.subr.bf16.mxu0 %v7843_v63  ;;  %v7884_v27 = vld [vmem:[%s8428_s28 + $0x1d0] ss:$8 sps:$4 sm:$0xff]   ;;  %v7887_v0 = vld [vmem:[%s8428_s28 + $0x1c4] ss:$8 sps:$4 sm:$0xff]   ;;  %s9696_s20 = scalar_lea.vmem [#allocation2], %s7474_s19  ;;  %p7448_p5 = scmp.ne.s32.totalorder %s8420_s24, 3 }
 0x271   : > { %4376 = vmatprep.subr.bf16.mxu1 %v7845_v57  ;;  %v3877_v37 = vld [vmem:[%s9696_s20] sm:$0xff]  ;;  %v3878_v38 = vld [vmem:[%s9696_s20 + $0x8] sm:$0xff]  ;;  %v7891_v49 = vld [vmem:[%s8428_s28 + $0xb4] ss:$8 sps:$4 sm:$0xff]  }
 0x272   : > { %v3882_v36 = vcombine.high %v3877_v37, %v3877_v37  ;;  %v7889_v48 = vld [vmem:[%s8428_s28 + $0xc0] ss:$8 sps:$4 sm:$0xff]   ;;  %v3883_v50 = vcombine.high %v3878_v38, %v3878_v38  ;;  %v7893_v55 = vld [vmem:[%s8428_s28 + $0x1b4] ss:$8 sps:$4 sm:$0xff]   ;;  %v7895_v18 = vld [vmem:[%s8428_s28 + $0xb0] ss:$8 sps:$4 sm:$0xff]   ;;  %v3886_v47 = vpack.c.bf16 %v3877_v37, %v3877_v37  ;;  %v3888_v62 = vpack.c.bf16 %v3878_v38, %v3878_v38 }
 0x273   : > { %4336 = vmatpush1.bf16.msra.mxu0 %v7847_v4  ;;  %v7890_v44 = vld [vmem:[%s8428_s28 + $0x1c0] ss:$8 sps:$4 sm:$0xff]   ;;  %v7896_v26 = vld [vmem:[%s8428_s28 + $0x1b0] ss:$8 sps:$4 sm:$0xff]   ;;  %v7897_v59 = vld [vmem:[%s8428_s28 + $0xa4] ss:$8 sps:$4 sm:$0xff]  }
 0x274   : > { %4377 = vmatpush1.bf16.msra.mxu1 %v7848_v5  ;;  %4337 = vmatprep.subr.bf16.mxu0 %v7849_v6  ;;  %v3887_v41 = vpack.c.bf16 %v3882_v36, %v3882_v36  ;;  %v3889_v53 = vpack.c.bf16 %v3883_v50, %v3883_v50  ;;  %v7899_v54 = vld [vmem:[%s8428_s28 + $0x1a4] ss:$8 sps:$4 sm:$0xff]   ;;  %v7901_v56 = vld [vmem:[%s8428_s28 + $0xa0] ss:$8 sps:$4 sm:$0xff]   ;;  %v7903_v22 = vld [vmem:[%s8428_s28 + $0x94] ss:$8 sps:$4 sm:$0xff]  }
 0x275   : > { %4378 = vmatprep.subr.bf16.mxu1 %v7851_v7  ;;  %v7902_v9 = vld [vmem:[%s8428_s28 + $0x1a0] ss:$8 sps:$4 sm:$0xff]   ;;  %v7905_v58 = vld [vmem:[%s8428_s28 + $0x194] ss:$8 sps:$4 sm:$0xff]   ;;  %v7907_v46 = vld [vmem:[%s8428_s28 + $0x90] ss:$8 sps:$4 sm:$0xff]  }
 0x276   : > { %4359 = vmatprep.mubr.bf16.mxu0 %v3887_v41  ;;  %4400 = vmatprep.mubr.bf16.mxu1 %v3889_v53  ;;  %v7908_v16 = vld [vmem:[%s8428_s28 + $0x190] ss:$8 sps:$4 sm:$0xff]   ;;  %v7909_v61 = vld [vmem:[%s8428_s28 + $0x84] ss:$8 sps:$4 sm:$0xff]   ;;  %v7913_v52 = vld [vmem:[%s8428_s28 + $0x80] ss:$8 sps:$4 sm:$0xff]  }
 0x277   : > { %4338 = vmatpush1.bf16.msra.mxu0 %v7853_v8  ;;  %v7911_v32 = vld [vmem:[%s8428_s28 + $0x184] ss:$8 sps:$4 sm:$0xff]   ;;  %v7914_v15 = vld [vmem:[%s8428_s28 + $0x180] ss:$8 sps:$4 sm:$0xff]   ;;  %v7919_v45 = vld [vmem:[%s8428_s28 + $0x234] ss:$8 sps:$4 sm:$0xff]  }
 0x278   : > { %4379 = vmatpush1.bf16.msra.mxu1 %v7854_v13  ;;  %4339 = vmatprep.subr.bf16.mxu0 %v7855_v14  ;;  %v7922_v34 = vld [vmem:[%s8428_s28 + $0x2b4] ss:$8 sps:$4 sm:$0xff]   ;;  %v7917_v43 = vld [vmem:[%s8428_s28 + $0x230] ss:$8 sps:$4 sm:$0xff]   ;;  %v7925_v60 = vld [vmem:[%s8428_s28 + $0x224] ss:$8 sps:$4 sm:$0xff]  }
 0x279   : > { %4380 = vmatprep.subr.bf16.mxu1 %v7857_v1  ;;  %v7920_v35 = vld [vmem:[%s8428_s28 + $0x2b0] ss:$8 sps:$4 sm:$0xff]   ;;  %v7928_v2 = vld [vmem:[%s8428_s28 + $0x2a4] ss:$8 sps:$4 sm:$0xff]   ;;  %v7923_v25 = vld [vmem:[%s8428_s28 + $0x220] ss:$8 sps:$4 sm:$0xff]  }
 0x27a   : > { %v7926_v42 = vld [vmem:[%s8428_s28 + $0x2a0] ss:$8 sps:$4 sm:$0xff]   ;;  %v7931_v63 = vld [vmem:[%s8428_s28 + $0x214] ss:$8 sps:$4 sm:$0xff]   ;;  %v8322_v4 = vmov 0  }
 0x27b   : > { %4340 = vmatpush1.bf16.msra.mxu0 %v7859_v17  ;;  %v7934_v57 = vld [vmem:[%s8428_s28 + $0x294] ss:$8 sps:$4 sm:$0xff]   ;;  %v7929_v5 = vld [vmem:[%s8428_s28 + $0x210] ss:$8 sps:$4 sm:$0xff]   ;;  %v7937_v7 = vld [vmem:[%s8428_s28 + $0x204] ss:$8 sps:$4 sm:$0xff]  }
 0x27c   : > { %4381 = vmatpush1.bf16.msra.mxu1 %v7860_v19  ;;  %4341 = vmatprep.subr.bf16.mxu0 %v7861_v21  ;;  %v7932_v6 = vld [vmem:[%s8428_s28 + $0x290] ss:$8 sps:$4 sm:$0xff]   ;;  %v7940_v8 = vld [vmem:[%s8428_s28 + $0x284] ss:$8 sps:$4 sm:$0xff]   ;;  %v7935_v13 = vld [vmem:[%s8428_s28 + $0x200] ss:$8 sps:$4 sm:$0xff]  }
 0x27d   : > { %4382 = vmatprep.subr.bf16.mxu1 %v7863_v23  ;;  %v7938_v14 = vld [vmem:[%s8428_s28 + $0x280] ss:$8 sps:$4 sm:$0xff]   ;;  %v3879_v1 = vld [vmem:[%s9696_s20 + $0x10] sm:$0xf]  ;;  %v7943_v17 = vld [vmem:[%s8428_s28 + $0x274] ss:$8 sps:$4 sm:$0xff]  }
 0x27e   : > { %v7946_v19 = vld [vmem:[%s8428_s28 + $0x3b4] ss:$8 sps:$4 sm:$0xff]   ;;  %v3890_v21 = vpack.c.bf16 %v3879_v1, %v3879_v1  ;;  %v7941_v23 = vld [vmem:[%s8428_s28 + $0x270] ss:$8 sps:$4 sm:$0xff]   ;;  %v7976_v50 = vld [vmem:[%s8428_s28 + $0x364] ss:$8 sps:$4 sm:$0xff]  }
 0x27f   : > { %4342 = vmatpush1.bf16.msra.mxu0 %v7865_v24  ;;  %v7944_v24 = vld [vmem:[%s8428_s28 + $0x3b0] ss:$8 sps:$4 sm:$0xff]   ;;  %v7967_v37 = vld [vmem:[%s8428_s28 + $0x334] ss:$8 sps:$4 sm:$0xff]   ;;  %v7971_v41 = vld [vmem:[%s8428_s28 + $0x320] ss:$8 sps:$4 sm:$0xff]  }
 0x280   : > { %4383 = vmatpush1.bf16.msra.mxu1 %v7866_v10  ;;  %4343 = vmatprep.subr.bf16.mxu0 %v7867_v33  ;;  %v7949_v10 = vld [vmem:[%s8428_s28 + $0x264] ss:$8 sps:$4 sm:$0xff]   ;;  %v7970_v36 = vld [vmem:[%s8428_s28 + $0x374] ss:$8 sps:$4 sm:$0xff]   ;;  %v7965_v38 = vld [vmem:[%s8428_s28 + $0x330] ss:$8 sps:$4 sm:$0xff]  }
 0x281   : > { %4384 = vmatprep.subr.bf16.mxu1 %v7869_v30  ;;  %v7952_v33 = vld [vmem:[%s8428_s28 + $0x3a4] ss:$8 sps:$4 sm:$0xff]   ;;  %v7947_v30 = vld [vmem:[%s8428_s28 + $0x260] ss:$8 sps:$4 sm:$0xff]  }
 0x282   : > { %v7974_v53 = vld [vmem:[%s8428_s28 + $0x360] ss:$8 sps:$4 sm:$0xff]  }
 0x283   : > { %4344 = vmatpush2.bf16.msra.mxu0 %v7871_v51  ;;  %v7950_v51 = vld [vmem:[%s8428_s28 + $0x3a0] ss:$8 sps:$4 sm:$0xff]  }
 0x284   : > { %4385 = vmatpush2.bf16.msra.mxu1 %v7872_v40  ;;  %4345 = vmatprep.subr.bf16.mxu0 %v7873_v20  ;;  %v7955_v40 = vld [vmem:[%s8428_s28 + $0x254] ss:$8 sps:$4 sm:$0xff]   ;;  %v8020_v1 = vld [vmem:[%s8428_s28 + $0x3e0] ss:$8 sps:$4 sm:$0xff]  }
 0x285   : > { %4386 = vmatprep.subr.bf16.mxu1 %v7875_v3  ;;  %v7958_v20 = vld [vmem:[%s8428_s28 + $0x394] ss:$8 sps:$4 sm:$0xff]  }
 0x286   : > { %v9748_v3 = vld [vmem:[%s9696_s20 + $0x14] sm:$0xff] }
 0x287   : > { %4346 = vmatpush2.bf16.msra.mxu0 %v7877_v39  ;;  %v7953_v39 = vld [vmem:[%s8428_s28 + $0x250] ss:$8 sps:$4 sm:$0xff]  }
 0x288   : > { %4387 = vmatpush2.bf16.msra.mxu1 %v7878_v31  ;;  %4347 = vmatprep.subr.bf16.mxu0 %v7879_v11  ;;  %v7956_v31 = vld [vmem:[%s8428_s28 + $0x390] ss:$8 sps:$4 sm:$0xff]   ;;  %v4464_v11 = vcombine.high %v9748_v3, %v9748_v3 }
 0x289   : > { %4388 = vmatprep.subr.bf16.mxu1 %v7881_v12  ;;  %v7961_v12 = vld [vmem:[%s8428_s28 + $0x244] ss:$8 sps:$4 sm:$0xff]  }
 0x28b   : > { %4348 = vmatpush2.bf16.msra.mxu0 %v7883_v28  ;;  %v7964_v28 = vld [vmem:[%s8428_s28 + $0x384] ss:$8 sps:$4 sm:$0xff]  }
 0x28c   : > { %4389 = vmatpush2.bf16.msra.mxu1 %v7884_v27  ;;  %4349 = vmatprep.subr.bf16.mxu0 %v7885_v29  ;;  %v4469_v27 = vpack.c.bf16 %v4464_v11, %v4464_v11  ;;  %v7959_v29 = vld [vmem:[%s8428_s28 + $0x240] ss:$8 sps:$4 sm:$0xff]  }
 0x28d   : > { %4390 = vmatprep.subr.bf16.mxu1 %v7887_v0  ;;  %v7962_v0 = vld [vmem:[%s8428_s28 + $0x380] ss:$8 sps:$4 sm:$0xff]  }
 0x28f   : > { %4350 = vmatpush2.bf16.msra.mxu0 %v7889_v48  ;;  %v7968_v48 = vld [vmem:[%s8428_s28 + $0x370] ss:$8 sps:$4 sm:$0xff]  }
 0x290   : > { %4391 = vmatpush2.bf16.msra.mxu1 %v7890_v44  ;;  %4351 = vmatprep.subr.bf16.mxu0 %v7891_v49  ;;  %v7973_v44 = vld [vmem:[%s8428_s28 + $0x324] ss:$8 sps:$4 sm:$0xff]   ;;  %v9765_v49 = vld [vmem:[%s9696_s20 + $0x1c] sm:$0xff] }
 0x291   : > { %4392 = vmatprep.subr.bf16.mxu1 %v7893_v55  ;;  %v4465_v55 = vcombine.high %v9765_v49, %v9765_v49 }
 0x293   : > { %4352 = vmatpush2.bf16.msra.mxu0 %v7895_v18  ;;  %v4471_v18 = vpack.c.bf16 %v4465_v55, %v4465_v55  ;;  %v8056_v55 = vld [vmem:[%s8428_s28 + $0x5d4] ss:$8 sps:$4 sm:$0xff]  }
 0x294   : > { %4393 = vmatpush2.bf16.msra.mxu1 %v7896_v26  ;;  %4353 = vmatprep.subr.bf16.mxu0 %v7897_v59  ;;  %v7979_v26 = vld [vmem:[%s8428_s28 + $0x314] ss:$8 sps:$4 sm:$0xff]  }
 0x295   : > { %4394 = vmatprep.subr.bf16.mxu1 %v7899_v54  ;;  %v7982_v59 = vld [vmem:[%s8428_s28 + $0x354] ss:$8 sps:$4 sm:$0xff]   ;;  %v7977_v54 = vld [vmem:[%s8428_s28 + $0x310] ss:$8 sps:$4 sm:$0xff]  }
 0x297   : > { %4354 = vmatpush2.bf16.msra.mxu0 %v7901_v56  ;;  %v7980_v56 = vld [vmem:[%s8428_s28 + $0x350] ss:$8 sps:$4 sm:$0xff]  }
 0x298   : > { %4395 = vmatpush2.bf16.msra.mxu1 %v7902_v9  ;;  %4355 = vmatprep.subr.bf16.mxu0 %v7903_v22  ;;  %v7985_v9 = vld [vmem:[%s8428_s28 + $0x304] ss:$8 sps:$4 sm:$0xff]  }
 0x299   : > { %4396 = vmatprep.subr.bf16.mxu1 %v7905_v58  ;;  %v7988_v22 = vld [vmem:[%s8428_s28 + $0x344] ss:$8 sps:$4 sm:$0xff]   ;;  %v7983_v58 = vld [vmem:[%s8428_s28 + $0x300] ss:$8 sps:$4 sm:$0xff]  }
 0x29b   : > { %4356 = vmatpush2.bf16.msra.mxu0 %v7907_v46  ;;  %v7986_v46 = vld [vmem:[%s8428_s28 + $0x340] ss:$8 sps:$4 sm:$0xff]  }
 0x29c   : > { %4397 = vmatpush2.bf16.msra.mxu1 %v7908_v16  ;;  %4357 = vmatprep.subr.bf16.mxu0 %v7909_v61  ;;  %v7991_v16 = vld [vmem:[%s8428_s28 + $0x2f4] ss:$8 sps:$4 sm:$0xff]  }
 0x29d   : > { %4398 = vmatprep.subr.bf16.mxu1 %v7911_v32  ;;  %v7994_v61 = vld [vmem:[%s8428_s28 + $0x434] ss:$8 sps:$4 sm:$0xff]   ;;  %v7989_v32 = vld [vmem:[%s8428_s28 + $0x2f0] ss:$8 sps:$4 sm:$0xff]  }
 0x29f   : > { %4358 = vmatpush2.bf16.msra.mxu0 %v7913_v52  ;;  %v7992_v52 = vld [vmem:[%s8428_s28 + $0x430] ss:$8 sps:$4 sm:$0xff]  }
 0x2a0   : > { %4399 = vmatpush2.bf16.msra.mxu1 %v7914_v15  ;;  %4417 = vmatprep.subr.bf16.mxu0 %v7919_v45  ;;  %v7997_v15 = vld [vmem:[%s8428_s28 + $0x2e4] ss:$8 sps:$4 sm:$0xff]  }
 0x2a1   : > { %4909 = vmatprep.subr.bf16.mxu1 %v7922_v34  ;;  %v8000_v45 = vld [vmem:[%s8428_s28 + $0x424] ss:$8 sps:$4 sm:$0xff]   ;;  %v7995_v34 = vld [vmem:[%s8428_s28 + $0x2e0] ss:$8 sps:$4 sm:$0xff]  }
 0x2a2   : > { %4360 = vmatmul.mubr.bf16.vlgmr.msra.gmra.mxu0 %v3886_v47  ;;  %v7998_v47 = vld [vmem:[%s8428_s28 + $0x420] ss:$8 sps:$4 sm:$0xff]  }
 0x2a3   : > { %4401 = vmatmul.mubr.bf16.vlgmr.msra.gmra.mxu1 %v3888_v62  ;;  %4418 = vmatpush1.bf16.msra.mxu0 %v7917_v43  ;;  %v8003_v62 = vld [vmem:[%s8428_s28 + $0x2d4] ss:$8 sps:$4 sm:$0xff]  }
 0x2a4   : > { %4910 = vmatpush1.bf16.msra.mxu1 %v7920_v35  ;;  %4419 = vmatprep.subr.bf16.mxu0 %v7925_v60  ;;  %v8006_v43 = vld [vmem:[%s8428_s28 + $0x414] ss:$8 sps:$4 sm:$0xff]   ;;  %v8001_v35 = vld [vmem:[%s8428_s28 + $0x2d0] ss:$8 sps:$4 sm:$0xff]  }
 0x2a5   : > { %4911 = vmatprep.subr.bf16.mxu1 %v7928_v2  ;;  %4441 = vmatprep.mubr.bf16.mxu0 %v8322_v4  ;;  %v8004_v60 = vld [vmem:[%s8428_s28 + $0x410] ss:$8 sps:$4 sm:$0xff]   ;;  %v8009_v2 = vld [vmem:[%s8428_s28 + $0x2c4] ss:$8 sps:$4 sm:$0xff]  }
 0x2a6   : > { %4941 = vmatprep.mubr.bf16.mxu1 %v4469_v27 }
 0x2a7   : > { %4420 = vmatpush1.bf16.msra.mxu0 %v7923_v25  ;;  %v8012_v25 = vld [vmem:[%s8428_s28 + $0x404] ss:$8 sps:$4 sm:$0xff]  }
 0x2a8   : > { %4912 = vmatpush1.bf16.msra.mxu1 %v7926_v42  ;;  %4421 = vmatprep.subr.bf16.mxu0 %v7931_v63  ;;  %v8007_v42 = vld [vmem:[%s8428_s28 + $0x2c0] ss:$8 sps:$4 sm:$0xff]  }
 0x2a9   : > { %4913 = vmatprep.subr.bf16.mxu1 %v7934_v57  ;;  %v8010_v63 = vld [vmem:[%s8428_s28 + $0x400] ss:$8 sps:$4 sm:$0xff]   ;;  %v8016_v57 = vld [vmem:[%s8428_s28 + $0x3f4] ss:$8 sps:$4 sm:$0xff]  }
 0x2ab   : > { %4422 = vmatpush1.bf16.msra.mxu0 %v7929_v5  ;;  %v8019_v5 = vld [vmem:[%s8428_s28 + $0x474] ss:$8 sps:$4 sm:$0xff]  }
 0x2ac   : > { %4914 = vmatpush1.bf16.msra.mxu1 %v7932_v6  ;;  %4423 = vmatprep.subr.bf16.mxu0 %v7937_v7  ;;  %v4468_v6 = vpack.c.bf16 %v9748_v3, %v9748_v3  ;;  %v8014_v7 = vld [vmem:[%s8428_s28 + $0x3f0] ss:$8 sps:$4 sm:$0xff]   ;;  %v8044_v3 = vld [vmem:[%s8428_s28 + $0x5f4] ss:$8 sps:$4 sm:$0xff]  }
 0x2ad   : > { %4915 = vmatprep.subr.bf16.mxu1 %v7940_v8  ;;  %v8017_v8 = vld [vmem:[%s8428_s28 + $0x470] ss:$8 sps:$4 sm:$0xff]  }
 0x2af   : > { %4424 = vmatpush1.bf16.msra.mxu0 %v7935_v13  ;;  %v8022_v13 = vld [vmem:[%s8428_s28 + $0x3e4] ss:$8 sps:$4 sm:$0xff]  }
 0x2b0   : > { %4916 = vmatpush1.bf16.msra.mxu1 %v7938_v14  ;;  %4950 = vmatprep.subr.bf16.mxu0 %v7946_v19  ;;  %v8025_v14 = vld [vmem:[%s8428_s28 + $0x464] ss:$8 sps:$4 sm:$0xff]   ;;  %v8028_v19 = vld [vmem:[%s8428_s28 + $0x3d4] ss:$8 sps:$4 sm:$0xff]  }
 0x2b1   : > { %4917 = vmatprep.subr.bf16.mxu1 %v7943_v17  ;;  %v8023_v17 = vld [vmem:[%s8428_s28 + $0x460] ss:$8 sps:$4 sm:$0xff]  }
 0x2b2   : > { %6997 = vmatmul.mubr.msk.bf16.vlgmr.msra.gmra.mxu0 %vm4323_vm5, %v3890_v21  ;;  %v8031_v21 = vld [vmem:[%s8428_s28 + $0x454] ss:$8 sps:$4 sm:$0xff]  }
 0x2b3   : > { %4951 = vmatpush1.bf16.msra.mxu0 %v7944_v24  ;;  %4982 = vmatprep.mubr.bf16.mxu0 %v4471_v18  ;;  %v8029_v24 = vld [vmem:[%s8428_s28 + $0x450] ss:$8 sps:$4 sm:$0xff]   ;;  %v8059_v18 = vld [vmem:[%s8428_s28 + $0x4c4] ss:$8 sps:$4 sm:$0xff]  }
 0x2b4   : > { %4918 = vmatpush1.bf16.msra.mxu1 %v7941_v23  ;;  %4952 = vmatprep.subr.bf16.mxu0 %v7952_v33  ;;  %v8026_v23 = vld [vmem:[%s8428_s28 + $0x3d0] ss:$8 sps:$4 sm:$0xff]   ;;  %v8037_v33 = vld [vmem:[%s8428_s28 + $0x444] ss:$8 sps:$4 sm:$0xff]  }
 0x2b5   : > { %4919 = vmatprep.subr.bf16.mxu1 %v7949_v10  ;;  %v8034_v10 = vld [vmem:[%s8428_s28 + $0x3c4] ss:$8 sps:$4 sm:$0xff]  }
 0x2b7   : > { %4953 = vmatpush1.bf16.msra.mxu0 %v7950_v51  ;;  %v8035_v51 = vld [vmem:[%s8428_s28 + $0x440] ss:$8 sps:$4 sm:$0xff]  }
 0x2b8   : > { %4920 = vmatpush1.bf16.msra.mxu1 %v7947_v30  ;;  %4954 = vmatprep.subr.bf16.mxu0 %v7958_v20  ;;  %v8032_v30 = vld [vmem:[%s8428_s28 + $0x3c0] ss:$8 sps:$4 sm:$0xff]   ;;  %v8041_v20 = vld [vmem:[%s8428_s28 + $0x4f4] ss:$8 sps:$4 sm:$0xff]  }
 0x2b9   : > { %4921 = vmatprep.subr.bf16.mxu1 %v7955_v40  ;;  %v7002_v40 = vld [vmem:[%s9696_s20 + $0x24] sm:$0xf] }
 0x2ba   : > { %v4472_v27 = vpack.c.bf16 %v7002_v40, %v7002_v40  ;;  %v8117_v40 = vld [vmem:[%s8428_s28 + $0x520] ss:$8 sps:$4 sm:$0xff]  }
 0x2bb   : > { %4955 = vmatpush1.bf16.msra.mxu0 %v7956_v31  ;;  %v9821_v31 = vld [vmem:[%s9696_s20 + $0x30] sm:$0xff] }
 0x2bc   : > { %4922 = vmatpush1.bf16.msra.mxu1 %v7953_v39  ;;  %4956 = vmatprep.subr.bf16.mxu0 %v7964_v28  ;;  %v9818_v39 = vld [vmem:[%s9696_s20 + $0x28] sm:$0xff]  ;;  %v4470_v28 = vpack.c.bf16 %v9765_v49, %v9765_v49  ;;  %v8053_v49 = vld [vmem:[%s8428_s28 + $0x4d4] ss:$8 sps:$4 sm:$0xff]  }
 0x2bd   : > { %4923 = vmatprep.subr.bf16.mxu1 %v7961_v12  ;;  %v5046_v11 = vcombine.high %v9818_v39, %v9818_v39  ;;  %v5047_v12 = vcombine.high %v9821_v31, %v9821_v31 }
 0x2bf   : > { %4957 = vmatpush1.bf16.msra.mxu0 %v7962_v0  ;;  %v8042_v0 = vld [vmem:[%s8428_s28 + $0x5f0] ss:$8 sps:$4 sm:$0xff]  }
 0x2c0   : > { %4924 = vmatpush1.bf16.msra.mxu1 %v7959_v29  ;;  %4958 = vmatprep.subr.bf16.mxu0 %v7970_v36  ;;  %v8039_v29 = vld [vmem:[%s8428_s28 + $0x4f0] ss:$8 sps:$4 sm:$0xff]   ;;  %v8050_v36 = vld [vmem:[%s8428_s28 + $0x5e4] ss:$8 sps:$4 sm:$0xff]  }
 0x2c1   : > { %4925 = vmatprep.subr.bf16.mxu1 %v7967_v37  ;;  %v8047_v37 = vld [vmem:[%s8428_s28 + $0x4e4] ss:$8 sps:$4 sm:$0xff]  }
 0x2c3   : > { %4959 = vmatpush1.bf16.msra.mxu0 %v7968_v48  ;;  %v5053_v48 = vpack.c.bf16 %v5047_v12, %v5047_v12  ;;  %v8123_v12 = vld [vmem:[%s8428_s28 + $0x510] ss:$8 sps:$4 sm:$0xff]  }
 0x2c4   : > { %4926 = vmatpush2.bf16.msra.mxu1 %v7965_v38  ;;  %4960 = vmatprep.subr.bf16.mxu0 %v7976_v50  ;;  %v5051_v38 = vpack.c.bf16 %v5046_v11, %v5046_v11  ;;  %v8048_v50 = vld [vmem:[%s8428_s28 + $0x5e0] ss:$8 sps:$4 sm:$0xff]   ;;  %v8128_v11 = vld [vmem:[%s8428_s28 + $0x614] ss:$8 sps:$4 sm:$0xff]  }
 0x2c5   : > { %4927 = vmatprep.subr.bf16.mxu1 %v7973_v44  ;;  %v8045_v44 = vld [vmem:[%s8428_s28 + $0x4e0] ss:$8 sps:$4 sm:$0xff]  }
 0x2c7   : > { %4961 = vmatpush1.bf16.msra.mxu0 %v7974_v53  ;;  %v8054_v53 = vld [vmem:[%s8428_s28 + $0x5d0] ss:$8 sps:$4 sm:$0xff]  }
 0x2c8   : > { %4928 = vmatpush2.bf16.msra.mxu1 %v7971_v41  ;;  %4962 = vmatprep.subr.bf16.mxu0 %v7982_v59  ;;  %v8051_v41 = vld [vmem:[%s8428_s28 + $0x4d0] ss:$8 sps:$4 sm:$0xff]   ;;  %v8057_v59 = vld [vmem:[%s8428_s28 + $0x4c0] ss:$8 sps:$4 sm:$0xff]  }
 0x2c9   : > { %4929 = vmatprep.subr.bf16.mxu1 %v7979_v26  ;;  %v8062_v26 = vld [vmem:[%s8428_s28 + $0x5c4] ss:$8 sps:$4 sm:$0xff]  }
 0x2cb   : > { %4963 = vmatpush1.bf16.msra.mxu0 %v7980_v56  ;;  %v8065_v56 = vld [vmem:[%s8428_s28 + $0x4b4] ss:$8 sps:$4 sm:$0xff]  }
 0x2cc   : > { %4930 = vmatpush2.bf16.msra.mxu1 %v7977_v54  ;;  %4964 = vmatprep.subr.bf16.mxu0 %v7988_v22  ;;  %v8060_v54 = vld [vmem:[%s8428_s28 + $0x5c0] ss:$8 sps:$4 sm:$0xff]   ;;  %v8063_v22 = vld [vmem:[%s8428_s28 + $0x4b0] ss:$8 sps:$4 sm:$0xff]  }
 0x2cd   : > { %4931 = vmatprep.subr.bf16.mxu1 %v7985_v9  ;;  %v8068_v9 = vld [vmem:[%s8428_s28 + $0x5b4] ss:$8 sps:$4 sm:$0xff]  }
 0x2cf   : > { %4965 = vmatpush1.bf16.msra.mxu0 %v7986_v46  ;;  %v8071_v46 = vld [vmem:[%s8428_s28 + $0x4a4] ss:$8 sps:$4 sm:$0xff]  }
 0x2d0   : > { %4932 = vmatpush2.bf16.msra.mxu1 %v7983_v58  ;;  %4966 = vmatprep.subr.bf16.mxu0 %v7994_v61  ;;  %v8066_v58 = vld [vmem:[%s8428_s28 + $0x5b0] ss:$8 sps:$4 sm:$0xff]   ;;  %v8069_v61 = vld [vmem:[%s8428_s28 + $0x4a0] ss:$8 sps:$4 sm:$0xff]  }
 0x2d1   : > { %4933 = vmatprep.subr.bf16.mxu1 %v7991_v16  ;;  %v8074_v16 = vld [vmem:[%s8428_s28 + $0x5a4] ss:$8 sps:$4 sm:$0xff]  }
 0x2d3   : > { %4967 = vmatpush2.bf16.msra.mxu0 %v7992_v52  ;;  %v8077_v52 = vld [vmem:[%s8428_s28 + $0x494] ss:$8 sps:$4 sm:$0xff]  }
 0x2d4   : > { %4934 = vmatpush2.bf16.msra.mxu1 %v7989_v32  ;;  %4968 = vmatprep.subr.bf16.mxu0 %v8000_v45  ;;  %v8072_v32 = vld [vmem:[%s8428_s28 + $0x5a0] ss:$8 sps:$4 sm:$0xff]   ;;  %v8075_v45 = vld [vmem:[%s8428_s28 + $0x490] ss:$8 sps:$4 sm:$0xff]  }
 0x2d5   : > { %4935 = vmatprep.subr.bf16.mxu1 %v7997_v15  ;;  %v8080_v15 = vld [vmem:[%s8428_s28 + $0x594] ss:$8 sps:$4 sm:$0xff]  }
 0x2d7   : > { %4969 = vmatpush2.bf16.msra.mxu0 %v7998_v47  ;;  %v8083_v47 = vld [vmem:[%s8428_s28 + $0x484] ss:$8 sps:$4 sm:$0xff]  }
 0x2d8   : > { %4936 = vmatpush2.bf16.msra.mxu1 %v7995_v34  ;;  %4970 = vmatprep.subr.bf16.mxu0 %v8006_v43  ;;  %v8078_v34 = vld [vmem:[%s8428_s28 + $0x590] ss:$8 sps:$4 sm:$0xff]   ;;  %v8081_v43 = vld [vmem:[%s8428_s28 + $0x480] ss:$8 sps:$4 sm:$0xff]  }
 0x2d9   : > { %4937 = vmatprep.subr.bf16.mxu1 %v8003_v62  ;;  %v8086_v62 = vld [vmem:[%s8428_s28 + $0x584] ss:$8 sps:$4 sm:$0xff]  }
 0x2db   : > { %4971 = vmatpush2.bf16.msra.mxu0 %v8004_v60  ;;  %v8089_v60 = vld [vmem:[%s8428_s28 + $0x574] ss:$8 sps:$4 sm:$0xff]  }
 0x2dc   : > { %4938 = vmatpush2.bf16.msra.mxu1 %v8001_v35  ;;  %4972 = vmatprep.subr.bf16.mxu0 %v8012_v25  ;;  %v8084_v35 = vld [vmem:[%s8428_s28 + $0x580] ss:$8 sps:$4 sm:$0xff]   ;;  %v8087_v25 = vld [vmem:[%s8428_s28 + $0x570] ss:$8 sps:$4 sm:$0xff]  }
 0x2dd   : > { %4939 = vmatprep.subr.bf16.mxu1 %v8009_v2  ;;  %v8092_v2 = vld [vmem:[%s8428_s28 + $0x674] ss:$8 sps:$4 sm:$0xff]  }
 0x2df   : > { %4973 = vmatpush2.bf16.msra.mxu0 %v8010_v63  ;;  %v8095_v63 = vld [vmem:[%s8428_s28 + $0x564] ss:$8 sps:$4 sm:$0xff]  }
 0x2e0   : > { %4940 = vmatpush2.bf16.msra.mxu1 %v8007_v42  ;;  %4974 = vmatprep.subr.bf16.mxu0 %v8016_v57  ;;  %v8090_v42 = vld [vmem:[%s8428_s28 + $0x670] ss:$8 sps:$4 sm:$0xff]   ;;  %v8098_v57 = vld [vmem:[%s8428_s28 + $0x664] ss:$8 sps:$4 sm:$0xff]  }
 0x2e1   : > { %4999 = vmatprep.subr.bf16.mxu1 %v8019_v5  ;;  %v8093_v5 = vld [vmem:[%s8428_s28 + $0x560] ss:$8 sps:$4 sm:$0xff]  }
 0x2e3   : > { %4942 = vmatmul.mubr.bf16.vlgmr.msra.gmra.mxu1 %v4468_v6  ;;  %4975 = vmatpush2.bf16.msra.mxu0 %v8014_v7  ;;  %v8096_v6 = vld [vmem:[%s8428_s28 + $0x660] ss:$8 sps:$4 sm:$0xff]   ;;  %v8101_v7 = vld [vmem:[%s8428_s28 + $0x554] ss:$8 sps:$4 sm:$0xff]  }
 0x2e4   : > { %5000 = vmatpush1.bf16.msra.mxu1 %v8017_v8  ;;  %4976 = vmatprep.subr.bf16.mxu0 %v8022_v13  ;;  %v8104_v8 = vld [vmem:[%s8428_s28 + $0x654] ss:$8 sps:$4 sm:$0xff]   ;;  %v8099_v13 = vld [vmem:[%s8428_s28 + $0x550] ss:$8 sps:$4 sm:$0xff]  }
 0x2e5   : > { %5001 = vmatprep.subr.bf16.mxu1 %v8025_v14  ;;  %5023 = vmatprep.mubr.bf16.mxu1 %v8322_v4  ;;  %v8102_v14 = vld [vmem:[%s8428_s28 + $0x650] ss:$8 sps:$4 sm:$0xff]  }
 0x2e7   : > { %4977 = vmatpush2.bf16.msra.mxu0 %v8020_v1  ;;  %v8107_v1 = vld [vmem:[%s8428_s28 + $0x544] ss:$8 sps:$4 sm:$0xff]  }
 0x2e8   : > { %5002 = vmatpush1.bf16.msra.mxu1 %v8023_v17  ;;  %4978 = vmatprep.subr.bf16.mxu0 %v8028_v19  ;;  %v8110_v17 = vld [vmem:[%s8428_s28 + $0x644] ss:$8 sps:$4 sm:$0xff]   ;;  %v8105_v19 = vld [vmem:[%s8428_s28 + $0x540] ss:$8 sps:$4 sm:$0xff]  }
 0x2e9   : > { %5003 = vmatprep.subr.bf16.mxu1 %v8031_v21  ;;  %v8108_v21 = vld [vmem:[%s8428_s28 + $0x640] ss:$8 sps:$4 sm:$0xff]  }
 0x2eb   : > { %4979 = vmatpush2.bf16.msra.mxu0 %v8026_v23  ;;  %v8113_v23 = vld [vmem:[%s8428_s28 + $0x534] ss:$8 sps:$4 sm:$0xff]  }
 0x2ec   : > { %5004 = vmatpush1.bf16.msra.mxu1 %v8029_v24  ;;  %4980 = vmatprep.subr.bf16.mxu0 %v8034_v10  ;;  %v8116_v24 = vld [vmem:[%s8428_s28 + $0x634] ss:$8 sps:$4 sm:$0xff]   ;;  %v8111_v10 = vld [vmem:[%s8428_s28 + $0x530] ss:$8 sps:$4 sm:$0xff]  }
 0x2ed   : > { %5005 = vmatprep.subr.bf16.mxu1 %v8037_v33  ;;  %v8114_v33 = vld [vmem:[%s8428_s28 + $0x630] ss:$8 sps:$4 sm:$0xff]  }
 0x2ef   : > { %4981 = vmatpush2.bf16.msra.mxu0 %v8032_v30  ;;  %v8119_v30 = vld [vmem:[%s8428_s28 + $0x524] ss:$8 sps:$4 sm:$0xff]  }
 0x2f0   : > { %5006 = vmatpush1.bf16.msra.mxu1 %v8035_v51  ;;  %5491 = vmatprep.subr.bf16.mxu0 %v8041_v20  ;;  %v8122_v51 = vld [vmem:[%s8428_s28 + $0x624] ss:$8 sps:$4 sm:$0xff]   ;;  %v8120_v20 = vld [vmem:[%s8428_s28 + $0x620] ss:$8 sps:$4 sm:$0xff]  }
 0x2f1   : > { %5532 = vmatprep.subr.bf16.mxu1 %v8044_v3  ;;  %v8125_v3 = vld [vmem:[%s8428_s28 + $0x514] ss:$8 sps:$4 sm:$0xff]  }
 0x2f2   : > { %4983 = vmatmul.mubr.bf16.vlgmr.msra.gmra.mxu0 %v4470_v28  ;;  %v8126_v28 = vld [vmem:[%s8428_s28 + $0x610] ss:$8 sps:$4 sm:$0xff]  }
 0x2f3   : > { %7147 = vmatmul.mubr.msk.bf16.vlgmr.msra.gmra.mxu1 %vm4323_vm5, %v4472_v27  ;;  %5492 = vmatpush1.bf16.msra.mxu0 %v8039_v29  ;;  %v8131_v27 = vld [vmem:[%s8428_s28 + $0x504] ss:$8 sps:$4 sm:$0xff]  }
 0x2f4   : > { %5533 = vmatpush1.bf16.msra.mxu1 %v8042_v0  ;;  %5493 = vmatprep.subr.bf16.mxu0 %v8047_v37  ;;  %v8134_v29 = vld [vmem:[%s8428_s28 + $0x604] ss:$8 sps:$4 sm:$0xff]   ;;  %v9891_v0 = vld [vmem:[%s9696_s20 + $0x3c] sm:$0xff] }
 0x2f5   : > { %5534 = vmatprep.subr.bf16.mxu1 %v8050_v36  ;;  %5523 = vmatprep.mubr.bf16.mxu0 %v5051_v38  ;;  %v8129_v37 = vld [vmem:[%s8428_s28 + $0x500] ss:$8 sps:$4 sm:$0xff]   ;;  %v8139_v38 = vld [vmem:[%s8428_s28 + $0x6b4] ss:$8 sps:$4 sm:$0xff]  }
 0x2f6   : > { %5564 = vmatprep.mubr.bf16.mxu1 %v5053_v48  ;;  %v8132_v36 = vld [vmem:[%s8428_s28 + $0x600] ss:$8 sps:$4 sm:$0xff]   ;;  %v8142_v48 = vld [vmem:[%s8428_s28 + $0x734] ss:$8 sps:$4 sm:$0xff]  }
 0x2f7   : > { %5494 = vmatpush1.bf16.msra.mxu0 %v8045_v44  ;;  %v5628_v44 = vcombine.high %v9891_v0, %v9891_v0 }
 0x2f8   : > { %5535 = vmatpush1.bf16.msra.mxu1 %v8048_v50  ;;  %5495 = vmatprep.subr.bf16.mxu0 %v8053_v49  ;;  %v5050_v50 = vpack.c.bf16 %v9818_v39, %v9818_v39  ;;  %v5052_v49 = vpack.c.bf16 %v9821_v31, %v9821_v31  ;;  %v8143_v39 = vld [vmem:[%s8428_s28 + $0x6a0] ss:$8 sps:$4 sm:$0xff]  }
 0x2f9   : > { %5536 = vmatprep.subr.bf16.mxu1 %v8056_v55  ;;  %v8137_v55 = vld [vmem:[%s8428_s28 + $0x6b0] ss:$8 sps:$4 sm:$0xff]   ;;  %v8146_v31 = vld [vmem:[%s8428_s28 + $0x720] ss:$8 sps:$4 sm:$0xff]  }
 0x2fb   : > { %5496 = vmatpush1.bf16.msra.mxu0 %v8051_v41  ;;  %v8140_v41 = vld [vmem:[%s8428_s28 + $0x730] ss:$8 sps:$4 sm:$0xff]  }
 0x2fc   : > { %5537 = vmatpush1.bf16.msra.mxu1 %v8054_v53  ;;  %5497 = vmatprep.subr.bf16.mxu0 %v8059_v18  ;;  %v8145_v53 = vld [vmem:[%s8428_s28 + $0x6a4] ss:$8 sps:$4 sm:$0xff]  }
 0x2fd   : > { %5538 = vmatprep.subr.bf16.mxu1 %v8062_v26  ;;  %v8148_v18 = vld [vmem:[%s8428_s28 + $0x724] ss:$8 sps:$4 sm:$0xff]   ;;  %v5633_v26 = vpack.c.bf16 %v5628_v44, %v5628_v44 }
 0x2ff   : > { %5498 = vmatpush1.bf16.msra.mxu0 %v8057_v59  ;;  %v8151_v59 = vld [vmem:[%s8428_s28 + $0x694] ss:$8 sps:$4 sm:$0xff]  }
 0x300   : > { %5539 = vmatpush1.bf16.msra.mxu1 %v8060_v54  ;;  %5499 = vmatprep.subr.bf16.mxu0 %v8065_v56  ;;  %v8154_v54 = vld [vmem:[%s8428_s28 + $0x714] ss:$8 sps:$4 sm:$0xff]   ;;  %v8149_v56 = vld [vmem:[%s8428_s28 + $0x690] ss:$8 sps:$4 sm:$0xff]  }
 0x301   : > { %5540 = vmatprep.subr.bf16.mxu1 %v8068_v9  ;;  %v8152_v9 = vld [vmem:[%s8428_s28 + $0x710] ss:$8 sps:$4 sm:$0xff]  }
 0x303   : > { %5500 = vmatpush1.bf16.msra.mxu0 %v8063_v22  ;;  %v8157_v22 = vld [vmem:[%s8428_s28 + $0x684] ss:$8 sps:$4 sm:$0xff]  }
 0x304   : > { %5541 = vmatpush1.bf16.msra.mxu1 %v8066_v58  ;;  %5501 = vmatprep.subr.bf16.mxu0 %v8071_v46  ;;  %v8160_v58 = vld [vmem:[%s8428_s28 + $0x704] ss:$8 sps:$4 sm:$0xff]  }
 0x305   : > { %5542 = vmatprep.subr.bf16.mxu1 %v8074_v16  ;;  %v9917_v46 = vld [vmem:[%s9696_s20 + $0x44] sm:$0xff] }
 0x306   : > { %v8155_v16 = vld [vmem:[%s8428_s28 + $0x680] ss:$8 sps:$4 sm:$0xff]  }
 0x307   : > { %5502 = vmatpush1.bf16.msra.mxu0 %v8069_v61  ;;  %v8158_v61 = vld [vmem:[%s8428_s28 + $0x700] ss:$8 sps:$4 sm:$0xff]  }
 0x308   : > { %5543 = vmatpush1.bf16.msra.mxu1 %v8072_v32  ;;  %5503 = vmatprep.subr.bf16.mxu0 %v8077_v52  ;;  %v7152_v32 = vld [vmem:[%s9696_s20 + $0x38] sm:$0xf]  ;;  %v8163_v52 = vld [vmem:[%s8428_s28 + $0x6f4] ss:$8 sps:$4 sm:$0xff]  }
 0x309   : > { %5544 = vmatprep.subr.bf16.mxu1 %v8080_v15  ;;  %v8166_v15 = vld [vmem:[%s8428_s28 + $0x834] ss:$8 sps:$4 sm:$0xff]  }
 0x30b   : > { %5504 = vmatpush1.bf16.msra.mxu0 %v8075_v45  ;;  %v5629_v45 = vcombine.high %v9917_v46, %v9917_v46 }
 0x30c   : > { %5545 = vmatpush1.bf16.msra.mxu1 %v8078_v34  ;;  %5505 = vmatprep.subr.bf16.mxu0 %v8083_v47  ;;  %v5054_v34 = vpack.c.bf16 %v7152_v32, %v7152_v32  ;;  %v8161_v47 = vld [vmem:[%s8428_s28 + $0x6f0] ss:$8 sps:$4 sm:$0xff]   ;;  %v8230_v32 = vld [vmem:[%s8428_s28 + $0x880] ss:$8 sps:$4 sm:$0xff]  }
 0x30d   : > { %5546 = vmatprep.subr.bf16.mxu1 %v8086_v62  ;;  %v8164_v62 = vld [vmem:[%s8428_s28 + $0x830] ss:$8 sps:$4 sm:$0xff]  }
 0x30f   : > { %5506 = vmatpush1.bf16.msra.mxu0 %v8081_v43  ;;  %v8169_v43 = vld [vmem:[%s8428_s28 + $0x6e4] ss:$8 sps:$4 sm:$0xff]  }
 0x310   : > { %5547 = vmatpush1.bf16.msra.mxu1 %v8084_v35  ;;  %5507 = vmatprep.subr.bf16.mxu0 %v8089_v60  ;;  %v8172_v35 = vld [vmem:[%s8428_s28 + $0x824] ss:$8 sps:$4 sm:$0xff]   ;;  %v5635_v60 = vpack.c.bf16 %v5629_v45, %v5629_v45  ;;  %v5632_v45 = vpack.c.bf16 %v9891_v0, %v9891_v0 }
 0x311   : > { %5548 = vmatprep.subr.bf16.mxu1 %v8092_v2  ;;  %v8167_v2 = vld [vmem:[%s8428_s28 + $0x6e0] ss:$8 sps:$4 sm:$0xff]  }
 0x313   : > { %5508 = vmatpush2.bf16.msra.mxu0 %v8087_v25  ;;  %v8170_v25 = vld [vmem:[%s8428_s28 + $0x820] ss:$8 sps:$4 sm:$0xff]  }
 0x314   : > { %5549 = vmatpush2.bf16.msra.mxu1 %v8090_v42  ;;  %5509 = vmatprep.subr.bf16.mxu0 %v8095_v63  ;;  %v8175_v42 = vld [vmem:[%s8428_s28 + $0x6d4] ss:$8 sps:$4 sm:$0xff]  }
 0x315   : > { %5550 = vmatprep.subr.bf16.mxu1 %v8098_v57  ;;  %v8178_v63 = vld [vmem:[%s8428_s28 + $0x814] ss:$8 sps:$4 sm:$0xff]   ;;  %v8173_v57 = vld [vmem:[%s8428_s28 + $0x6d0] ss:$8 sps:$4 sm:$0xff]  }
 0x317   : > { %5510 = vmatpush2.bf16.msra.mxu0 %v8093_v5  ;;  %v8176_v5 = vld [vmem:[%s8428_s28 + $0x810] ss:$8 sps:$4 sm:$0xff]  }
 0x318   : > { %5551 = vmatpush2.bf16.msra.mxu1 %v8096_v6  ;;  %5511 = vmatprep.subr.bf16.mxu0 %v8101_v7  ;;  %v8181_v6 = vld [vmem:[%s8428_s28 + $0x6c4] ss:$8 sps:$4 sm:$0xff]  }
 0x319   : > { %5552 = vmatprep.subr.bf16.mxu1 %v8104_v8  ;;  %v8184_v7 = vld [vmem:[%s8428_s28 + $0x804] ss:$8 sps:$4 sm:$0xff]   ;;  %v8179_v8 = vld [vmem:[%s8428_s28 + $0x6c0] ss:$8 sps:$4 sm:$0xff]  }
 0x31b   : > { %5512 = vmatpush2.bf16.msra.mxu0 %v8099_v13  ;;  %v8182_v13 = vld [vmem:[%s8428_s28 + $0x800] ss:$8 sps:$4 sm:$0xff]  }
 0x31c   : > { %5553 = vmatpush2.bf16.msra.mxu1 %v8102_v14  ;;  %5513 = vmatprep.subr.bf16.mxu0 %v8107_v1  ;;  %v8187_v14 = vld [vmem:[%s8428_s28 + $0x7b4] ss:$8 sps:$4 sm:$0xff]  }
 0x31d   : > { %5554 = vmatprep.subr.bf16.mxu1 %v8110_v17  ;;  %v8190_v1 = vld [vmem:[%s8428_s28 + $0x7f4] ss:$8 sps:$4 sm:$0xff]   ;;  %v8185_v17 = vld [vmem:[%s8428_s28 + $0x7b0] ss:$8 sps:$4 sm:$0xff]  }
 0x31f   : > { %5514 = vmatpush2.bf16.msra.mxu0 %v8105_v19  ;;  %v8188_v19 = vld [vmem:[%s8428_s28 + $0x7f0] ss:$8 sps:$4 sm:$0xff]  }
 0x320   : > { %5555 = vmatpush2.bf16.msra.mxu1 %v8108_v21  ;;  %5515 = vmatprep.subr.bf16.mxu0 %v8113_v23  ;;  %v8193_v21 = vld [vmem:[%s8428_s28 + $0x7a4] ss:$8 sps:$4 sm:$0xff]  }
 0x321   : > { %5556 = vmatprep.subr.bf16.mxu1 %v8116_v24  ;;  %v8196_v23 = vld [vmem:[%s8428_s28 + $0x7e4] ss:$8 sps:$4 sm:$0xff]   ;;  %v8191_v24 = vld [vmem:[%s8428_s28 + $0x7a0] ss:$8 sps:$4 sm:$0xff]  }
 0x323   : > { %5516 = vmatpush2.bf16.msra.mxu0 %v8111_v10  ;;  %v8194_v10 = vld [vmem:[%s8428_s28 + $0x7e0] ss:$8 sps:$4 sm:$0xff]  }
 0x324   : > { %5557 = vmatpush2.bf16.msra.mxu1 %v8114_v33  ;;  %5517 = vmatprep.subr.bf16.mxu0 %v8119_v30  ;;  %v8199_v33 = vld [vmem:[%s8428_s28 + $0x794] ss:$8 sps:$4 sm:$0xff]  }
 0x325   : > { %5558 = vmatprep.subr.bf16.mxu1 %v8122_v51  ;;  %v8202_v30 = vld [vmem:[%s8428_s28 + $0x7d4] ss:$8 sps:$4 sm:$0xff]   ;;  %v8197_v51 = vld [vmem:[%s8428_s28 + $0x790] ss:$8 sps:$4 sm:$0xff]  }
 0x327   : > { %5518 = vmatpush2.bf16.msra.mxu0 %v8117_v40  ;;  %v8200_v40 = vld [vmem:[%s8428_s28 + $0x7d0] ss:$8 sps:$4 sm:$0xff]  }
 0x328   : > { %5559 = vmatpush2.bf16.msra.mxu1 %v8120_v20  ;;  %5519 = vmatprep.subr.bf16.mxu0 %v8125_v3  ;;  %v8205_v20 = vld [vmem:[%s8428_s28 + $0x784] ss:$8 sps:$4 sm:$0xff]  }
 0x329   : > { %5560 = vmatprep.subr.bf16.mxu1 %v8128_v11  ;;  %v8208_v3 = vld [vmem:[%s8428_s28 + $0x7c4] ss:$8 sps:$4 sm:$0xff]   ;;  %v8203_v11 = vld [vmem:[%s8428_s28 + $0x780] ss:$8 sps:$4 sm:$0xff]  }
 0x32b   : > { %5520 = vmatpush2.bf16.msra.mxu0 %v8123_v12  ;;  %v8206_v12 = vld [vmem:[%s8428_s28 + $0x7c0] ss:$8 sps:$4 sm:$0xff]  }
 0x32c   : > { %5561 = vmatpush2.bf16.msra.mxu1 %v8126_v28  ;;  %5521 = vmatprep.subr.bf16.mxu0 %v8131_v27  ;;  %v8211_v28 = vld [vmem:[%s8428_s28 + $0x774] ss:$8 sps:$4 sm:$0xff]  }
 0x32d   : > { %5562 = vmatprep.subr.bf16.mxu1 %v8134_v29  ;;  %v8214_v27 = vld [vmem:[%s8428_s28 + $0x8b4] ss:$8 sps:$4 sm:$0xff]   ;;  %v8209_v29 = vld [vmem:[%s8428_s28 + $0x770] ss:$8 sps:$4 sm:$0xff]  }
 0x32f   : > { %5522 = vmatpush2.bf16.msra.mxu0 %v8129_v37  ;;  %v8212_v37 = vld [vmem:[%s8428_s28 + $0x8b0] ss:$8 sps:$4 sm:$0xff]  }
 0x330   : > { %5563 = vmatpush2.bf16.msra.mxu1 %v8132_v36  ;;  %5581 = vmatprep.subr.bf16.mxu0 %v8139_v38  ;;  %v8217_v36 = vld [vmem:[%s8428_s28 + $0x764] ss:$8 sps:$4 sm:$0xff]  }
 0x331   : > { %6073 = vmatprep.subr.bf16.mxu1 %v8142_v48  ;;  %v8220_v38 = vld [vmem:[%s8428_s28 + $0x8a4] ss:$8 sps:$4 sm:$0xff]  }
 0x332   : > { %5524 = vmatmul.mubr.bf16.vlgmr.msra.gmra.mxu0 %v5050_v50 }
 0x333   : > { %5565 = vmatmul.mubr.bf16.vlgmr.msra.gmra.mxu1 %v5052_v49  ;;  %5582 = vmatpush1.bf16.msra.mxu0 %v8137_v55  ;;  %v8215_v49 = vld [vmem:[%s8428_s28 + $0x760] ss:$8 sps:$4 sm:$0xff]  }
 0x334   : > { %6074 = vmatpush1.bf16.msra.mxu1 %v8140_v41  ;;  %5583 = vmatprep.subr.bf16.mxu0 %v8145_v53  ;;  %v8218_v55 = vld [vmem:[%s8428_s28 + $0x8a0] ss:$8 sps:$4 sm:$0xff]  }
 0x335   : > { %6075 = vmatprep.subr.bf16.mxu1 %v8148_v18  ;;  %5605 = vmatprep.mubr.bf16.mxu0 %v8322_v4  ;;  %v8223_v18 = vld [vmem:[%s8428_s28 + $0x754] ss:$8 sps:$4 sm:$0xff]  }
 0x336   : > { %6105 = vmatprep.mubr.bf16.mxu1 %v5633_v26  ;;  %v8226_v26 = vld [vmem:[%s8428_s28 + $0x894] ss:$8 sps:$4 sm:$0xff]  }
 0x337   : > { %5584 = vmatpush1.bf16.msra.mxu0 %v8143_v39 }
 0x338   : > { %6076 = vmatpush1.bf16.msra.mxu1 %v8146_v31  ;;  %5585 = vmatprep.subr.bf16.mxu0 %v8151_v59 }
 0x339   : > { %6077 = vmatprep.subr.bf16.mxu1 %v8154_v54  ;;  %v8221_v54 = vld [vmem:[%s8428_s28 + $0x750] ss:$8 sps:$4 sm:$0xff]  }
 0x33b   : > { %5586 = vmatpush1.bf16.msra.mxu0 %v8149_v56  ;;  %v8224_v56 = vld [vmem:[%s8428_s28 + $0x890] ss:$8 sps:$4 sm:$0xff]  }
 0x33c   : > { %6078 = vmatpush1.bf16.msra.mxu1 %v8152_v9  ;;  %5587 = vmatprep.subr.bf16.mxu0 %v8157_v22 }
 0x33d   : > { %6079 = vmatprep.subr.bf16.mxu1 %v8160_v58  ;;  %v8229_v58 = vld [vmem:[%s8428_s28 + $0x744] ss:$8 sps:$4 sm:$0xff]  }
 0x33f   : > { %5588 = vmatpush1.bf16.msra.mxu0 %v8155_v16  ;;  %v8232_v16 = vld [vmem:[%s8428_s28 + $0x884] ss:$8 sps:$4 sm:$0xff]  }
 0x340   : > { %6080 = vmatpush1.bf16.msra.mxu1 %v8158_v61  ;;  %6114 = vmatprep.subr.bf16.mxu0 %v8166_v15  ;;  %v8227_v61 = vld [vmem:[%s8428_s28 + $0x740] ss:$8 sps:$4 sm:$0xff]   ;;  %v8239_v15 = vld [vmem:[%s8428_s28 + $0x8f4] ss:$8 sps:$4 sm:$0xff]  }
 0x341   : > { %6081 = vmatprep.subr.bf16.mxu1 %v8163_v52  ;;  %v8236_v52 = vld [vmem:[%s8428_s28 + $0x874] ss:$8 sps:$4 sm:$0xff]  }
 0x342   : > { %7297 = vmatmul.mubr.msk.bf16.vlgmr.msra.gmra.mxu0 %vm4323_vm5, %v5054_v34  ;;  %v8234_v34 = vld [vmem:[%s8428_s28 + $0x870] ss:$8 sps:$4 sm:$0xff]  }
 0x343   : > { %6115 = vmatpush1.bf16.msra.mxu0 %v8164_v62  ;;  %6146 = vmatprep.mubr.bf16.mxu0 %v5635_v60  ;;  %v8242_v62 = vld [vmem:[%s8428_s28 + $0x864] ss:$8 sps:$4 sm:$0xff]  }
 0x344   : > { %6082 = vmatpush1.bf16.msra.mxu1 %v8161_v47  ;;  %6116 = vmatprep.subr.bf16.mxu0 %v8172_v35  ;;  %v8237_v47 = vld [vmem:[%s8428_s28 + $0x8f0] ss:$8 sps:$4 sm:$0xff]  }
 0x345   : > { %6083 = vmatprep.subr.bf16.mxu1 %v8169_v43  ;;  %v8245_v43 = vld [vmem:[%s8428_s28 + $0x8e4] ss:$8 sps:$4 sm:$0xff]  }
 0x347   : > { %6117 = vmatpush1.bf16.msra.mxu0 %v8170_v25  ;;  %v8243_v25 = vld [vmem:[%s8428_s28 + $0x8e0] ss:$8 sps:$4 sm:$0xff]  }
 0x348   : > { %6084 = vmatpush1.bf16.msra.mxu1 %v8167_v2  ;;  %6118 = vmatprep.subr.bf16.mxu0 %v8178_v63  ;;  %v8240_v2 = vld [vmem:[%s8428_s28 + $0x860] ss:$8 sps:$4 sm:$0xff]   ;;  %v8251_v63 = vld [vmem:[%s8428_s28 + $0x8d4] ss:$8 sps:$4 sm:$0xff]  }
 0x349   : > { %6085 = vmatprep.subr.bf16.mxu1 %v8175_v42  ;;  %v8248_v42 = vld [vmem:[%s8428_s28 + $0x854] ss:$8 sps:$4 sm:$0xff]  }
 0x34b   : > { %6119 = vmatpush1.bf16.msra.mxu0 %v8176_v5 }
 0x34c   : > { %6086 = vmatpush1.bf16.msra.mxu1 %v8173_v57  ;;  %6120 = vmatprep.subr.bf16.mxu0 %v8184_v7  ;;  %v8246_v7 = vld [vmem:[%s8428_s28 + $0x850] ss:$8 sps:$4 sm:$0xff]  }
 0x34d   : > { %6087 = vmatprep.subr.bf16.mxu1 %v8181_v6 }
 0x34f   : > { %6121 = vmatpush1.bf16.msra.mxu0 %v8182_v13 }
 0x350   : > { %6088 = vmatpush1.bf16.msra.mxu1 %v8179_v8  ;;  %6122 = vmatprep.subr.bf16.mxu0 %v8190_v1  ;;  %v8249_v8 = vld [vmem:[%s8428_s28 + $0x8d0] ss:$8 sps:$4 sm:$0xff]   ;;  %v8257_v1 = vld [vmem:[%s8428_s28 + $0x8c4] ss:$8 sps:$4 sm:$0xff]  }
 0x351   : > { %6089 = vmatprep.subr.bf16.mxu1 %v8187_v14  ;;  %v8254_v14 = vld [vmem:[%s8428_s28 + $0x844] ss:$8 sps:$4 sm:$0xff]  }
 0x353   : > { %6123 = vmatpush1.bf16.msra.mxu0 %v8188_v19  ;;  %v8255_v19 = vld [vmem:[%s8428_s28 + $0x8c0] ss:$8 sps:$4 sm:$0xff]  }
 0x354   : > { %6090 = vmatpush2.bf16.msra.mxu1 %v8185_v17  ;;  %6124 = vmatprep.subr.bf16.mxu0 %v8196_v23  ;;  %v8252_v17 = vld [vmem:[%s8428_s28 + $0x840] ss:$8 sps:$4 sm:$0xff]  }
 0x355   : > { %6091 = vmatprep.subr.bf16.mxu1 %v8193_v21  ;;  %v7302_v21 = vld [vmem:[%s9696_s20 + $0x4c] sm:$0xf] }
 0x356   : > { %v5636_v23 = vpack.c.bf16 %v7302_v21, %v7302_v21 }
 0x357   : > { %6125 = vmatpush1.bf16.msra.mxu0 %v8194_v10 }
 0x358   : > { %6092 = vmatpush2.bf16.msra.mxu1 %v8191_v24  ;;  %6126 = vmatprep.subr.bf16.mxu0 %v8202_v30 }
 0x359   : > { %6093 = vmatprep.subr.bf16.mxu1 %v8199_v33 }
 0x35b   : > { %6127 = vmatpush1.bf16.msra.mxu0 %v8200_v40 }
 0x35c   : > { %6094 = vmatpush2.bf16.msra.mxu1 %v8197_v51  ;;  %6128 = vmatprep.subr.bf16.mxu0 %v8208_v3 }
 0x35d   : > { %6095 = vmatprep.subr.bf16.mxu1 %v8205_v20 }
 0x35f   : > { %6129 = vmatpush1.bf16.msra.mxu0 %v8206_v12 }
 0x360   : > { %6096 = vmatpush2.bf16.msra.mxu1 %v8203_v11  ;;  %6130 = vmatprep.subr.bf16.mxu0 %v8214_v27  ;;  %v3872_v27 = vld [vmem:[#allocation3] sm:$0xff] }
 0x361   : > { %6097 = vmatprep.subr.bf16.mxu1 %v8211_v28 }
 0x362   : > { %v4361_v48 = vpop.f32.mrf.mxu0 }
 0x363   : > { %v4402_v44 = vpop.f32.mrf.mxu1  ;;  %6131 = vmatpush2.bf16.msra.mxu0 %v8212_v37 }
 0x364   : > { %v4403_v50 = vadd.f32 %v4402_v44, %v4361_v48  ;;  %6098 = vmatpush2.bf16.msra.mxu1 %v8209_v29  ;;  %v4363_v41 = vpop.f32.mrf.mxu0  ;;  %6132 = vmatprep.subr.bf16.mxu0 %v8220_v38 }
 0x365   : > { %v4404_v53 = vpop.f32.mrf.mxu1  ;;  %6099 = vmatprep.subr.bf16.mxu1 %v8217_v36 }
 0x366   : > { %v4405_v39 = vadd.f32 %v4404_v53, %v4363_v41  ;;  %v4365_v31 = vpop.f32.mrf.mxu0 }
 0x367   : > { %v4406_v59 = vpop.f32.mrf.mxu1  ;;  %6133 = vmatpush2.bf16.msra.mxu0 %v8218_v55 }
 0x368   : > { %6100 = vmatpush2.bf16.msra.mxu1 %v8215_v49  ;;  %v4366_v9 = vpop.f32.mrf.mxu0  ;;  %6134 = vmatprep.subr.bf16.mxu0 %v8226_v26 }
 0x369   : > { %v4407_v22 = vpop.f32.mrf.mxu1  ;;  %6101 = vmatprep.subr.bf16.mxu1 %v8223_v18 }
 0x36b   : > { %6135 = vmatpush2.bf16.msra.mxu0 %v8224_v56 }
 0x36c   : > { %6102 = vmatpush2.bf16.msra.mxu1 %v8221_v54  ;;  %6136 = vmatprep.subr.bf16.mxu0 %v8232_v16 }
 0x36d   : > { %6103 = vmatprep.subr.bf16.mxu1 %v8229_v58 }
 0x36f   : > { %6137 = vmatpush2.bf16.msra.mxu0 %v8230_v32 }
 0x370   : > { %6104 = vmatpush2.bf16.msra.mxu1 %v8227_v61  ;;  %6138 = vmatprep.subr.bf16.mxu0 %v8236_v52 }
 0x371   : > { %6163 = vmatprep.subr.bf16.mxu1 %v8239_v15 }
 0x372   : > { %v4443_v35 = vpop.f32.mrf.mxu0 }
 0x373   : > { %6106 = vmatmul.mubr.bf16.vlgmr.msra.gmra.mxu1 %v5632_v45  ;;  %v4444_v60 = vadd.f32 %v4443_v35, %v4403_v50  ;;  %6139 = vmatpush2.bf16.msra.mxu0 %v8234_v34 }
 0x374   : > { %6164 = vmatpush1.bf16.msra.mxu1 %v8237_v47  ;;  %v4445_v0 = vpop.f32.mrf.mxu0  ;;  %6140 = vmatprep.subr.bf16.mxu0 %v8242_v62 }
 0x375   : > { %6165 = vmatprep.subr.bf16.mxu1 %v8245_v43  ;;  %v4446_v57 = vadd.f32 %v4445_v0, %v4405_v39  ;;  %6187 = vmatprep.mubr.bf16.mxu1 %v8322_v4  ;;  %v5634_v4 = vpack.c.bf16 %v9917_v46, %v9917_v46 }
 0x376   : > { %v4447_v5 = vpop.f32.mrf.mxu0 }
 0x377   : > { %v4452_v6 = vcombine.low %v4444_v60, %v4446_v57  ;;  %6141 = vmatpush2.bf16.msra.mxu0 %v8240_v2 }
 0x378   : > { %6166 = vmatpush1.bf16.msra.mxu1 %v8243_v25  ;;  %v4448_v13 = vpop.f32.mrf.mxu0  ;;  %6142 = vmatprep.subr.bf16.mxu0 %v8248_v42 }
 0x379   : > { %6167 = vmatprep.subr.bf16.mxu1 %v8251_v63  ;;  %v4454_v48 = vadd.f32 %v4452_v6, %v3872_v27 }
 0x37b   : > { %6143 = vmatpush2.bf16.msra.mxu0 %v8246_v7 }
 0x37c   : > { %6168 = vmatpush1.bf16.msra.mxu1 %v8249_v8  ;;  %6144 = vmatprep.subr.bf16.mxu0 %v8254_v14 }
 0x37d   : > { %6169 = vmatprep.subr.bf16.mxu1 %v8257_v1 }
 0x37f   : > { %6145 = vmatpush2.bf16.msra.mxu0 %v8252_v17 }
 0x380   : > { %6170 = vmatpush1.bf16.msra.mxu1 %v8255_v19 }
 0x382   : > { %6147 = vmatmul.mubr.bf16.vlgmr.msra.gmra.mxu0 %v5634_v4 }
 0x383   : > { %7447 = vmatmul.mubr.msk.bf16.vlgmr.msra.gmra.mxu1 %vm4323_vm5, %v5636_v23 }
 0x3a3   : > { %v4943_v24 = vpop.f32.mrf.mxu1 }
 0x3a5   : > { %v4945_v10 = vpop.f32.mrf.mxu1 }
 0x3a7   : > { %v4947_v33 = vpop.f32.mrf.mxu1 }
 0x3a9   : > { %v4948_v30 = vpop.f32.mrf.mxu1 }
 0x3b2   : > { %v4984_v51 = vpop.f32.mrf.mxu0 }
 0x3b3   : > { %v5025_v40 = vpop.f32.mrf.mxu1  ;;  %v4985_v20 = vadd.f32 %v4984_v51, %v4943_v24 }
 0x3b4   : > { %v4986_v3 = vpop.f32.mrf.mxu0 }
 0x3b5   : > { %v5027_v11 = vpop.f32.mrf.mxu1  ;;  %v5026_v12 = vadd.f32 %v5025_v40, %v4985_v20  ;;  %v4987_v28 = vadd.f32 %v4986_v3, %v4945_v10 }
 0x3b6   : > { %v4988_v29 = vpop.f32.mrf.mxu0 }
 0x3b7   : > { %v5029_v46 = vpop.f32.mrf.mxu1  ;;  %v5028_v37 = vadd.f32 %v5027_v11, %v4987_v28 }
 0x3b8   : > { %v4989_v36 = vpop.f32.mrf.mxu0 }
 0x3b9   : > { %v5030_v38 = vpop.f32.mrf.mxu1  ;;  %v5034_v44 = vcombine.low %v5026_v12, %v5028_v37 }
 0x3bb   : > { %v5036_v50 = vadd.f32 %v5034_v44, %v4454_v48 }
 0x3f2   : > { %v5525_v49 = vpop.f32.mrf.mxu0 }
 0x3f3   : > { %v5566_v55 = vpop.f32.mrf.mxu1 }
 0x3f4   : > { %v5567_v41 = vadd.f32 %v5566_v55, %v5525_v49  ;;  %v5527_v53 = vpop.f32.mrf.mxu0 }
 0x3f5   : > { %v5568_v18 = vpop.f32.mrf.mxu1 }
 0x3f6   : > { %v5569_v26 = vadd.f32 %v5568_v18, %v5527_v53  ;;  %v5529_v39 = vpop.f32.mrf.mxu0 }
 0x3f7   : > { %v5570_v31 = vpop.f32.mrf.mxu1 }
 0x3f8   : > { %v5530_v59 = vpop.f32.mrf.mxu0 }
 0x3f9   : > { %v5571_v54 = vpop.f32.mrf.mxu1 }
 0x402   : > { %v5607_v56 = vpop.f32.mrf.mxu0 }
 0x403   : > { %v5608_v9 = vadd.f32 %v5607_v56, %v5567_v41 }
 0x404   : > { %v5609_v22 = vpop.f32.mrf.mxu0 }
 0x405   : > { %v5610_v58 = vadd.f32 %v5609_v22, %v5569_v26 }
 0x406   : > { %v5611_v16 = vpop.f32.mrf.mxu0 }
 0x407   : > { %v5616_v61 = vcombine.low %v5608_v9, %v5610_v58 }
 0x408   : > { %v5612_v32 = vpop.f32.mrf.mxu0 }
 0x409   : > { %v5618_v52 = vadd.f32 %v5616_v61, %v5036_v50 }
 0x433   : > { %v6107_v15 = vpop.f32.mrf.mxu1 }
 0x435   : > { %v6109_v45 = vpop.f32.mrf.mxu1 }
 0x437   : > { %v6111_v34 = vpop.f32.mrf.mxu1 }
 0x439   : > { %v6112_v47 = vpop.f32.mrf.mxu1 }
 0x442   : > { %v6148_v62 = vpop.f32.mrf.mxu0 }
 0x443   : > { %v6189_v43 = vpop.f32.mrf.mxu1  ;;  %v6149_v35 = vadd.f32 %v6148_v62, %v6107_v15 }
 0x444   : > { %v6150_v60 = vpop.f32.mrf.mxu0 }
 0x445   : > { %v6191_v2 = vpop.f32.mrf.mxu1  ;;  %v6151_v25 = vadd.f32 %v6150_v60, %v6109_v45  ;;  %v6190_v63 = vadd.f32 %v6189_v43, %v6149_v35 }
 0x446   : > { %v6152_v0 = vpop.f32.mrf.mxu0 }
 0x447   : > { %v6193_v42 = vpop.f32.mrf.mxu1  ;;  %v6192_v57 = vadd.f32 %v6191_v2, %v6151_v25 }
 0x448   : > { %v6153_v5 = vpop.f32.mrf.mxu0 }
 0x449   : > { %v6194_v6 = vpop.f32.mrf.mxu1  ;;  %v6198_v7 = vcombine.low %v6190_v63, %v6192_v57  ;;  %6205 = sbr.rel (%p7448_p5) target bundleno = 1859 (0x743), region = 88 }
 0x44b   : > { %v6200_v8 = vadd.f32 %v6198_v7, %v5618_v52 }
 0x44d   : > { %6201 = vst [vmem:[#allocation3] sm:$0xff] %v6200_v8 }
 0x44e   : > { %v8259_v13 = vld [vmem:[%s10187_s13 + $0x78] sm:$0xff]   ;;  %v8261_v1 = vld [vmem:[%s10187_s13 + $0x70] sm:$0xff]   ;;  %v8263_v19 = vld [vmem:[%s10187_s13 + $0x68] sm:$0xff]   ;;  %v6208_v21 = vlaneseq  ;;  %v8323_v6 = vmov 0.0   ;;  %vm8324_vm6 = vmmov 0   ;;  %vm6338_vm7 = vcmask 3072  }
 0x44f   : > { %v8260_v14 = vld [vmem:[%s10187_s13 + $0x38] sm:$0xff]   ;;  %7556 = vmatprep.subr.bf16.mxu1 %v8259_v13  ;;  %v8262_v17 = vld [vmem:[%s10187_s13 + $0x30] sm:$0xff]   ;;  %v8264_v4 = vld [vmem:[%s10187_s13 + $0x28] sm:$0xff]   ;;  %vm6594_vm8 = vcmask 27648   ;;  %vm6617_vm10 = vcmask 1043456   ;;  %vm6627_vm11 = vcmask 0  }
 0x450   : > { %7557 = vmatpush3.bf16.msra.mxu1 %v8260_v14  ;;  %v8265_v23 = vld [vmem:[%s10187_s13 + $0x60] sm:$0xff]   ;;  %v10019_v24 = vshrl.u32 %v6208_v21, 7  ;;  %v8267_v33 = vld [vmem:[%s10187_s13 + $0x58] sm:$0xff]   ;;  %v8269_v20 = vld [vmem:[%s10187_s13 + $0x50] sm:$0xff]  }
 0x451   : > { %7558 = vmatprep.subr.bf16.mxu1 %v8261_v1  ;;  %v8266_v10 = vld [vmem:[%s10187_s13 + $0x20] sm:$0xff]   ;;  %v8268_v40 = vld [vmem:[%s10187_s13 + $0x18] sm:$0xff]   ;;  %v6250_v29 = vld [vmem:[%s10180_s6 + $0xf0] sm:$0xff] }
 0x452   : > { %v6210_v30 = vsub.s32 0, %v10019_v24  ;;  %v6214_v51 = vsub.s32 1, %v10019_v24  ;;  %v6206_v3 = vld [vmem:[%s10179_s5] sm:$0x3]  ;;  %v6251_v11 = vld [vmem:[%s10180_s6 + $0xf8] sm:$0xff]  ;;  %v6234_v46 = vld [vmem:[%s10180_s6 + $0x70] sm:$0xff] }
 0x453   : > { %v6235_v12 = vld [vmem:[%s10180_s6 + $0x78] sm:$0xff]  ;;  %7521 = vmatprep.subr.mxu0 %v6251_v11  ;;  %v6249_v37 = vld [vmem:[%s10180_s6 + $0xe8] sm:$0xff]  ;;  %v8270_v36 = vld [vmem:[%s10187_s13 + $0x10] sm:$0xff]  }
 0x454   : > { %7559 = vmatpush3.bf16.msra.mxu1 %v8262_v17  ;;  %v6211_v28 = vrot.slane %v6206_v3, %v6210_v30  ;;  %v6215_v27 = vrot.slane %v6206_v3, %v6214_v51  ;;  %7522 = vmatpush3.msra.mxu0 %v6235_v12  ;;  %v6233_v48 = vld [vmem:[%s10180_s6 + $0x68] sm:$0xff]  ;;  %v6248_v50 = vld [vmem:[%s10180_s6 + $0xe0] sm:$0xff]  ;;  %v6247_v41 = vld [vmem:[%s10180_s6 + $0xd8] sm:$0xff]  ;;  %v6610_v12 = vand.u32 127, %v6208_v21 }
 0x455   : > { %7560 = vmatprep.subr.bf16.mxu1 %v8263_v19  ;;  %7523 = vmatprep.subr.mxu0 %v6250_v29  ;;  %v8271_v44 = vld [vmem:[%s10187_s13 + $0x48] sm:$0xff]   ;;  %v6232_v55 = vld [vmem:[%s10180_s6 + $0x60] sm:$0xff]  ;;  %v6231_v26 = vld [vmem:[%s10180_s6 + $0x58] sm:$0xff] }
 0x456   : > { %v6216_v38 = vcombine.low %v6211_v28, %v6215_v27  ;;  %7524 = vmatpush3.msra.mxu0 %v6234_v46  ;;  %v8272_v53 = vld [vmem:[%s10187_s13 + $0x8] sm:$0xff]   ;;  %v8273_v39 = vld [vmem:[%s10187_s13 + $0x40] sm:$0xff]   ;;  %v6246_v31 = vld [vmem:[%s10180_s6 + $0xd0] sm:$0xff]  ;;  %vm6611_vm9 = vcmp.eq.s32.totalorder %v10019_v24, %v6610_v12 }
 0x457   : > { %7525 = vmatprep.subr.mxu0 %v6249_v37  ;;  %v6230_v54 = vld [vmem:[%s10180_s6 + $0x50] sm:$0xff]  ;;  %v6245_v56 = vld [vmem:[%s10180_s6 + $0xc8] sm:$0xff]  ;;  %v8274_v9 = vld [vmem:[%s10187_s13] sm:$0xff]  }
 0x458   : > { %7561 = vmatpush3.bf16.msra.mxu1 %v8264_v4  ;;  %v6218_v49 = vadd.f32 %v6216_v38, %v6200_v8  ;;  %7526 = vmatpush3.msra.mxu0 %v6233_v48  ;;  %v6229_v58 = vld [vmem:[%s10180_s6 + $0x48] sm:$0xff]  ;;  %v6244_v16 = vld [vmem:[%s10180_s6 + $0xc0] sm:$0xff]  ;;  %v6243_v52 = vld [vmem:[%s10180_s6 + $0xb8] sm:$0xff] }
 0x459   : > { %7562 = vmatprep.subr.bf16.mxu1 %v8265_v23  ;;  %7527 = vmatprep.subr.mxu0 %v6248_v50  ;;  %v6228_v61 = vld [vmem:[%s10180_s6 + $0x40] sm:$0xff]  ;;  %v6227_v15 = vld [vmem:[%s10180_s6 + $0x38] sm:$0xff]  ;;  %v6242_v45 = vld [vmem:[%s10180_s6 + $0xb0] sm:$0xff] }
 0x45a   : > { %v6219_v18 = vmax.f32 %v6218_v49, 0.0  ;;  %7528 = vmatpush3.msra.mxu0 %v6232_v55  ;;  %v6226_v34 = vld [vmem:[%s10180_s6 + $0x30] sm:$0xff]  ;;  %v6241_v47 = vld [vmem:[%s10180_s6 + $0xa8] sm:$0xff]  ;;  %v6240_v43 = vld [vmem:[%s10180_s6 + $0xa0] sm:$0xff] }
 0x45b   : > { %7529 = vmatprep.subr.mxu0 %v6247_v41  ;;  %v6225_v62 = vld [vmem:[%s10180_s6 + $0x28] sm:$0xff]  ;;  %v6224_v35 = vld [vmem:[%s10180_s6 + $0x20] sm:$0xff]  ;;  %v6239_v60 = vld [vmem:[%s10180_s6 + $0x98] sm:$0xff] }
 0x45c   : > { %7563 = vmatpush3.bf16.msra.mxu1 %v8266_v10  ;;  %v6260_v59 = vcombine.high %v6219_v18, %v6219_v18  ;;  %7530 = vmatpush3.msra.mxu0 %v6231_v26  ;;  %v6340_v32 = vpack.c.bf16 %v6219_v18, %v6219_v18  ;;  %v6223_v2 = vld [vmem:[%s10180_s6 + $0x18] sm:$0xff]  ;;  %v6238_v25 = vld [vmem:[%s10180_s6 + $0x90] sm:$0xff]  ;;  %v6237_v42 = vld [vmem:[%s10180_s6 + $0x88] sm:$0xff] }
 0x45d   : > { %7564 = vmatprep.subr.bf16.mxu1 %v8267_v33  ;;  %7531 = vmatprep.subr.mxu0 %v6246_v31  ;;  %v6222_v0 = vld [vmem:[%s10180_s6 + $0x10] sm:$0xff]  ;;  %v6221_v63 = vld [vmem:[%s10180_s6 + $0x8] sm:$0xff]  ;;  %v6236_v57 = vld [vmem:[%s10180_s6 + $0x80] sm:$0xff] }
 0x45e   : > { %v6341_v22 = vpack.c.bf16 %v6260_v59, %v6260_v59  ;;  %7532 = vmatpush3.msra.mxu0 %v6230_v54  ;;  %6326 = vmatprep.mubr.f32.mxu0 %v6260_v59  ;;  %v6220_v5 = vld [vmem:[%s10180_s6] sm:$0xff]  ;;  %v6517_v7 = vld [vmem:[#allocation4] sm:$0xf]  ;;  %v7449_v10 = vld [vmem:[#allocation5] ss:$0 sm:$0xff] }
 0x45f   : > { %7533 = vmatprep.subr.mxu0 %v6245_v56  ;;  %v7451_v13 = vld [vmem:[%s10188_s14] ss:$0 sm:$0xff] }
 0x460   : > { %7565 = vmatpush3.bf16.msra.mxu1 %v8268_v40  ;;  %6509 = vmatprep.mubr.bf16.mxu1 %v6341_v22 }
 0x461   : > { %7566 = vmatprep.subr.bf16.mxu1 %v8269_v20  ;;  %7534 = vmatpush3.msra.mxu0 %v6229_v58 }
 0x462   : > { %7535 = vmatprep.subr.mxu0 %v6244_v16 }
 0x463   : > { %7536 = vmatpush3.msra.mxu0 %v6228_v61 }
 0x464   : > { %7567 = vmatpush3.bf16.msra.mxu1 %v8270_v36  ;;  %7537 = vmatprep.subr.mxu0 %v6243_v52 }
 0x465   : > { %7568 = vmatprep.subr.bf16.mxu1 %v8271_v44  ;;  %7538 = vmatpush3.msra.mxu0 %v6227_v15 }
 0x466   : > { %7539 = vmatprep.subr.mxu0 %v6242_v45 }
 0x467   : > { %7540 = vmatpush3.msra.mxu0 %v6226_v34 }
 0x468   : > { %7569 = vmatpush3.bf16.msra.mxu1 %v8272_v53  ;;  %7541 = vmatprep.subr.mxu0 %v6241_v47 }
 0x469   : > { %7570 = vmatprep.subr.bf16.mxu1 %v8273_v39  ;;  %7542 = vmatpush3.msra.mxu0 %v6225_v62 }
 0x46a   : > { %7543 = vmatprep.subr.mxu0 %v6240_v43 }
 0x46b   : > { %7544 = vmatpush3.msra.mxu0 %v6224_v35 }
 0x46c   : > { %7571 = vmatpush3.bf16.msra.mxu1 %v8274_v9  ;;  %7545 = vmatprep.subr.mxu0 %v6239_v60 }
 0x46d   : > { %7546 = vmatpush3.msra.mxu0 %v6223_v2 }
 0x46e   : > { %7547 = vmatprep.subr.mxu0 %v6238_v25 }
 0x46f   : > { %6510 = vmatmul.mubr.bf16.vlgmr.msra.gmra.mxu1 %v6340_v32  ;;  %7548 = vmatpush3.msra.mxu0 %v6222_v0 }
 0x470   : > { %7549 = vmatprep.subr.mxu0 %v6237_v42 }
 0x471   : > { %7550 = vmatpush3.msra.mxu0 %v6221_v63 }
 0x472   : > { %7551 = vmatprep.subr.mxu0 %v6236_v57 }
 0x473   : > { %7552 = vmatpush3.msra.mxu0 %v6220_v5 }
 0x474   : > { %6327 = vmatmul.mubr.f32.vlgmr.msra.gmra.mxu0 %v6219_v18  ;;  %7624 = vmatprep.subr.mxu0 %v8323_v6 }
 0x475   : > { %7625 = vmatpush3.xpose.msk.msra.mxu0 %vm4323_vm5, %v6517_v7  ;;  %7626 = vmatprep.mubr.msk.f32.mxu0 %vm8324_vm6, %v8323_v6 }
 0x52f   : > { %v7572_v8 = vpop.f32.mrf.mxu1 }
 0x531   : > { %v7573_v14 = vpop.f32.mrf.mxu1 }
 0x532   : > { %v7574_v1 = vadd.f32 %v7573_v14, %v7572_v8 }
 0x533   : > { %v7575_v17 = vpop.f32.mrf.mxu1 }
 0x534   : > { %v6512_v19 = vadd.f32 %v7574_v1, %v7451_v13  ;;  %v7553_v23 = vpop.f32.mrf.mxu0 }
 0x535   : > { %v7576_v4 = vpop.f32.mrf.mxu1 }
 0x536   : > { %7627 = vmatmul.mubr.msk.f32.vlgmr.msra.gmra.mxu0 %vm4323_vm5, %v6512_v19  ;;  %v7554_v33 = vpop.f32.mrf.mxu0 }
 0x537   : > { %v7555_v30 = vadd.f32 %v7554_v33, %v7553_v23 }
 0x539   : > { %v6329_v51 = vadd.f32 %v7555_v30, %v7449_v10 }
 0x53b   : > { %v7450_v40 = vmul.f32 -1.442695, %v6329_v51 }
 0x53d   : > { %8275 = vpow2.f32 %v7450_v40 }
 0x54a   : > { %v8276_v20 = vpop.eup %8275 }
 0x54b   : > { %v6335_v3 = vadd.f32 1.0, %v8276_v20 }
 0x54d   : > { %8277 = vrcp.f32 %v6335_v3 }
 0x55a   : > { %v8278_v11 = vpop.eup %8277 }
 0x55b   : > { %6339 = vst.msk [vmem:[%s10189_s15] sm:$0xf] %vm6338_vm7, %v8278_v11 }
 0x5f6   : > { %v6590_v28 = vpop.f32.mrf.mxu0 }
 0x5f7   : > { %v6595_v27 = vsel %vm6594_vm8, %v6590_v28, -inf  ;;  %v6612_v29 = vsel %vm6611_vm9, %v6590_v28, 0.0 }
 0x5f8   : > { %6596 = vmax.xlane.f32.xlu0 %v6595_v27  ;;  %v7628_v46 = vpop.f32.mrf.mxu0  ;;  %v6613_v37 = vsel %vm6594_vm8, %v6612_v29, 0.0 }
 0x5f9   : > { %6614 = vadd.xlane.f32.xlu1 %v6613_v37 }
 0x681   : > { %v6597_v36 = vpop.xlane.xlu0 %6596 }
 0x682   : > { %v6598_v38 = vsub.f32 %v6590_v28, %v6597_v36  ;;  %v6615_v24 = vpop.xlane.xlu1 %6614 }
 0x684   : > { %v6599_v48 = vmul.f32 1.442695, %v6598_v38 }
 0x686   : > { %8279 = vpow2.f32 %v6599_v48 }
 0x693   : > { %v8280_v44 = vpop.eup %8279 }
 0x694   : > { %v6601_v50 = vsel %vm6594_vm8, %v8280_v44, 0.0 }
 0x695   : > { %6602 = vadd.xlane.f32.xlu0 %v6601_v50 }
 0x71e   : > { %v6603_v49 = vpop.xlane.xlu0 %6602 }
 0x71f   : > { %8281 = vlog2.f32 %v6603_v49 }
 0x72c   : > { %v8282_v21 = vpop.eup %8281 }
 0x72d   : > { %v6605_v55 = vmul.f32 0.6931472, %v8282_v21 }
 0x72f   : > { %v6606_v41 = vadd.f32 %v6605_v55, %v6597_v36 }
 0x731   : > { %v6616_v53 = vsub.f32 %v6606_v41, %v6615_v24 }
 0x733   : > { %v6618_v18 = vsel %vm6617_vm10, %v6616_v53, 0.0 }
 0x734   : > { %v6619_v26 = vrot.slane %v6618_v18, 4 }
 0x736   : > { %v6620_v39 = vadd.f32 %v6619_v26, %v6618_v18 }
 0x738   : > { %v6621_v31 = vrot.slane %v6620_v39, 2 }
 0x73a   : > { %v6622_v59 = vadd.f32 %v6621_v31, %v6620_v39 }
 0x73c   : > { %v6623_v54 = vrot.slane %v6622_v59, 1 }
 0x73e   : > { %v6624_v56 = vadd.f32 %v6623_v54, %v6622_v59 }
 0x740   : > { %v6626_v9 = vmul.f32 0.25, %v6624_v56 }
 0x742   : > { %6628 = vst.msk [vmem:[#allocation6] sm:$0x1] %vm6627_vm11, %v6626_v9 }
 0x743 PF: > { %p7634_p6 = scmp.eq.s32.totalorder %s8420_s24, 3  ;;  %s8325_s19 = smov [#allocation6]  }
 0x744   : > { %s6639_s20 = sshll.u32 %s8325_s19, 4  ;;  %s6640_s20 = int_to_ptr.vmem [resolvable:$true] %s6639_s20 }
 0x745   : > { %s8283_s28 = scalar_lea.vmem %s6640_s20, 16  ;;  %s8289_s21 = scalar_lea.vmem %s6640_s20, 32 }
 0x746   : > { %p8284_p7 = scmp.ne.s32.totalorder %s6640_s20, %s8283_s28  ;;  %p8290_p10 = scmp.lt.s32.totalorder %s6640_s20, %s6640_s20 }
 0x747   : > { %p8291_p11 = scmp.lt.s32.totalorder %s8289_s21, %s8283_s28 }
 0x748   : > { %p8285_p8 = pnand %p8284_p7, %p7634_p6 }
 0x749   : > { %p8292_p12 = por %p8291_p11, %p8290_p10 }
 0x74a   : > { %p8286_p9 = pneg %p8285_p8 }
 0x74c   : > { %p8293_p13 = pnand %p8292_p12, %p8286_p9 }
 0x74e   : > { %8296 = shalt.err (!%p8293_p13)
}
 0x74f   : > { %7631 = dma.vmem_to_hbm [thread:$0]  (%p7634_p6), %s6640_s20, 16, %s10190_s16, [#allocation7]  }
 0x750   : > { %8312 = dma.done.wait (%p7634_p6), [#allocation7], 16  }
 0x751   : > { %8314 = vsyncadd (%p7634_p6), [#allocation7], 4294967280 }
 0x752 PF: > { %s30_s23 = sadd.s32 1, %s8317_s23  }
 0x753   : > { %p27_p0 = scmp.ge.s32.totalorder %s30_s23, 6  }
 0x755   :  { %29 = sbr.rel (!%p27_p0) target bundleno = 4 (0x4), region = 196 }
 0x75a   :  { %6655 = vsyncpa [#allocation7], 1 }
 0x75b   :  { %6657 = vsyncpa [#allocation7 + $0x1], 1 }

</bundles_post_ra>
